<compile_context>
chip_gen: v7x
topology: tpu7x:2x2x1
jax: 0.10.0
libtpu: 0.0.40
codegen_flags: <defaults>
</compile_context>

<pallas_src>
import jax
import jax.numpy as jnp
from jax import lax
from jax.experimental import pallas as pl
from jax.experimental.pallas import tpu as pltpu

BN_EPS = 1e-5                       # PyTorch BatchNorm2d default eps
VMEM_LIMIT = 32 * 1024 * 1024       # safe scoped-VMEM budget across v5e/v6e/v7x


# --------------------------------------------------------------------------
# helpers
# --------------------------------------------------------------------------
def _pick_row_tile(H, cap=16):
    """Largest multiple of 4 that divides H and is <= cap."""
    t = min(H, cap)
    t -= t % 4
    while t > 4:
        if H % t == 0:
            return t
        t -= 4
    return 4


def _choose_ktile(D):
    """Largest 128-aligned divisor of D (<=512) for K tiling; else one block."""
    for t in (512, 384, 256, 128):
        if D % t == 0:
            return t
    # No aligned divisor (or D small): single K block.  Fine for small D.
    return D


def _fold_bn(conv_b, gamma, beta, mean, var):
    scale = gamma / jnp.sqrt(var + BN_EPS)
    bias = (conv_b - mean) * scale + beta
    return scale.reshape(1, -1), bias.reshape(1, -1)


# --------------------------------------------------------------------------
# Fused Conv(5x5, pad=2) + folded BN + ReLU + MaxPool(4,4) kernel
#   grid = (num_images,), in-kernel loop over row tiles (with +4-row halo)
# --------------------------------------------------------------------------
def _make_conv_stage_kernel(H, W, C_in, C_out, row_tile):
    H4, W4 = H // 4, W // 4
    TH = row_tile                      # multiple of 4, divides H
    TH4 = TH // 4
    n_chunks = H // TH
    K = 25 * C_in

    def kernel(xp_ref, w_ref, scale_ref, bias_ref, out_ref, col_ref):
        # xp_ref : (1, H+4, W+4, C_in) padded image (VMEM, auto-pipelined)
        # w_ref  : (25*C_in, C_out) im2col weight
        # out_ref: (1, H4, W4*C_out)  lane-dense output block
        # col_ref: (TH*W, 25*C_in) bf16 im2col scratch
        w = w_ref[...].astype(jnp.bfloat16)
        scale = scale_ref[...]                 # (1, C_out) f32
        bias = bias_ref[...]                   # (1, C_out) f32

        def chunk(ci, carry):
            r0 = ci * TH
            # Row tile + conv halo, sliced from the VMEM-resident padded image.
            slab = xp_ref[:, pl.ds(r0, TH + 4), :, :]      # (1, TH+4, W+4, C_in)
            # im2col: 25 shifted taps written once at static lane offsets.
            for dy in range(5):
                for dx in range(5):
                    t = dy * 5 + dx
                    tap = slab[:, dy:dy + TH, dx:dx + W, :]
                    col_ref[:, t * C_in:(t + 1) * C_in] = (
                        tap.reshape(TH * W, C_in).astype(jnp.bfloat16))
            # Single MXU matmul per row tile (K = 25*C_in), f32 accumulation.
            acc = jnp.dot(col_ref[...], w,
                          preferred_element_type=jnp.float32)   # (TH*W, C_out)
            # Folded eval-mode BatchNorm (+conv bias) and ReLU.
            y = jnp.maximum(acc * scale + bias, 0.0)
            # MaxPool 4x4 stride 4: pool W, then H (static slices + maxima).
            yw = y.reshape(TH * W4, 4, C_out)
            pw = jnp.maximum(jnp.maximum(yw[:, 0, :], yw[:, 1, :]),
                             jnp.maximum(yw[:, 2, :], yw[:, 3, :]))
            ph = pw.reshape(TH4, 4 * W4, C_out)
            pooled = jnp.maximum(
                jnp.maximum(ph[:, 0 * W4:1 * W4, :], ph[:, 1 * W4:2 * W4, :]),
                jnp.maximum(ph[:, 2 * W4:3 * W4, :], ph[:, 3 * W4:4 * W4, :]))
            # Lane-dense store: last dim is W4*C_out, not C_out.
            out_ref[:, pl.ds(ci * TH4, TH4), :] = (
                pooled.reshape(1, TH4, W4 * C_out).astype(out_ref.dtype))
            return carry

        lax.fori_loop(0, n_chunks, chunk, 0)

    return kernel


def conv_bn_relu_pool(x_nhwc, w_hwio, scale, bias):
    B2, H, W, C_in = x_nhwc.shape
    C_out = w_hwio.shape[-1]
    assert H % 4 == 0 and W % 4 == 0, (H, W)
    TH = _pick_row_tile(H)
    H4, W4 = H // 4, W // 4
    K = 25 * C_in
    # NOTE: wrapper-side zero pad keeps every DMA shape static; the row halo is
    # sliced out of the VMEM-resident padded image inside the kernel.
    xp = jnp.pad(x_nhwc, ((0, 0), (2, 2), (2, 2), (0, 0)))
    w2 = w_hwio.reshape(K, C_out)                     # (dy, dx, c_in) row order

    out = pl.pallas_call(
        _make_conv_stage_kernel(H, W, C_in, C_out, TH),
        out_shape=jax.ShapeDtypeStruct((B2, H4, W4 * C_out), x_nhwc.dtype),
        grid=(B2,),
        in_specs=[
            pl.BlockSpec((1, H + 4, W + 4, C_in), lambda b: (b, 0, 0, 0)),
            pl.BlockSpec((K, C_out), lambda b: (0, 0)),
            pl.BlockSpec((1, C_out), lambda b: (0, 0)),
            pl.BlockSpec((1, C_out), lambda b: (0, 0)),
        ],
        out_specs=pl.BlockSpec((1, H4, W4 * C_out), lambda b: (b, 0, 0)),
        scratch_shapes=[pltpu.VMEM((TH * W, K), jnp.bfloat16)],
        compiler_params=pltpu.CompilerParams(
            dimension_semantics=("parallel",),
            vmem_limit_bytes=VMEM_LIMIT),
    )(xp, w2, scale, bias)
    return out.reshape(B2, H4, W4, C_out)             # free: same memory order


# --------------------------------------------------------------------------
# "Dual" Linear: consumes the (2B, D) feature slab directly (left rows 0..B-1,
# right rows B..2B-1) with a (2, D, N) weight -> equivalent to concat + Linear.
# K-tiled with a VMEM accumulator, pl.when init/finalize, bf16 MXU operands.
# --------------------------------------------------------------------------
def _make_dual_linear_kernel(B, apply_relu):
    def kernel(x_ref, w_ref, b_ref, o_ref, acc_ref):
        k = pl.program_id(0)

        @pl.when(k == 0)
        def _init():
            acc_ref[...] = jnp.zeros_like(acc_ref)

        xl = x_ref[:B, :].astype(jnp.bfloat16)
        xr = x_ref[B:, :].astype(jnp.bfloat16)
        acc_ref[...] += (
            jnp.dot(xl, w_ref[0].astype(jnp.bfloat16),
                    preferred_element_type=jnp.float32)
            + jnp.dot(xr, w_ref[1].astype(jnp.bfloat16),
                      preferred_element_type=jnp.float32))

        @pl.when(k == pl.num_programs(0) - 1)
        def _finalize():
            y = acc_ref[...] + b_ref[...].astype(jnp.float32)
            if apply_relu:
                y = jnp.maximum(y, 0.0)
            o_ref[...] = y.astype(o_ref.dtype)

    return kernel


def dual_linear(x2b, w3, b, *, apply_relu=False):
    B2, D = x2b.shape
    B = B2 // 2
    N = w3.shape[-1]
    tk = _choose_ktile(D)
    return pl.pallas_call(
        _make_dual_linear_kernel(B, apply_relu),
        out_shape=jax.ShapeDtypeStruct((B, N), x2b.dtype),
        grid=(D // tk,),
        in_specs=[
            pl.BlockSpec((B2, tk), lambda k: (0, k)),
            pl.BlockSpec((2, tk, N), lambda k: (0, k, 0)),
            pl.BlockSpec((1, N), lambda k: (0, 0)),
        ],
        out_specs=pl.BlockSpec((B, N), lambda k: (0, 0)),
        scratch_shapes=[pltpu.VMEM((B, N), jnp.float32)],
        compiler_params=pltpu.CompilerParams(
            dimension_semantics=("arbitrary",),
            vmem_limit_bytes=VMEM_LIMIT),
    )(x2b, w3, b.reshape(1, N))


# --------------------------------------------------------------------------
# Small fused Linear (+ optional ReLU) for the hidden->out layer
# --------------------------------------------------------------------------
def _make_linear_kernel(apply_relu):
    def kernel(x_ref, w_ref, b_ref, o_ref):
        y = jnp.dot(x_ref[...].astype(jnp.bfloat16),
                    w_ref[...].astype(jnp.bfloat16),
                    preferred_element_type=jnp.float32)
        y = y + b_ref[...].astype(jnp.float32)
        if apply_relu:
            y = jnp.maximum(y, 0.0)
        o_ref[...] = y.astype(o_ref.dtype)
    return kernel


def linear(x, w, b, *, apply_relu=False):
    B, K = x.shape
    N = w.shape[-1]
    return pl.pallas_call(
        _make_linear_kernel(apply_relu),
        out_shape=jax.ShapeDtypeStruct((B, N), x.dtype),
        in_specs=[
            pl.BlockSpec((B, K), lambda: (0, 0)),
            pl.BlockSpec((K, N), lambda: (0, 0)),
            pl.BlockSpec((1, N), lambda: (0, 0)),
        ],
        out_specs=pl.BlockSpec((B, N), lambda: (0, 0)),
        compiler_params=pltpu.CompilerParams(vmem_limit_bytes=VMEM_LIMIT),
    )(x, w, b.reshape(1, N))


# --------------------------------------------------------------------------
# Forward pass wrapper
# --------------------------------------------------------------------------
def cnn_model3_forward(left_x, right_x, params):
    """Eval-mode forward pass of CNNModel3. left_x/right_x are NCHW (B, 1, H, W)."""
    B, C, H, W = left_x.shape
    assert C == 1, "CNNModel3 expects single-channel inputs"
    assert H % 16 == 0 and W % 16 == 0, "two MaxPool(4,4) stages need H,W % 16 == 0"

    # Stack left/right on the batch axis so the shared CNN runs once per stage.
    # With C == 1 the NCHW -> NHWC conversion is a pure (free) reshape.
    x = jnp.concatenate([left_x, right_x], axis=0).reshape(2 * B, H, W, 1)

    s1, b1 = _fold_bn(params["conv1_b"], params["bn1_gamma"], params["bn1_beta"],
                      params["bn1_mean"], params["bn1_var"])
    x = conv_bn_relu_pool(x, params["conv1_w"], s1, b1)        # (2B, H/4,  W/4,  16)

    s2, b2 = _fold_bn(params["conv2_b"], params["bn2_gamma"], params["bn2_beta"],
                      params["bn2_mean"], params["bn2_var"])
    x = conv_bn_relu_pool(x, params["conv2_w"], s2, b2)        # (2B, H/16, W/16, 32)

    H16, W16, C2 = x.shape[1], x.shape[2], x.shape[3]
    D = H16 * W16 * C2
    flat = x.reshape(2 * B, D)                                 # NHWC flatten (no relayout)

    # Hoist the NCHW flatten + left/right concat into the FC weights: permute
    # weight rows from torch's NCHW-flatten order to NHWC order and keep the
    # (left, right) halves as a leading axis of size 2.
    perm = jnp.transpose(
        jnp.arange(D, dtype=jnp.int32).reshape(C2, H16, W16), (1, 2, 0)).reshape(-1)

    # nn.Dropout layers are identities in eval mode.
    if params.get("fc_hid_w") is not None:
        w3 = params["fc_hid_w"].reshape(2, D, -1)[:, perm, :]
        hid = dual_linear(flat, w3, params["fc_hid_b"], apply_relu=True)
        out = linear(hid, params["fc_w"], params["fc_b"], apply_relu=False)
    else:
        w3 = params["fc_w"].reshape(2, D, -1)[:, perm, :]
        out = dual_linear(flat, w3, params["fc_b"], apply_relu=False)
    return out


# --------------------------------------------------------------------------
# Pure-JAX reference for a correctness sanity check
# --------------------------------------------------------------------------
def _reference(left_x, right_x, p):
    def block(x, w, cb, g, bt, m, v):
        y = lax.conv_general_dilated(
            x, w, window_strides=(1, 1), padding=((2, 2), (2, 2)),
            dimension_numbers=("NHWC", "HWIO", "NHWC"),
            precision=lax.Precision.HIGHEST)
        y = y + cb.reshape(1, 1, 1, -1)
        y = (y - m.reshape(1, 1, 1, -1)) * (
            g.reshape(1, 1, 1, -1) / jnp.sqrt(v.reshape(1, 1, 1, -1) + BN_EPS)
        ) + bt.reshape(1, 1, 1, -1)
        y = jnp.maximum(y, 0.0)
        y = lax.reduce_window(y, -jnp.inf, lax.max,
                              (1, 4, 4, 1), (1, 4, 4, 1), "VALID")
        return y

    def cnn(x_nchw):
        x = jnp.transpose(x_nchw, (0, 2, 3, 1))
        x = block(x, p["conv1_w"], p["conv1_b"], p["bn1_gamma"], p["bn1_beta"],
                  p["bn1_mean"], p["bn1_var"])
        x = block(x, p["conv2_w"], p["conv2_b"], p["bn2_gamma"], p["bn2_beta"],
                  p["bn2_mean"], p["bn2_var"])
        return jnp.transpose(x, (0, 3, 1, 2)).reshape(x.shape[0], -1)   # NCHW flatten

    feats = jnp.concatenate([cnn(left_x), cnn(right_x)], axis=1)
    hid = jnp.maximum(
        jnp.dot(feats, p["fc_hid_w"], precision=lax.Precision.HIGHEST)
        + p["fc_hid_b"], 0.0)
    return jnp.dot(hid, p["fc_w"], precision=lax.Precision.HIGHEST) + p["fc_b"]


if __name__ == "__main__":
    # Small shapes consistent with the module (spatial dims divisible by 16
    # so two MaxPool(4,4) stages work, like the 752x480 in the original).
    B, C_IN, H, W = 2, 1, 16, 16
    HIDDEN_DIM, OUT_DIM = 16, 8
    cnn_out_dim = 32 * (H // 16) * (W // 16)      # mirrors int(32*(752/16)*(480/16))

    key = jax.random.PRNGKey(0)
    ks = jax.random.split(key, 18)
    f32 = jnp.float32

    left_x = jax.random.normal(ks[0], (B, C_IN, H, W), f32)
    right_x = jax.random.normal(ks[1], (B, C_IN, H, W), f32)

    params = dict(
        conv1_w=jax.random.normal(ks[2], (5, 5, 1, 16), f32) * 0.2,
        conv1_b=jax.random.normal(ks[3], (16,), f32) * 0.1,
        bn1_gamma=1.0 + 0.1 * jax.random.normal(ks[4], (16,), f32),
        bn1_beta=0.1 * jax.random.normal(ks[5], (16,), f32),
        bn1_mean=0.1 * jax.random.normal(ks[6], (16,), f32),
        bn1_var=1.0 + 0.1 * jnp.abs(jax.random.normal(ks[7], (16,), f32)),
        conv2_w=jax.random.normal(ks[8], (5, 5, 16, 32), f32) * 0.05,
        conv2_b=jax.random.normal(ks[9], (32,), f32) * 0.1,
        bn2_gamma=1.0 + 0.1 * jax.random.normal(ks[10], (32,), f32),
        bn2_beta=0.1 * jax.random.normal(ks[11], (32,), f32),
        bn2_mean=0.1 * jax.random.normal(ks[12], (32,), f32),
        bn2_var=1.0 + 0.1 * jnp.abs(jax.random.normal(ks[13], (32,), f32)),
        fc_hid_w=jax.random.normal(ks[14], (2 * cnn_out_dim, HIDDEN_DIM), f32) * 0.1,
        fc_hid_b=0.1 * jax.random.normal(ks[15], (HIDDEN_DIM,), f32),
        fc_w=jax.random.normal(ks[16], (HIDDEN_DIM, OUT_DIM), f32) * 0.2,
        fc_b=0.1 * jax.random.normal(ks[17], (OUT_DIM,), f32),
    )

    fwd = jax.jit(cnn_model3_forward)
    out = jax.block_until_ready(fwd(left_x, right_x, params))
    ref = jax.block_until_ready(_reference(left_x, right_x, params))

    assert out.shape == (B, OUT_DIM), out.shape
    # bf16 MXU operands (f32 accumulation) => slightly looser tolerance than pure f32.
    assert jnp.allclose(out, ref, rtol=5e-2, atol=5e-2), (out, ref)
    print("KERNEL_OK")
</pallas_src>

<mosaic_0001>
module attributes {stable_mosaic.version = 11 : i64} {
  func.func @kernel(%arg0: i32, %arg1: memref<1x20x20x1xf32, #tpu.memory_space<vmem>>, %arg2: memref<25x16xf32, #tpu.memory_space<vmem>>, %arg3: memref<1x16xf32, #tpu.memory_space<vmem>>, %arg4: memref<1x16xf32, #tpu.memory_space<vmem>>, %arg5: memref<1x4x64xf32, #tpu.memory_space<vmem>>, %arg6: memref<256x25xbf16, #tpu.memory_space<vmem>>) attributes {dimension_semantics = [#tpu.dimension_semantics<parallel>], iteration_bounds = array<i64: 4>, scalar_prefetch = 0 : i64, scratch_operands = 1 : i64, tpu.core_type = #tpu.core_type<tc>, window_params = [{transform_indices = @transform_0, window_bounds = array<i64: 1, 20, 20, 1>}, {pipeline_mode = #tpu.pipeline_mode<synchronous>, transform_indices = @transform_1, window_bounds = array<i64: 25, 16>}, {pipeline_mode = #tpu.pipeline_mode<synchronous>, transform_indices = @transform_2, window_bounds = array<i64: 1, 16>}, {pipeline_mode = #tpu.pipeline_mode<synchronous>, transform_indices = @transform_3, window_bounds = array<i64: 1, 16>}, {transform_indices = @transform_4, window_bounds = array<i64: 1, 4, 64>}]} {
    %c0 = arith.constant 0 : index
    %c0_0 = arith.constant 0 : index
    %0 = vector.load %arg2[%c0, %c0_0] : memref<25x16xf32, #tpu.memory_space<vmem>>, vector<25x16xf32>
    %1 = arith.truncf %0 : vector<25x16xf32> to vector<25x16xbf16>
    %c0_1 = arith.constant 0 : index
    %c0_2 = arith.constant 0 : index
    %2 = vector.load %arg3[%c0_1, %c0_2] : memref<1x16xf32, #tpu.memory_space<vmem>>, vector<1x16xf32>
    %c0_3 = arith.constant 0 : index
    %c0_4 = arith.constant 0 : index
    %3 = vector.load %arg4[%c0_3, %c0_4] : memref<1x16xf32, #tpu.memory_space<vmem>>, vector<1x16xf32>
    %c0_i32 = arith.constant 0 : i32
    %c16_i32 = arith.constant 16 : i32
    %4 = arith.muli %c0_i32, %c16_i32 : i32
    %c0_5 = arith.constant 0 : index
    %5 = arith.index_cast %4 : i32 to index
    %c0_6 = arith.constant 0 : index
    %c0_7 = arith.constant 0 : index
    %6 = vector.load %arg1[%c0_5, %5, %c0_6, %c0_7] : memref<1x20x20x1xf32, #tpu.memory_space<vmem>>, vector<1x20x20x1xf32>
    %7 = vector.extract_strided_slice %6 {offsets = [0, 0, 0, 0], sizes = [1, 16, 16, 1], strides = [1, 1, 1, 1]} : vector<1x20x20x1xf32> to vector<1x16x16x1xf32>
    %8 = vector.shape_cast %7 : vector<1x16x16x1xf32> to vector<256x1xf32>
    %9 = arith.truncf %8 : vector<256x1xf32> to vector<256x1xbf16>
    %c0_8 = arith.constant 0 : index
    %c0_9 = arith.constant 0 : index
    %10 = vector.load %arg6[%c0_8, %c0_9] : memref<256x25xbf16, #tpu.memory_space<vmem>>, vector<256x1xbf16>
    tpu.vector_store %arg6[%c0_8, %c0_9], %9 {strides = array<i32>} : memref<256x25xbf16, #tpu.memory_space<vmem>>, vector<256x1xbf16>,
    %11 = vector.extract_strided_slice %6 {offsets = [0, 0, 1, 0], sizes = [1, 16, 16, 1], strides = [1, 1, 1, 1]} : vector<1x20x20x1xf32> to vector<1x16x16x1xf32>
    %12 = vector.shape_cast %11 : vector<1x16x16x1xf32> to vector<256x1xf32>
    %13 = arith.truncf %12 : vector<256x1xf32> to vector<256x1xbf16>
    %c0_10 = arith.constant 0 : index
    %c1 = arith.constant 1 : index
    %14 = vector.load %arg6[%c0_10, %c1] : memref<256x25xbf16, #tpu.memory_space<vmem>>, vector<256x1xbf16>
    tpu.vector_store %arg6[%c0_10, %c1], %13 {strides = array<i32>} : memref<256x25xbf16, #tpu.memory_space<vmem>>, vector<256x1xbf16>,
    %15 = vector.extract_strided_slice %6 {offsets = [0, 0, 2, 0], sizes = [1, 16, 16, 1], strides = [1, 1, 1, 1]} : vector<1x20x20x1xf32> to vector<1x16x16x1xf32>
    %16 = vector.shape_cast %15 : vector<1x16x16x1xf32> to vector<256x1xf32>
    %17 = arith.truncf %16 : vector<256x1xf32> to vector<256x1xbf16>
    %c0_11 = arith.constant 0 : index
    %c2 = arith.constant 2 : index
    %18 = vector.load %arg6[%c0_11, %c2] : memref<256x25xbf16, #tpu.memory_space<vmem>>, vector<256x1xbf16>
    tpu.vector_store %arg6[%c0_11, %c2], %17 {strides = array<i32>} : memref<256x25xbf16, #tpu.memory_space<vmem>>, vector<256x1xbf16>,
    %19 = vector.extract_strided_slice %6 {offsets = [0, 0, 3, 0], sizes = [1, 16, 16, 1], strides = [1, 1, 1, 1]} : vector<1x20x20x1xf32> to vector<1x16x16x1xf32>
    %20 = vector.shape_cast %19 : vector<1x16x16x1xf32> to vector<256x1xf32>
    %21 = arith.truncf %20 : vector<256x1xf32> to vector<256x1xbf16>
    %c0_12 = arith.constant 0 : index
    %c3 = arith.constant 3 : index
    %22 = vector.load %arg6[%c0_12, %c3] : memref<256x25xbf16, #tpu.memory_space<vmem>>, vector<256x1xbf16>
    tpu.vector_store %arg6[%c0_12, %c3], %21 {strides = array<i32>} : memref<256x25xbf16, #tpu.memory_space<vmem>>, vector<256x1xbf16>,
    %23 = vector.extract_strided_slice %6 {offsets = [0, 0, 4, 0], sizes = [1, 16, 16, 1], strides = [1, 1, 1, 1]} : vector<1x20x20x1xf32> to vector<1x16x16x1xf32>
    %24 = vector.shape_cast %23 : vector<1x16x16x1xf32> to vector<256x1xf32>
    %25 = arith.truncf %24 : vector<256x1xf32> to vector<256x1xbf16>
    %c0_13 = arith.constant 0 : index
    %c4 = arith.constant 4 : index
    %26 = vector.load %arg6[%c0_13, %c4] : memref<256x25xbf16, #tpu.memory_space<vmem>>, vector<256x1xbf16>
    tpu.vector_store %arg6[%c0_13, %c4], %25 {strides = array<i32>} : memref<256x25xbf16, #tpu.memory_space<vmem>>, vector<256x1xbf16>,
    %27 = vector.extract_strided_slice %6 {offsets = [0, 1, 0, 0], sizes = [1, 16, 16, 1], strides = [1, 1, 1, 1]} : vector<1x20x20x1xf32> to vector<1x16x16x1xf32>
    %28 = vector.shape_cast %27 : vector<1x16x16x1xf32> to vector<256x1xf32>
    %29 = arith.truncf %28 : vector<256x1xf32> to vector<256x1xbf16>
    %c0_14 = arith.constant 0 : index
    %c5 = arith.constant 5 : index
    %30 = vector.load %arg6[%c0_14, %c5] : memref<256x25xbf16, #tpu.memory_space<vmem>>, vector<256x1xbf16>
    tpu.vector_store %arg6[%c0_14, %c5], %29 {strides = array<i32>} : memref<256x25xbf16, #tpu.memory_space<vmem>>, vector<256x1xbf16>,
    %31 = vector.extract_strided_slice %6 {offsets = [0, 1, 1, 0], sizes = [1, 16, 16, 1], strides = [1, 1, 1, 1]} : vector<1x20x20x1xf32> to vector<1x16x16x1xf32>
    %32 = vector.shape_cast %31 : vector<1x16x16x1xf32> to vector<256x1xf32>
    %33 = arith.truncf %32 : vector<256x1xf32> to vector<256x1xbf16>
    %c0_15 = arith.constant 0 : index
    %c6 = arith.constant 6 : index
    %34 = vector.load %arg6[%c0_15, %c6] : memref<256x25xbf16, #tpu.memory_space<vmem>>, vector<256x1xbf16>
    tpu.vector_store %arg6[%c0_15, %c6], %33 {strides = array<i32>} : memref<256x25xbf16, #tpu.memory_space<vmem>>, vector<256x1xbf16>,
    %35 = vector.extract_strided_slice %6 {offsets = [0, 1, 2, 0], sizes = [1, 16, 16, 1], strides = [1, 1, 1, 1]} : vector<1x20x20x1xf32> to vector<1x16x16x1xf32>
    %36 = vector.shape_cast %35 : vector<1x16x16x1xf32> to vector<256x1xf32>
    %37 = arith.truncf %36 : vector<256x1xf32> to vector<256x1xbf16>
    %c0_16 = arith.constant 0 : index
    %c7 = arith.constant 7 : index
    %38 = vector.load %arg6[%c0_16, %c7] : memref<256x25xbf16, #tpu.memory_space<vmem>>, vector<256x1xbf16>
    tpu.vector_store %arg6[%c0_16, %c7], %37 {strides = array<i32>} : memref<256x25xbf16, #tpu.memory_space<vmem>>, vector<256x1xbf16>,
    %39 = vector.extract_strided_slice %6 {offsets = [0, 1, 3, 0], sizes = [1, 16, 16, 1], strides = [1, 1, 1, 1]} : vector<1x20x20x1xf32> to vector<1x16x16x1xf32>
    %40 = vector.shape_cast %39 : vector<1x16x16x1xf32> to vector<256x1xf32>
    %41 = arith.truncf %40 : vector<256x1xf32> to vector<256x1xbf16>
    %c0_17 = arith.constant 0 : index
    %c8 = arith.constant 8 : index
    %42 = vector.load %arg6[%c0_17, %c8] : memref<256x25xbf16, #tpu.memory_space<vmem>>, vector<256x1xbf16>
    tpu.vector_store %arg6[%c0_17, %c8], %41 {strides = array<i32>} : memref<256x25xbf16, #tpu.memory_space<vmem>>, vector<256x1xbf16>,
    %43 = vector.extract_strided_slice %6 {offsets = [0, 1, 4, 0], sizes = [1, 16, 16, 1], strides = [1, 1, 1, 1]} : vector<1x20x20x1xf32> to vector<1x16x16x1xf32>
    %44 = vector.shape_cast %43 : vector<1x16x16x1xf32> to vector<256x1xf32>
    %45 = arith.truncf %44 : vector<256x1xf32> to vector<256x1xbf16>
    %c0_18 = arith.constant 0 : index
    %c9 = arith.constant 9 : index
    %46 = vector.load %arg6[%c0_18, %c9] : memref<256x25xbf16, #tpu.memory_space<vmem>>, vector<256x1xbf16>
    tpu.vector_store %arg6[%c0_18, %c9], %45 {strides = array<i32>} : memref<256x25xbf16, #tpu.memory_space<vmem>>, vector<256x1xbf16>,
    %47 = vector.extract_strided_slice %6 {offsets = [0, 2, 0, 0], sizes = [1, 16, 16, 1], strides = [1, 1, 1, 1]} : vector<1x20x20x1xf32> to vector<1x16x16x1xf32>
    %48 = vector.shape_cast %47 : vector<1x16x16x1xf32> to vector<256x1xf32>
    %49 = arith.truncf %48 : vector<256x1xf32> to vector<256x1xbf16>
    %c0_19 = arith.constant 0 : index
    %c10 = arith.constant 10 : index
    %50 = vector.load %arg6[%c0_19, %c10] : memref<256x25xbf16, #tpu.memory_space<vmem>>, vector<256x1xbf16>
    tpu.vector_store %arg6[%c0_19, %c10], %49 {strides = array<i32>} : memref<256x25xbf16, #tpu.memory_space<vmem>>, vector<256x1xbf16>,
    %51 = vector.extract_strided_slice %6 {offsets = [0, 2, 1, 0], sizes = [1, 16, 16, 1], strides = [1, 1, 1, 1]} : vector<1x20x20x1xf32> to vector<1x16x16x1xf32>
    %52 = vector.shape_cast %51 : vector<1x16x16x1xf32> to vector<256x1xf32>
    %53 = arith.truncf %52 : vector<256x1xf32> to vector<256x1xbf16>
    %c0_20 = arith.constant 0 : index
    %c11 = arith.constant 11 : index
    %54 = vector.load %arg6[%c0_20, %c11] : memref<256x25xbf16, #tpu.memory_space<vmem>>, vector<256x1xbf16>
    tpu.vector_store %arg6[%c0_20, %c11], %53 {strides = array<i32>} : memref<256x25xbf16, #tpu.memory_space<vmem>>, vector<256x1xbf16>,
    %55 = vector.extract_strided_slice %6 {offsets = [0, 2, 2, 0], sizes = [1, 16, 16, 1], strides = [1, 1, 1, 1]} : vector<1x20x20x1xf32> to vector<1x16x16x1xf32>
    %56 = vector.shape_cast %55 : vector<1x16x16x1xf32> to vector<256x1xf32>
    %57 = arith.truncf %56 : vector<256x1xf32> to vector<256x1xbf16>
    %c0_21 = arith.constant 0 : index
    %c12 = arith.constant 12 : index
    %58 = vector.load %arg6[%c0_21, %c12] : memref<256x25xbf16, #tpu.memory_space<vmem>>, vector<256x1xbf16>
    tpu.vector_store %arg6[%c0_21, %c12], %57 {strides = array<i32>} : memref<256x25xbf16, #tpu.memory_space<vmem>>, vector<256x1xbf16>,
    %59 = vector.extract_strided_slice %6 {offsets = [0, 2, 3, 0], sizes = [1, 16, 16, 1], strides = [1, 1, 1, 1]} : vector<1x20x20x1xf32> to vector<1x16x16x1xf32>
    %60 = vector.shape_cast %59 : vector<1x16x16x1xf32> to vector<256x1xf32>
    %61 = arith.truncf %60 : vector<256x1xf32> to vector<256x1xbf16>
    %c0_22 = arith.constant 0 : index
    %c13 = arith.constant 13 : index
    %62 = vector.load %arg6[%c0_22, %c13] : memref<256x25xbf16, #tpu.memory_space<vmem>>, vector<256x1xbf16>
    tpu.vector_store %arg6[%c0_22, %c13], %61 {strides = array<i32>} : memref<256x25xbf16, #tpu.memory_space<vmem>>, vector<256x1xbf16>,
    %63 = vector.extract_strided_slice %6 {offsets = [0, 2, 4, 0], sizes = [1, 16, 16, 1], strides = [1, 1, 1, 1]} : vector<1x20x20x1xf32> to vector<1x16x16x1xf32>
    %64 = vector.shape_cast %63 : vector<1x16x16x1xf32> to vector<256x1xf32>
    %65 = arith.truncf %64 : vector<256x1xf32> to vector<256x1xbf16>
    %c0_23 = arith.constant 0 : index
    %c14 = arith.constant 14 : index
    %66 = vector.load %arg6[%c0_23, %c14] : memref<256x25xbf16, #tpu.memory_space<vmem>>, vector<256x1xbf16>
    tpu.vector_store %arg6[%c0_23, %c14], %65 {strides = array<i32>} : memref<256x25xbf16, #tpu.memory_space<vmem>>, vector<256x1xbf16>,
    %67 = vector.extract_strided_slice %6 {offsets = [0, 3, 0, 0], sizes = [1, 16, 16, 1], strides = [1, 1, 1, 1]} : vector<1x20x20x1xf32> to vector<1x16x16x1xf32>
    %68 = vector.shape_cast %67 : vector<1x16x16x1xf32> to vector<256x1xf32>
    %69 = arith.truncf %68 : vector<256x1xf32> to vector<256x1xbf16>
    %c0_24 = arith.constant 0 : index
    %c15 = arith.constant 15 : index
    %70 = vector.load %arg6[%c0_24, %c15] : memref<256x25xbf16, #tpu.memory_space<vmem>>, vector<256x1xbf16>
    tpu.vector_store %arg6[%c0_24, %c15], %69 {strides = array<i32>} : memref<256x25xbf16, #tpu.memory_space<vmem>>, vector<256x1xbf16>,
    %71 = vector.extract_strided_slice %6 {offsets = [0, 3, 1, 0], sizes = [1, 16, 16, 1], strides = [1, 1, 1, 1]} : vector<1x20x20x1xf32> to vector<1x16x16x1xf32>
    %72 = vector.shape_cast %71 : vector<1x16x16x1xf32> to vector<256x1xf32>
    %73 = arith.truncf %72 : vector<256x1xf32> to vector<256x1xbf16>
    %c0_25 = arith.constant 0 : index
    %c16 = arith.constant 16 : index
    %74 = vector.load %arg6[%c0_25, %c16] : memref<256x25xbf16, #tpu.memory_space<vmem>>, vector<256x1xbf16>
    tpu.vector_store %arg6[%c0_25, %c16], %73 {strides = array<i32>} : memref<256x25xbf16, #tpu.memory_space<vmem>>, vector<256x1xbf16>,
    %75 = vector.extract_strided_slice %6 {offsets = [0, 3, 2, 0], sizes = [1, 16, 16, 1], strides = [1, 1, 1, 1]} : vector<1x20x20x1xf32> to vector<1x16x16x1xf32>
    %76 = vector.shape_cast %75 : vector<1x16x16x1xf32> to vector<256x1xf32>
    %77 = arith.truncf %76 : vector<256x1xf32> to vector<256x1xbf16>
    %c0_26 = arith.constant 0 : index
    %c17 = arith.constant 17 : index
    %78 = vector.load %arg6[%c0_26, %c17] : memref<256x25xbf16, #tpu.memory_space<vmem>>, vector<256x1xbf16>
    tpu.vector_store %arg6[%c0_26, %c17], %77 {strides = array<i32>} : memref<256x25xbf16, #tpu.memory_space<vmem>>, vector<256x1xbf16>,
    %79 = vector.extract_strided_slice %6 {offsets = [0, 3, 3, 0], sizes = [1, 16, 16, 1], strides = [1, 1, 1, 1]} : vector<1x20x20x1xf32> to vector<1x16x16x1xf32>
    %80 = vector.shape_cast %79 : vector<1x16x16x1xf32> to vector<256x1xf32>
    %81 = arith.truncf %80 : vector<256x1xf32> to vector<256x1xbf16>
    %c0_27 = arith.constant 0 : index
    %c18 = arith.constant 18 : index
    %82 = vector.load %arg6[%c0_27, %c18] : memref<256x25xbf16, #tpu.memory_space<vmem>>, vector<256x1xbf16>
    tpu.vector_store %arg6[%c0_27, %c18], %81 {strides = array<i32>} : memref<256x25xbf16, #tpu.memory_space<vmem>>, vector<256x1xbf16>,
    %83 = vector.extract_strided_slice %6 {offsets = [0, 3, 4, 0], sizes = [1, 16, 16, 1], strides = [1, 1, 1, 1]} : vector<1x20x20x1xf32> to vector<1x16x16x1xf32>
    %84 = vector.shape_cast %83 : vector<1x16x16x1xf32> to vector<256x1xf32>
    %85 = arith.truncf %84 : vector<256x1xf32> to vector<256x1xbf16>
    %c0_28 = arith.constant 0 : index
    %c19 = arith.constant 19 : index
    %86 = vector.load %arg6[%c0_28, %c19] : memref<256x25xbf16, #tpu.memory_space<vmem>>, vector<256x1xbf16>
    tpu.vector_store %arg6[%c0_28, %c19], %85 {strides = array<i32>} : memref<256x25xbf16, #tpu.memory_space<vmem>>, vector<256x1xbf16>,
    %87 = vector.extract_strided_slice %6 {offsets = [0, 4, 0, 0], sizes = [1, 16, 16, 1], strides = [1, 1, 1, 1]} : vector<1x20x20x1xf32> to vector<1x16x16x1xf32>
    %88 = vector.shape_cast %87 : vector<1x16x16x1xf32> to vector<256x1xf32>
    %89 = arith.truncf %88 : vector<256x1xf32> to vector<256x1xbf16>
    %c0_29 = arith.constant 0 : index
    %c20 = arith.constant 20 : index
    %90 = vector.load %arg6[%c0_29, %c20] : memref<256x25xbf16, #tpu.memory_space<vmem>>, vector<256x1xbf16>
    tpu.vector_store %arg6[%c0_29, %c20], %89 {strides = array<i32>} : memref<256x25xbf16, #tpu.memory_space<vmem>>, vector<256x1xbf16>,
    %91 = vector.extract_strided_slice %6 {offsets = [0, 4, 1, 0], sizes = [1, 16, 16, 1], strides = [1, 1, 1, 1]} : vector<1x20x20x1xf32> to vector<1x16x16x1xf32>
    %92 = vector.shape_cast %91 : vector<1x16x16x1xf32> to vector<256x1xf32>
    %93 = arith.truncf %92 : vector<256x1xf32> to vector<256x1xbf16>
    %c0_30 = arith.constant 0 : index
    %c21 = arith.constant 21 : index
    %94 = vector.load %arg6[%c0_30, %c21] : memref<256x25xbf16, #tpu.memory_space<vmem>>, vector<256x1xbf16>
    tpu.vector_store %arg6[%c0_30, %c21], %93 {strides = array<i32>} : memref<256x25xbf16, #tpu.memory_space<vmem>>, vector<256x1xbf16>,
    %95 = vector.extract_strided_slice %6 {offsets = [0, 4, 2, 0], sizes = [1, 16, 16, 1], strides = [1, 1, 1, 1]} : vector<1x20x20x1xf32> to vector<1x16x16x1xf32>
    %96 = vector.shape_cast %95 : vector<1x16x16x1xf32> to vector<256x1xf32>
    %97 = arith.truncf %96 : vector<256x1xf32> to vector<256x1xbf16>
    %c0_31 = arith.constant 0 : index
    %c22 = arith.constant 22 : index
    %98 = vector.load %arg6[%c0_31, %c22] : memref<256x25xbf16, #tpu.memory_space<vmem>>, vector<256x1xbf16>
    tpu.vector_store %arg6[%c0_31, %c22], %97 {strides = array<i32>} : memref<256x25xbf16, #tpu.memory_space<vmem>>, vector<256x1xbf16>,
    %99 = vector.extract_strided_slice %6 {offsets = [0, 4, 3, 0], sizes = [1, 16, 16, 1], strides = [1, 1, 1, 1]} : vector<1x20x20x1xf32> to vector<1x16x16x1xf32>
    %100 = vector.shape_cast %99 : vector<1x16x16x1xf32> to vector<256x1xf32>
    %101 = arith.truncf %100 : vector<256x1xf32> to vector<256x1xbf16>
    %c0_32 = arith.constant 0 : index
    %c23 = arith.constant 23 : index
    %102 = vector.load %arg6[%c0_32, %c23] : memref<256x25xbf16, #tpu.memory_space<vmem>>, vector<256x1xbf16>
    tpu.vector_store %arg6[%c0_32, %c23], %101 {strides = array<i32>} : memref<256x25xbf16, #tpu.memory_space<vmem>>, vector<256x1xbf16>,
    %103 = vector.extract_strided_slice %6 {offsets = [0, 4, 4, 0], sizes = [1, 16, 16, 1], strides = [1, 1, 1, 1]} : vector<1x20x20x1xf32> to vector<1x16x16x1xf32>
    %104 = vector.shape_cast %103 : vector<1x16x16x1xf32> to vector<256x1xf32>
    %105 = arith.truncf %104 : vector<256x1xf32> to vector<256x1xbf16>
    %c0_33 = arith.constant 0 : index
    %c24 = arith.constant 24 : index
    %106 = vector.load %arg6[%c0_33, %c24] : memref<256x25xbf16, #tpu.memory_space<vmem>>, vector<256x1xbf16>
    tpu.vector_store %arg6[%c0_33, %c24], %105 {strides = array<i32>} : memref<256x25xbf16, #tpu.memory_space<vmem>>, vector<256x1xbf16>,
    %c0_34 = arith.constant 0 : index
    %c0_35 = arith.constant 0 : index
    %107 = vector.load %arg6[%c0_34, %c0_35] : memref<256x25xbf16, #tpu.memory_space<vmem>>, vector<256x25xbf16>
    %cst = arith.constant dense<0.000000e+00> : vector<256x16xf32>
    %108 = tpu.matmul %107, %1, %cst {dimension_numbers = #tpu.dot_dimension_numbers<[1], [0], [0], [1], [0, 0, 1, 1], [], []>} : vector<256x25xbf16>, vector<25x16xbf16>, vector<256x16xf32> -> vector<256x16xf32>
    %109 = vector.broadcast %2 : vector<1x16xf32> to vector<256x16xf32>
    %110 = arith.mulf %108, %109 : vector<256x16xf32>
    %111 = vector.broadcast %3 : vector<1x16xf32> to vector<256x16xf32>
    %112 = arith.addf %110, %111 : vector<256x16xf32>
    %cst_36 = arith.constant 0.000000e+00 : f32
    %113 = vector.broadcast %cst_36 : f32 to vector<256x16xf32>
    %114 = arith.maximumf %112, %113 : vector<256x16xf32>
    %115 = vector.shape_cast %114 : vector<256x16xf32> to vector<64x4x16xf32>
    %116 = vector.extract_strided_slice %115 {offsets = [0, 0, 0], sizes = [64, 1, 16], strides = [1, 1, 1]} : vector<64x4x16xf32> to vector<64x1x16xf32>
    %117 = vector.shape_cast %116 : vector<64x1x16xf32> to vector<64x16xf32>
    %118 = vector.extract_strided_slice %115 {offsets = [0, 1, 0], sizes = [64, 1, 16], strides = [1, 1, 1]} : vector<64x4x16xf32> to vector<64x1x16xf32>
    %119 = vector.shape_cast %118 : vector<64x1x16xf32> to vector<64x16xf32>
    %120 = arith.maximumf %117, %119 : vector<64x16xf32>
    %121 = vector.extract_strided_slice %115 {offsets = [0, 2, 0], sizes = [64, 1, 16], strides = [1, 1, 1]} : vector<64x4x16xf32> to vector<64x1x16xf32>
    %122 = vector.shape_cast %121 : vector<64x1x16xf32> to vector<64x16xf32>
    %123 = vector.extract_strided_slice %115 {offsets = [0, 3, 0], sizes = [64, 1, 16], strides = [1, 1, 1]} : vector<64x4x16xf32> to vector<64x1x16xf32>
    %124 = vector.shape_cast %123 : vector<64x1x16xf32> to vector<64x16xf32>
    %125 = arith.maximumf %122, %124 : vector<64x16xf32>
    %126 = arith.maximumf %120, %125 : vector<64x16xf32>
    %127 = vector.shape_cast %126 : vector<64x16xf32> to vector<4x16x16xf32>
    %128 = vector.extract_strided_slice %127 {offsets = [0, 0, 0], sizes = [4, 4, 16], strides = [1, 1, 1]} : vector<4x16x16xf32> to vector<4x4x16xf32>
    %129 = vector.extract_strided_slice %127 {offsets = [0, 4, 0], sizes = [4, 4, 16], strides = [1, 1, 1]} : vector<4x16x16xf32> to vector<4x4x16xf32>
    %130 = arith.maximumf %128, %129 : vector<4x4x16xf32>
    %131 = vector.extract_strided_slice %127 {offsets = [0, 8, 0], sizes = [4, 4, 16], strides = [1, 1, 1]} : vector<4x16x16xf32> to vector<4x4x16xf32>
    %132 = vector.extract_strided_slice %127 {offsets = [0, 12, 0], sizes = [4, 4, 16], strides = [1, 1, 1]} : vector<4x16x16xf32> to vector<4x4x16xf32>
    %133 = arith.maximumf %131, %132 : vector<4x4x16xf32>
    %134 = arith.maximumf %130, %133 : vector<4x4x16xf32>
    %135 = vector.shape_cast %134 : vector<4x4x16xf32> to vector<1x4x64xf32>
    %c4_i32 = arith.constant 4 : i32
    %136 = arith.muli %c0_i32, %c4_i32 : i32
    %c0_37 = arith.constant 0 : index
    %137 = arith.index_cast %136 : i32 to index
    %c0_38 = arith.constant 0 : index
    %138 = vector.load %arg5[%c0_37, %137, %c0_38] : memref<1x4x64xf32, #tpu.memory_space<vmem>>, vector<1x4x64xf32>
    tpu.vector_store %arg5[%c0_37, %137, %c0_38], %135 {strides = array<i32>} : memref<1x4x64xf32, #tpu.memory_space<vmem>>, vector<1x4x64xf32>,
    %c1_i32 = arith.constant 1 : i32
    return
  }
  func.func @transform_0(%arg0: i32) -> (i32, i32, i32, i32) {
    %c0_i32 = arith.constant 0 : i32
    %c0_i32_0 = arith.constant 0 : i32
    %c0_i32_1 = arith.constant 0 : i32
    %c0_i32_2 = arith.constant 0 : i32
    return %arg0, %c0_i32, %c0_i32_0, %c0_i32_1 : i32, i32, i32, i32
  }
  func.func @transform_1(%arg0: i32) -> (i32, i32) {
    %c0_i32 = arith.constant 0 : i32
    %c0_i32_0 = arith.constant 0 : i32
    %c0_i32_1 = arith.constant 0 : i32
    return %c0_i32, %c0_i32_0 : i32, i32
  }
  func.func @transform_2(%arg0: i32) -> (i32, i32) {
    %c0_i32 = arith.constant 0 : i32
    %c0_i32_0 = arith.constant 0 : i32
    %c0_i32_1 = arith.constant 0 : i32
    return %c0_i32, %c0_i32_0 : i32, i32
  }
  func.func @transform_3(%arg0: i32) -> (i32, i32) {
    %c0_i32 = arith.constant 0 : i32
    %c0_i32_0 = arith.constant 0 : i32
    %c0_i32_1 = arith.constant 0 : i32
    return %c0_i32, %c0_i32_0 : i32, i32
  }
  func.func @transform_4(%arg0: i32) -> (i32, i32, i32) {
    %c0_i32 = arith.constant 0 : i32
    %c0_i32_0 = arith.constant 0 : i32
    %c0_i32_1 = arith.constant 0 : i32
    return %arg0, %c0_i32, %c0_i32_0 : i32, i32, i32
  }
}

module attributes {stable_mosaic.version = 11 : i64} {
  func.func @kernel(%arg0: i32, %arg1: memref<1x8x8x16xf32, #tpu.memory_space<vmem>>, %arg2: memref<400x32xf32, #tpu.memory_space<vmem>>, %arg3: memref<1x32xf32, #tpu.memory_space<vmem>>, %arg4: memref<1x32xf32, #tpu.memory_space<vmem>>, %arg5: memref<1x1x32xf32, #tpu.memory_space<vmem>>, %arg6: memref<16x400xbf16, #tpu.memory_space<vmem>>) attributes {dimension_semantics = [#tpu.dimension_semantics<parallel>], iteration_bounds = array<i64: 4>, scalar_prefetch = 0 : i64, scratch_operands = 1 : i64, tpu.core_type = #tpu.core_type<tc>, window_params = [{transform_indices = @transform_0, window_bounds = array<i64: 1, 8, 8, 16>}, {pipeline_mode = #tpu.pipeline_mode<synchronous>, transform_indices = @transform_1, window_bounds = array<i64: 400, 32>}, {pipeline_mode = #tpu.pipeline_mode<synchronous>, transform_indices = @transform_2, window_bounds = array<i64: 1, 32>}, {pipeline_mode = #tpu.pipeline_mode<synchronous>, transform_indices = @transform_3, window_bounds = array<i64: 1, 32>}, {transform_indices = @transform_4, window_bounds = array<i64: 1, 1, 32>}]} {
    %c0 = arith.constant 0 : index
    %c0_0 = arith.constant 0 : index
    %0 = vector.load %arg2[%c0, %c0_0] : memref<400x32xf32, #tpu.memory_space<vmem>>, vector<400x32xf32>
    %1 = arith.truncf %0 : vector<400x32xf32> to vector<400x32xbf16>
    %c0_1 = arith.constant 0 : index
    %c0_2 = arith.constant 0 : index
    %2 = vector.load %arg3[%c0_1, %c0_2] : memref<1x32xf32, #tpu.memory_space<vmem>>, vector<1x32xf32>
    %c0_3 = arith.constant 0 : index
    %c0_4 = arith.constant 0 : index
    %3 = vector.load %arg4[%c0_3, %c0_4] : memref<1x32xf32, #tpu.memory_space<vmem>>, vector<1x32xf32>
    %c0_i32 = arith.constant 0 : i32
    %c4_i32 = arith.constant 4 : i32
    %4 = arith.muli %c0_i32, %c4_i32 : i32
    %c0_5 = arith.constant 0 : index
    %5 = arith.index_cast %4 : i32 to index
    %c0_6 = arith.constant 0 : index
    %c0_7 = arith.constant 0 : index
    %6 = vector.load %arg1[%c0_5, %5, %c0_6, %c0_7] : memref<1x8x8x16xf32, #tpu.memory_space<vmem>>, vector<1x8x8x16xf32>
    %7 = vector.extract_strided_slice %6 {offsets = [0, 0, 0, 0], sizes = [1, 4, 4, 16], strides = [1, 1, 1, 1]} : vector<1x8x8x16xf32> to vector<1x4x4x16xf32>
    %8 = vector.shape_cast %7 : vector<1x4x4x16xf32> to vector<16x16xf32>
    %9 = arith.truncf %8 : vector<16x16xf32> to vector<16x16xbf16>
    %c0_8 = arith.constant 0 : index
    %c0_9 = arith.constant 0 : index
    %10 = vector.load %arg6[%c0_8, %c0_9] : memref<16x400xbf16, #tpu.memory_space<vmem>>, vector<16x16xbf16>
    tpu.vector_store %arg6[%c0_8, %c0_9], %9 {strides = array<i32>} : memref<16x400xbf16, #tpu.memory_space<vmem>>, vector<16x16xbf16>,
    %11 = vector.extract_strided_slice %6 {offsets = [0, 0, 1, 0], sizes = [1, 4, 4, 16], strides = [1, 1, 1, 1]} : vector<1x8x8x16xf32> to vector<1x4x4x16xf32>
    %12 = vector.shape_cast %11 : vector<1x4x4x16xf32> to vector<16x16xf32>
    %13 = arith.truncf %12 : vector<16x16xf32> to vector<16x16xbf16>
    %c0_10 = arith.constant 0 : index
    %c16 = arith.constant 16 : index
    %14 = vector.load %arg6[%c0_10, %c16] : memref<16x400xbf16, #tpu.memory_space<vmem>>, vector<16x16xbf16>
    tpu.vector_store %arg6[%c0_10, %c16], %13 {strides = array<i32>} : memref<16x400xbf16, #tpu.memory_space<vmem>>, vector<16x16xbf16>,
    %15 = vector.extract_strided_slice %6 {offsets = [0, 0, 2, 0], sizes = [1, 4, 4, 16], strides = [1, 1, 1, 1]} : vector<1x8x8x16xf32> to vector<1x4x4x16xf32>
    %16 = vector.shape_cast %15 : vector<1x4x4x16xf32> to vector<16x16xf32>
    %17 = arith.truncf %16 : vector<16x16xf32> to vector<16x16xbf16>
    %c0_11 = arith.constant 0 : index
    %c32 = arith.constant 32 : index
    %18 = vector.load %arg6[%c0_11, %c32] : memref<16x400xbf16, #tpu.memory_space<vmem>>, vector<16x16xbf16>
    tpu.vector_store %arg6[%c0_11, %c32], %17 {strides = array<i32>} : memref<16x400xbf16, #tpu.memory_space<vmem>>, vector<16x16xbf16>,
    %19 = vector.extract_strided_slice %6 {offsets = [0, 0, 3, 0], sizes = [1, 4, 4, 16], strides = [1, 1, 1, 1]} : vector<1x8x8x16xf32> to vector<1x4x4x16xf32>
    %20 = vector.shape_cast %19 : vector<1x4x4x16xf32> to vector<16x16xf32>
    %21 = arith.truncf %20 : vector<16x16xf32> to vector<16x16xbf16>
    %c0_12 = arith.constant 0 : index
    %c48 = arith.constant 48 : index
    %22 = vector.load %arg6[%c0_12, %c48] : memref<16x400xbf16, #tpu.memory_space<vmem>>, vector<16x16xbf16>
    tpu.vector_store %arg6[%c0_12, %c48], %21 {strides = array<i32>} : memref<16x400xbf16, #tpu.memory_space<vmem>>, vector<16x16xbf16>,
    %23 = vector.extract_strided_slice %6 {offsets = [0, 0, 4, 0], sizes = [1, 4, 4, 16], strides = [1, 1, 1, 1]} : vector<1x8x8x16xf32> to vector<1x4x4x16xf32>
    %24 = vector.shape_cast %23 : vector<1x4x4x16xf32> to vector<16x16xf32>
    %25 = arith.truncf %24 : vector<16x16xf32> to vector<16x16xbf16>
    %c0_13 = arith.constant 0 : index
    %c64 = arith.constant 64 : index
    %26 = vector.load %arg6[%c0_13, %c64] : memref<16x400xbf16, #tpu.memory_space<vmem>>, vector<16x16xbf16>
    tpu.vector_store %arg6[%c0_13, %c64], %25 {strides = array<i32>} : memref<16x400xbf16, #tpu.memory_space<vmem>>, vector<16x16xbf16>,
    %27 = vector.extract_strided_slice %6 {offsets = [0, 1, 0, 0], sizes = [1, 4, 4, 16], strides = [1, 1, 1, 1]} : vector<1x8x8x16xf32> to vector<1x4x4x16xf32>
    %28 = vector.shape_cast %27 : vector<1x4x4x16xf32> to vector<16x16xf32>
    %29 = arith.truncf %28 : vector<16x16xf32> to vector<16x16xbf16>
    %c0_14 = arith.constant 0 : index
    %c80 = arith.constant 80 : index
    %30 = vector.load %arg6[%c0_14, %c80] : memref<16x400xbf16, #tpu.memory_space<vmem>>, vector<16x16xbf16>
    tpu.vector_store %arg6[%c0_14, %c80], %29 {strides = array<i32>} : memref<16x400xbf16, #tpu.memory_space<vmem>>, vector<16x16xbf16>,
    %31 = vector.extract_strided_slice %6 {offsets = [0, 1, 1, 0], sizes = [1, 4, 4, 16], strides = [1, 1, 1, 1]} : vector<1x8x8x16xf32> to vector<1x4x4x16xf32>
    %32 = vector.shape_cast %31 : vector<1x4x4x16xf32> to vector<16x16xf32>
    %33 = arith.truncf %32 : vector<16x16xf32> to vector<16x16xbf16>
    %c0_15 = arith.constant 0 : index
    %c96 = arith.constant 96 : index
    %34 = vector.load %arg6[%c0_15, %c96] : memref<16x400xbf16, #tpu.memory_space<vmem>>, vector<16x16xbf16>
    tpu.vector_store %arg6[%c0_15, %c96], %33 {strides = array<i32>} : memref<16x400xbf16, #tpu.memory_space<vmem>>, vector<16x16xbf16>,
    %35 = vector.extract_strided_slice %6 {offsets = [0, 1, 2, 0], sizes = [1, 4, 4, 16], strides = [1, 1, 1, 1]} : vector<1x8x8x16xf32> to vector<1x4x4x16xf32>
    %36 = vector.shape_cast %35 : vector<1x4x4x16xf32> to vector<16x16xf32>
    %37 = arith.truncf %36 : vector<16x16xf32> to vector<16x16xbf16>
    %c0_16 = arith.constant 0 : index
    %c112 = arith.constant 112 : index
    %38 = vector.load %arg6[%c0_16, %c112] : memref<16x400xbf16, #tpu.memory_space<vmem>>, vector<16x16xbf16>
    tpu.vector_store %arg6[%c0_16, %c112], %37 {strides = array<i32>} : memref<16x400xbf16, #tpu.memory_space<vmem>>, vector<16x16xbf16>,
    %39 = vector.extract_strided_slice %6 {offsets = [0, 1, 3, 0], sizes = [1, 4, 4, 16], strides = [1, 1, 1, 1]} : vector<1x8x8x16xf32> to vector<1x4x4x16xf32>
    %40 = vector.shape_cast %39 : vector<1x4x4x16xf32> to vector<16x16xf32>
    %41 = arith.truncf %40 : vector<16x16xf32> to vector<16x16xbf16>
    %c0_17 = arith.constant 0 : index
    %c128 = arith.constant 128 : index
    %42 = vector.load %arg6[%c0_17, %c128] : memref<16x400xbf16, #tpu.memory_space<vmem>>, vector<16x16xbf16>
    tpu.vector_store %arg6[%c0_17, %c128], %41 {strides = array<i32>} : memref<16x400xbf16, #tpu.memory_space<vmem>>, vector<16x16xbf16>,
    %43 = vector.extract_strided_slice %6 {offsets = [0, 1, 4, 0], sizes = [1, 4, 4, 16], strides = [1, 1, 1, 1]} : vector<1x8x8x16xf32> to vector<1x4x4x16xf32>
    %44 = vector.shape_cast %43 : vector<1x4x4x16xf32> to vector<16x16xf32>
    %45 = arith.truncf %44 : vector<16x16xf32> to vector<16x16xbf16>
    %c0_18 = arith.constant 0 : index
    %c144 = arith.constant 144 : index
    %46 = vector.load %arg6[%c0_18, %c144] : memref<16x400xbf16, #tpu.memory_space<vmem>>, vector<16x16xbf16>
    tpu.vector_store %arg6[%c0_18, %c144], %45 {strides = array<i32>} : memref<16x400xbf16, #tpu.memory_space<vmem>>, vector<16x16xbf16>,
    %47 = vector.extract_strided_slice %6 {offsets = [0, 2, 0, 0], sizes = [1, 4, 4, 16], strides = [1, 1, 1, 1]} : vector<1x8x8x16xf32> to vector<1x4x4x16xf32>
    %48 = vector.shape_cast %47 : vector<1x4x4x16xf32> to vector<16x16xf32>
    %49 = arith.truncf %48 : vector<16x16xf32> to vector<16x16xbf16>
    %c0_19 = arith.constant 0 : index
    %c160 = arith.constant 160 : index
    %50 = vector.load %arg6[%c0_19, %c160] : memref<16x400xbf16, #tpu.memory_space<vmem>>, vector<16x16xbf16>
    tpu.vector_store %arg6[%c0_19, %c160], %49 {strides = array<i32>} : memref<16x400xbf16, #tpu.memory_space<vmem>>, vector<16x16xbf16>,
    %51 = vector.extract_strided_slice %6 {offsets = [0, 2, 1, 0], sizes = [1, 4, 4, 16], strides = [1, 1, 1, 1]} : vector<1x8x8x16xf32> to vector<1x4x4x16xf32>
    %52 = vector.shape_cast %51 : vector<1x4x4x16xf32> to vector<16x16xf32>
    %53 = arith.truncf %52 : vector<16x16xf32> to vector<16x16xbf16>
    %c0_20 = arith.constant 0 : index
    %c176 = arith.constant 176 : index
    %54 = vector.load %arg6[%c0_20, %c176] : memref<16x400xbf16, #tpu.memory_space<vmem>>, vector<16x16xbf16>
    tpu.vector_store %arg6[%c0_20, %c176], %53 {strides = array<i32>} : memref<16x400xbf16, #tpu.memory_space<vmem>>, vector<16x16xbf16>,
    %55 = vector.extract_strided_slice %6 {offsets = [0, 2, 2, 0], sizes = [1, 4, 4, 16], strides = [1, 1, 1, 1]} : vector<1x8x8x16xf32> to vector<1x4x4x16xf32>
    %56 = vector.shape_cast %55 : vector<1x4x4x16xf32> to vector<16x16xf32>
    %57 = arith.truncf %56 : vector<16x16xf32> to vector<16x16xbf16>
    %c0_21 = arith.constant 0 : index
    %c192 = arith.constant 192 : index
    %58 = vector.load %arg6[%c0_21, %c192] : memref<16x400xbf16, #tpu.memory_space<vmem>>, vector<16x16xbf16>
    tpu.vector_store %arg6[%c0_21, %c192], %57 {strides = array<i32>} : memref<16x400xbf16, #tpu.memory_space<vmem>>, vector<16x16xbf16>,
    %59 = vector.extract_strided_slice %6 {offsets = [0, 2, 3, 0], sizes = [1, 4, 4, 16], strides = [1, 1, 1, 1]} : vector<1x8x8x16xf32> to vector<1x4x4x16xf32>
    %60 = vector.shape_cast %59 : vector<1x4x4x16xf32> to vector<16x16xf32>
    %61 = arith.truncf %60 : vector<16x16xf32> to vector<16x16xbf16>
    %c0_22 = arith.constant 0 : index
    %c208 = arith.constant 208 : index
    %62 = vector.load %arg6[%c0_22, %c208] : memref<16x400xbf16, #tpu.memory_space<vmem>>, vector<16x16xbf16>
    tpu.vector_store %arg6[%c0_22, %c208], %61 {strides = array<i32>} : memref<16x400xbf16, #tpu.memory_space<vmem>>, vector<16x16xbf16>,
    %63 = vector.extract_strided_slice %6 {offsets = [0, 2, 4, 0], sizes = [1, 4, 4, 16], strides = [1, 1, 1, 1]} : vector<1x8x8x16xf32> to vector<1x4x4x16xf32>
    %64 = vector.shape_cast %63 : vector<1x4x4x16xf32> to vector<16x16xf32>
    %65 = arith.truncf %64 : vector<16x16xf32> to vector<16x16xbf16>
    %c0_23 = arith.constant 0 : index
    %c224 = arith.constant 224 : index
    %66 = vector.load %arg6[%c0_23, %c224] : memref<16x400xbf16, #tpu.memory_space<vmem>>, vector<16x16xbf16>
    tpu.vector_store %arg6[%c0_23, %c224], %65 {strides = array<i32>} : memref<16x400xbf16, #tpu.memory_space<vmem>>, vector<16x16xbf16>,
    %67 = vector.extract_strided_slice %6 {offsets = [0, 3, 0, 0], sizes = [1, 4, 4, 16], strides = [1, 1, 1, 1]} : vector<1x8x8x16xf32> to vector<1x4x4x16xf32>
    %68 = vector.shape_cast %67 : vector<1x4x4x16xf32> to vector<16x16xf32>
    %69 = arith.truncf %68 : vector<16x16xf32> to vector<16x16xbf16>
    %c0_24 = arith.constant 0 : index
    %c240 = arith.constant 240 : index
    %70 = vector.load %arg6[%c0_24, %c240] : memref<16x400xbf16, #tpu.memory_space<vmem>>, vector<16x16xbf16>
    tpu.vector_store %arg6[%c0_24, %c240], %69 {strides = array<i32>} : memref<16x400xbf16, #tpu.memory_space<vmem>>, vector<16x16xbf16>,
    %71 = vector.extract_strided_slice %6 {offsets = [0, 3, 1, 0], sizes = [1, 4, 4, 16], strides = [1, 1, 1, 1]} : vector<1x8x8x16xf32> to vector<1x4x4x16xf32>
    %72 = vector.shape_cast %71 : vector<1x4x4x16xf32> to vector<16x16xf32>
    %73 = arith.truncf %72 : vector<16x16xf32> to vector<16x16xbf16>
    %c0_25 = arith.constant 0 : index
    %c256 = arith.constant 256 : index
    %74 = vector.load %arg6[%c0_25, %c256] : memref<16x400xbf16, #tpu.memory_space<vmem>>, vector<16x16xbf16>
    tpu.vector_store %arg6[%c0_25, %c256], %73 {strides = array<i32>} : memref<16x400xbf16, #tpu.memory_space<vmem>>, vector<16x16xbf16>,
    %75 = vector.extract_strided_slice %6 {offsets = [0, 3, 2, 0], sizes = [1, 4, 4, 16], strides = [1, 1, 1, 1]} : vector<1x8x8x16xf32> to vector<1x4x4x16xf32>
    %76 = vector.shape_cast %75 : vector<1x4x4x16xf32> to vector<16x16xf32>
    %77 = arith.truncf %76 : vector<16x16xf32> to vector<16x16xbf16>
    %c0_26 = arith.constant 0 : index
    %c272 = arith.constant 272 : index
    %78 = vector.load %arg6[%c0_26, %c272] : memref<16x400xbf16, #tpu.memory_space<vmem>>, vector<16x16xbf16>
    tpu.vector_store %arg6[%c0_26, %c272], %77 {strides = array<i32>} : memref<16x400xbf16, #tpu.memory_space<vmem>>, vector<16x16xbf16>,
    %79 = vector.extract_strided_slice %6 {offsets = [0, 3, 3, 0], sizes = [1, 4, 4, 16], strides = [1, 1, 1, 1]} : vector<1x8x8x16xf32> to vector<1x4x4x16xf32>
    %80 = vector.shape_cast %79 : vector<1x4x4x16xf32> to vector<16x16xf32>
    %81 = arith.truncf %80 : vector<16x16xf32> to vector<16x16xbf16>
    %c0_27 = arith.constant 0 : index
    %c288 = arith.constant 288 : index
    %82 = vector.load %arg6[%c0_27, %c288] : memref<16x400xbf16, #tpu.memory_space<vmem>>, vector<16x16xbf16>
    tpu.vector_store %arg6[%c0_27, %c288], %81 {strides = array<i32>} : memref<16x400xbf16, #tpu.memory_space<vmem>>, vector<16x16xbf16>,
    %83 = vector.extract_strided_slice %6 {offsets = [0, 3, 4, 0], sizes = [1, 4, 4, 16], strides = [1, 1, 1, 1]} : vector<1x8x8x16xf32> to vector<1x4x4x16xf32>
    %84 = vector.shape_cast %83 : vector<1x4x4x16xf32> to vector<16x16xf32>
    %85 = arith.truncf %84 : vector<16x16xf32> to vector<16x16xbf16>
    %c0_28 = arith.constant 0 : index
    %c304 = arith.constant 304 : index
    %86 = vector.load %arg6[%c0_28, %c304] : memref<16x400xbf16, #tpu.memory_space<vmem>>, vector<16x16xbf16>
    tpu.vector_store %arg6[%c0_28, %c304], %85 {strides = array<i32>} : memref<16x400xbf16, #tpu.memory_space<vmem>>, vector<16x16xbf16>,
    %87 = vector.extract_strided_slice %6 {offsets = [0, 4, 0, 0], sizes = [1, 4, 4, 16], strides = [1, 1, 1, 1]} : vector<1x8x8x16xf32> to vector<1x4x4x16xf32>
    %88 = vector.shape_cast %87 : vector<1x4x4x16xf32> to vector<16x16xf32>
    %89 = arith.truncf %88 : vector<16x16xf32> to vector<16x16xbf16>
    %c0_29 = arith.constant 0 : index
    %c320 = arith.constant 320 : index
    %90 = vector.load %arg6[%c0_29, %c320] : memref<16x400xbf16, #tpu.memory_space<vmem>>, vector<16x16xbf16>
    tpu.vector_store %arg6[%c0_29, %c320], %89 {strides = array<i32>} : memref<16x400xbf16, #tpu.memory_space<vmem>>, vector<16x16xbf16>,
    %91 = vector.extract_strided_slice %6 {offsets = [0, 4, 1, 0], sizes = [1, 4, 4, 16], strides = [1, 1, 1, 1]} : vector<1x8x8x16xf32> to vector<1x4x4x16xf32>
    %92 = vector.shape_cast %91 : vector<1x4x4x16xf32> to vector<16x16xf32>
    %93 = arith.truncf %92 : vector<16x16xf32> to vector<16x16xbf16>
    %c0_30 = arith.constant 0 : index
    %c336 = arith.constant 336 : index
    %94 = vector.load %arg6[%c0_30, %c336] : memref<16x400xbf16, #tpu.memory_space<vmem>>, vector<16x16xbf16>
    tpu.vector_store %arg6[%c0_30, %c336], %93 {strides = array<i32>} : memref<16x400xbf16, #tpu.memory_space<vmem>>, vector<16x16xbf16>,
    %95 = vector.extract_strided_slice %6 {offsets = [0, 4, 2, 0], sizes = [1, 4, 4, 16], strides = [1, 1, 1, 1]} : vector<1x8x8x16xf32> to vector<1x4x4x16xf32>
    %96 = vector.shape_cast %95 : vector<1x4x4x16xf32> to vector<16x16xf32>
    %97 = arith.truncf %96 : vector<16x16xf32> to vector<16x16xbf16>
    %c0_31 = arith.constant 0 : index
    %c352 = arith.constant 352 : index
    %98 = vector.load %arg6[%c0_31, %c352] : memref<16x400xbf16, #tpu.memory_space<vmem>>, vector<16x16xbf16>
    tpu.vector_store %arg6[%c0_31, %c352], %97 {strides = array<i32>} : memref<16x400xbf16, #tpu.memory_space<vmem>>, vector<16x16xbf16>,
    %99 = vector.extract_strided_slice %6 {offsets = [0, 4, 3, 0], sizes = [1, 4, 4, 16], strides = [1, 1, 1, 1]} : vector<1x8x8x16xf32> to vector<1x4x4x16xf32>
    %100 = vector.shape_cast %99 : vector<1x4x4x16xf32> to vector<16x16xf32>
    %101 = arith.truncf %100 : vector<16x16xf32> to vector<16x16xbf16>
    %c0_32 = arith.constant 0 : index
    %c368 = arith.constant 368 : index
    %102 = vector.load %arg6[%c0_32, %c368] : memref<16x400xbf16, #tpu.memory_space<vmem>>, vector<16x16xbf16>
    tpu.vector_store %arg6[%c0_32, %c368], %101 {strides = array<i32>} : memref<16x400xbf16, #tpu.memory_space<vmem>>, vector<16x16xbf16>,
    %103 = vector.extract_strided_slice %6 {offsets = [0, 4, 4, 0], sizes = [1, 4, 4, 16], strides = [1, 1, 1, 1]} : vector<1x8x8x16xf32> to vector<1x4x4x16xf32>
    %104 = vector.shape_cast %103 : vector<1x4x4x16xf32> to vector<16x16xf32>
    %105 = arith.truncf %104 : vector<16x16xf32> to vector<16x16xbf16>
    %c0_33 = arith.constant 0 : index
    %c384 = arith.constant 384 : index
    %106 = vector.load %arg6[%c0_33, %c384] : memref<16x400xbf16, #tpu.memory_space<vmem>>, vector<16x16xbf16>
    tpu.vector_store %arg6[%c0_33, %c384], %105 {strides = array<i32>} : memref<16x400xbf16, #tpu.memory_space<vmem>>, vector<16x16xbf16>,
    %c0_34 = arith.constant 0 : index
    %c0_35 = arith.constant 0 : index
    %107 = vector.load %arg6[%c0_34, %c0_35] : memref<16x400xbf16, #tpu.memory_space<vmem>>, vector<16x400xbf16>
    %cst = arith.constant dense<0.000000e+00> : vector<16x32xf32>
    %108 = tpu.matmul %107, %1, %cst {dimension_numbers = #tpu.dot_dimension_numbers<[1], [0], [0], [1], [0, 0, 1, 1], [], []>} : vector<16x400xbf16>, vector<400x32xbf16>, vector<16x32xf32> -> vector<16x32xf32>
    %109 = vector.broadcast %2 : vector<1x32xf32> to vector<16x32xf32>
    %110 = arith.mulf %108, %109 : vector<16x32xf32>
    %111 = vector.broadcast %3 : vector<1x32xf32> to vector<16x32xf32>
    %112 = arith.addf %110, %111 : vector<16x32xf32>
    %cst_36 = arith.constant 0.000000e+00 : f32
    %113 = vector.broadcast %cst_36 : f32 to vector<16x32xf32>
    %114 = arith.maximumf %112, %113 : vector<16x32xf32>
    %115 = vector.shape_cast %114 : vector<16x32xf32> to vector<4x4x32xf32>
    %116 = vector.extract_strided_slice %115 {offsets = [0, 0, 0], sizes = [4, 1, 32], strides = [1, 1, 1]} : vector<4x4x32xf32> to vector<4x1x32xf32>
    %117 = vector.shape_cast %116 : vector<4x1x32xf32> to vector<4x32xf32>
    %118 = vector.extract_strided_slice %115 {offsets = [0, 1, 0], sizes = [4, 1, 32], strides = [1, 1, 1]} : vector<4x4x32xf32> to vector<4x1x32xf32>
    %119 = vector.shape_cast %118 : vector<4x1x32xf32> to vector<4x32xf32>
    %120 = arith.maximumf %117, %119 : vector<4x32xf32>
    %121 = vector.extract_strided_slice %115 {offsets = [0, 2, 0], sizes = [4, 1, 32], strides = [1, 1, 1]} : vector<4x4x32xf32> to vector<4x1x32xf32>
    %122 = vector.shape_cast %121 : vector<4x1x32xf32> to vector<4x32xf32>
    %123 = vector.extract_strided_slice %115 {offsets = [0, 3, 0], sizes = [4, 1, 32], strides = [1, 1, 1]} : vector<4x4x32xf32> to vector<4x1x32xf32>
    %124 = vector.shape_cast %123 : vector<4x1x32xf32> to vector<4x32xf32>
    %125 = arith.maximumf %122, %124 : vector<4x32xf32>
    %126 = arith.maximumf %120, %125 : vector<4x32xf32>
    %127 = vector.shape_cast %126 : vector<4x32xf32> to vector<1x4x32xf32>
    %128 = vector.extract_strided_slice %127 {offsets = [0, 0, 0], sizes = [1, 1, 32], strides = [1, 1, 1]} : vector<1x4x32xf32> to vector<1x1x32xf32>
    %129 = vector.extract_strided_slice %127 {offsets = [0, 1, 0], sizes = [1, 1, 32], strides = [1, 1, 1]} : vector<1x4x32xf32> to vector<1x1x32xf32>
    %130 = arith.maximumf %128, %129 : vector<1x1x32xf32>
    %131 = vector.extract_strided_slice %127 {offsets = [0, 2, 0], sizes = [1, 1, 32], strides = [1, 1, 1]} : vector<1x4x32xf32> to vector<1x1x32xf32>
    %132 = vector.extract_strided_slice %127 {offsets = [0, 3, 0], sizes = [1, 1, 32], strides = [1, 1, 1]} : vector<1x4x32xf32> to vector<1x1x32xf32>
    %133 = arith.maximumf %131, %132 : vector<1x1x32xf32>
    %134 = arith.maximumf %130, %133 : vector<1x1x32xf32>
    %c1_i32 = arith.constant 1 : i32
    %135 = arith.muli %c0_i32, %c1_i32 : i32
    %c0_37 = arith.constant 0 : index
    %136 = arith.index_cast %135 : i32 to index
    %c0_38 = arith.constant 0 : index
    %137 = vector.load %arg5[%c0_37, %136, %c0_38] : memref<1x1x32xf32, #tpu.memory_space<vmem>>, vector<1x1x32xf32>
    tpu.vector_store %arg5[%c0_37, %136, %c0_38], %134 {strides = array<i32>} : memref<1x1x32xf32, #tpu.memory_space<vmem>>, vector<1x1x32xf32>,
    %c1_i32_39 = arith.constant 1 : i32
    return
  }
  func.func @transform_0(%arg0: i32) -> (i32, i32, i32, i32) {
    %c0_i32 = arith.constant 0 : i32
    %c0_i32_0 = arith.constant 0 : i32
    %c0_i32_1 = arith.constant 0 : i32
    %c0_i32_2 = arith.constant 0 : i32
    return %arg0, %c0_i32, %c0_i32_0, %c0_i32_1 : i32, i32, i32, i32
  }
  func.func @transform_1(%arg0: i32) -> (i32, i32) {
    %c0_i32 = arith.constant 0 : i32
    %c0_i32_0 = arith.constant 0 : i32
    %c0_i32_1 = arith.constant 0 : i32
    return %c0_i32, %c0_i32_0 : i32, i32
  }
  func.func @transform_2(%arg0: i32) -> (i32, i32) {
    %c0_i32 = arith.constant 0 : i32
    %c0_i32_0 = arith.constant 0 : i32
    %c0_i32_1 = arith.constant 0 : i32
    return %c0_i32, %c0_i32_0 : i32, i32
  }
  func.func @transform_3(%arg0: i32) -> (i32, i32) {
    %c0_i32 = arith.constant 0 : i32
    %c0_i32_0 = arith.constant 0 : i32
    %c0_i32_1 = arith.constant 0 : i32
    return %c0_i32, %c0_i32_0 : i32, i32
  }
  func.func @transform_4(%arg0: i32) -> (i32, i32, i32) {
    %c0_i32 = arith.constant 0 : i32
    %c0_i32_0 = arith.constant 0 : i32
    %c0_i32_1 = arith.constant 0 : i32
    return %arg0, %c0_i32, %c0_i32_0 : i32, i32, i32
  }
}

module attributes {stable_mosaic.version = 11 : i64} {
  func.func @kernel(%arg0: i32, %arg1: memref<4x32xf32, #tpu.memory_space<vmem>>, %arg2: memref<2x32x16xf32, #tpu.memory_space<vmem>>, %arg3: memref<1x16xf32, #tpu.memory_space<vmem>>, %arg4: memref<2x16xf32, #tpu.memory_space<vmem>>, %arg5: memref<2x16xf32, #tpu.memory_space<vmem>>) attributes {dimension_semantics = [#tpu.dimension_semantics<arbitrary>], iteration_bounds = array<i64: 1>, scalar_prefetch = 0 : i64, scratch_operands = 1 : i64, tpu.core_type = #tpu.core_type<tc>, window_params = [{transform_indices = @transform_0, window_bounds = array<i64: 4, 32>}, {transform_indices = @transform_1, window_bounds = array<i64: 2, 32, 16>}, {pipeline_mode = #tpu.pipeline_mode<synchronous>, transform_indices = @transform_2, window_bounds = array<i64: 1, 16>}, {pipeline_mode = #tpu.pipeline_mode<synchronous>, transform_indices = @transform_3, window_bounds = array<i64: 2, 16>}]} {
    %c0_i32 = arith.constant 0 : i32
    %0 = arith.cmpi eq, %arg0, %c0_i32 : i32
    %1 = arith.extui %0 : i1 to i32
    %c0_i32_0 = arith.constant 0 : i32
    %2 = arith.cmpi ne, %1, %c0_i32_0 : i32
    scf.if %2 {
      %cst_15 = arith.constant 0.000000e+00 : f32
      %22 = vector.broadcast %cst_15 : f32 to vector<2x16xf32>
      %c0_16 = arith.constant 0 : index
      %c0_17 = arith.constant 0 : index
      %23 = vector.load %arg5[%c0_16, %c0_17] : memref<2x16xf32, #tpu.memory_space<vmem>>, vector<2x16xf32>
      tpu.vector_store %arg5[%c0_16, %c0_17], %22 {strides = array<i32>} : memref<2x16xf32, #tpu.memory_space<vmem>>, vector<2x16xf32>,
    } else {
    }
    %c0 = arith.constant 0 : index
    %c0_1 = arith.constant 0 : index
    %3 = vector.load %arg1[%c0, %c0_1] : memref<4x32xf32, #tpu.memory_space<vmem>>, vector<2x32xf32>
    %4 = arith.truncf %3 : vector<2x32xf32> to vector<2x32xbf16>
    %c2 = arith.constant 2 : index
    %c0_2 = arith.constant 0 : index
    %5 = vector.load %arg1[%c2, %c0_2] : memref<4x32xf32, #tpu.memory_space<vmem>>, vector<2x32xf32>
    %6 = arith.truncf %5 : vector<2x32xf32> to vector<2x32xbf16>
    %c0_3 = arith.constant 0 : index
    %c0_4 = arith.constant 0 : index
    %7 = vector.load %arg5[%c0_3, %c0_4] : memref<2x16xf32, #tpu.memory_space<vmem>>, vector<2x16xf32>
    %c0_5 = arith.constant 0 : index
    %c0_6 = arith.constant 0 : index
    %c0_7 = arith.constant 0 : index
    %8 = vector.load %arg2[%c0_5, %c0_6, %c0_7] : memref<2x32x16xf32, #tpu.memory_space<vmem>>, vector<1x32x16xf32>
    %9 = vector.shape_cast %8 : vector<1x32x16xf32> to vector<32x16xf32>
    %10 = arith.truncf %9 : vector<32x16xf32> to vector<32x16xbf16>
    %cst = arith.constant dense<0.000000e+00> : vector<2x16xf32>
    %11 = tpu.matmul %4, %10, %cst {dimension_numbers = #tpu.dot_dimension_numbers<[1], [0], [0], [1], [0, 0, 1, 1], [], []>} : vector<2x32xbf16>, vector<32x16xbf16>, vector<2x16xf32> -> vector<2x16xf32>
    %c1 = arith.constant 1 : index
    %c0_8 = arith.constant 0 : index
    %c0_9 = arith.constant 0 : index
    %12 = vector.load %arg2[%c1, %c0_8, %c0_9] : memref<2x32x16xf32, #tpu.memory_space<vmem>>, vector<1x32x16xf32>
    %13 = vector.shape_cast %12 : vector<1x32x16xf32> to vector<32x16xf32>
    %14 = arith.truncf %13 : vector<32x16xf32> to vector<32x16xbf16>
    %cst_10 = arith.constant dense<0.000000e+00> : vector<2x16xf32>
    %15 = tpu.matmul %6, %14, %cst_10 {dimension_numbers = #tpu.dot_dimension_numbers<[1], [0], [0], [1], [0, 0, 1, 1], [], []>} : vector<2x32xbf16>, vector<32x16xbf16>, vector<2x16xf32> -> vector<2x16xf32>
    %16 = arith.addf %11, %15 : vector<2x16xf32>
    %17 = arith.addf %7, %16 : vector<2x16xf32>
    %c0_11 = arith.constant 0 : index
    %c0_12 = arith.constant 0 : index
    %18 = vector.load %arg5[%c0_11, %c0_12] : memref<2x16xf32, #tpu.memory_space<vmem>>, vector<2x16xf32>
    tpu.vector_store %arg5[%c0_11, %c0_12], %17 {strides = array<i32>} : memref<2x16xf32, #tpu.memory_space<vmem>>, vector<2x16xf32>,
    %c0_i32_13 = arith.constant 0 : i32
    %19 = arith.cmpi eq, %arg0, %c0_i32_13 : i32
    %20 = arith.extui %19 : i1 to i32
    %c0_i32_14 = arith.constant 0 : i32
    %21 = arith.cmpi ne, %20, %c0_i32_14 : i32
    scf.if %21 {
      %c0_15 = arith.constant 0 : index
      %c0_16 = arith.constant 0 : index
      %22 = vector.load %arg5[%c0_15, %c0_16] : memref<2x16xf32, #tpu.memory_space<vmem>>, vector<2x16xf32>
      %c0_17 = arith.constant 0 : index
      %c0_18 = arith.constant 0 : index
      %23 = vector.load %arg3[%c0_17, %c0_18] : memref<1x16xf32, #tpu.memory_space<vmem>>, vector<1x16xf32>
      %24 = vector.broadcast %23 : vector<1x16xf32> to vector<2x16xf32>
      %25 = arith.addf %22, %24 : vector<2x16xf32>
      %cst_19 = arith.constant 0.000000e+00 : f32
      %26 = vector.broadcast %cst_19 : f32 to vector<2x16xf32>
      %27 = arith.maximumf %25, %26 : vector<2x16xf32>
      %c0_20 = arith.constant 0 : index
      %c0_21 = arith.constant 0 : index
      %28 = vector.load %arg4[%c0_20, %c0_21] : memref<2x16xf32, #tpu.memory_space<vmem>>, vector<2x16xf32>
      tpu.vector_store %arg4[%c0_20, %c0_21], %27 {strides = array<i32>} : memref<2x16xf32, #tpu.memory_space<vmem>>, vector<2x16xf32>,
    } else {
    }
    return
  }
  func.func @transform_0(%arg0: i32) -> (i32, i32) {
    %c0_i32 = arith.constant 0 : i32
    %c0_i32_0 = arith.constant 0 : i32
    return %c0_i32, %arg0 : i32, i32
  }
  func.func @transform_1(%arg0: i32) -> (i32, i32, i32) {
    %c0_i32 = arith.constant 0 : i32
    %c0_i32_0 = arith.constant 0 : i32
    %c0_i32_1 = arith.constant 0 : i32
    return %c0_i32, %arg0, %c0_i32_0 : i32, i32, i32
  }
  func.func @transform_2(%arg0: i32) -> (i32, i32) {
    %c0_i32 = arith.constant 0 : i32
    %c0_i32_0 = arith.constant 0 : i32
    %c0_i32_1 = arith.constant 0 : i32
    return %c0_i32, %c0_i32_0 : i32, i32
  }
  func.func @transform_3(%arg0: i32) -> (i32, i32) {
    %c0_i32 = arith.constant 0 : i32
    %c0_i32_0 = arith.constant 0 : i32
    %c0_i32_1 = arith.constant 0 : i32
    return %c0_i32, %c0_i32_0 : i32, i32
  }
}

module attributes {stable_mosaic.version = 11 : i64} {
  func.func @kernel(%arg0: memref<2x16xf32, #tpu.memory_space<vmem>>, %arg1: memref<16x8xf32, #tpu.memory_space<vmem>>, %arg2: memref<1x8xf32, #tpu.memory_space<vmem>>, %arg3: memref<2x8xf32, #tpu.memory_space<vmem>>) attributes {dimension_semantics = [], scalar_prefetch = 0 : i64, scratch_operands = 0 : i64, tpu.core_type = #tpu.core_type<tc>} {
    %c0 = arith.constant 0 : index
    %c0_0 = arith.constant 0 : index
    %0 = vector.load %arg0[%c0, %c0_0] : memref<2x16xf32, #tpu.memory_space<vmem>>, vector<2x16xf32>
    %1 = arith.truncf %0 : vector<2x16xf32> to vector<2x16xbf16>
    %c0_1 = arith.constant 0 : index
    %c0_2 = arith.constant 0 : index
    %2 = vector.load %arg1[%c0_1, %c0_2] : memref<16x8xf32, #tpu.memory_space<vmem>>, vector<16x8xf32>
    %3 = arith.truncf %2 : vector<16x8xf32> to vector<16x8xbf16>
    %cst = arith.constant dense<0.000000e+00> : vector<2x8xf32>
    %4 = tpu.matmul %1, %3, %cst {dimension_numbers = #tpu.dot_dimension_numbers<[1], [0], [0], [1], [0, 0, 1, 1], [], []>} : vector<2x16xbf16>, vector<16x8xbf16>, vector<2x8xf32> -> vector<2x8xf32>
    %c0_3 = arith.constant 0 : index
    %c0_4 = arith.constant 0 : index
    %5 = vector.load %arg2[%c0_3, %c0_4] : memref<1x8xf32, #tpu.memory_space<vmem>>, vector<1x8xf32>
    %6 = vector.broadcast %5 : vector<1x8xf32> to vector<2x8xf32>
    %7 = arith.addf %4, %6 : vector<2x8xf32>
    %c0_5 = arith.constant 0 : index
    %c0_6 = arith.constant 0 : index
    %8 = vector.load %arg3[%c0_5, %c0_6] : memref<2x8xf32, #tpu.memory_space<vmem>>, vector<2x8xf32>
    tpu.vector_store %arg3[%c0_5, %c0_6], %7 {strides = array<i32>} : memref<2x8xf32, #tpu.memory_space<vmem>>, vector<2x8xf32>,
    return
  }
}

</mosaic_0001>

<bundles_post_ra>
// kernel: cnn_model3_forward.6
= control target key start
LH: loop header
LB: loop body
LE: loop exit
PB: predicated region body
PF: predicated region fallthrough
CT: control target
= control target key end

     0   :  { %v178_v0 = vmov 0.0   ;;  %vm179_vm0 = vmmov 0   ;;  %vm39_vm1 = vcmask 261120   ;;  %vm19_vm2 = vcmask 123904   ;;  %s239_s1 = inlined_call_operand.vmem [shape: f32[2,32,16], index: 1, kind: input, shape index: {}]   ;;  %s240_s0 = inlined_call_operand.vmem [shape: f32[4,32], index: 0, kind: input, shape index: {}]   ;;  %s241_s2 = inlined_call_operand.vmem [shape: f32[1,16], index: 2, kind: input, shape index: {}]   ;;  %s242_s3 = inlined_call_operand.vmem [shape: f32[2,16], index: 3, kind: output, shape index: {}]  }
   0x1   :  { %160 = vmatprep.subr.bf16.mxu0 %v178_v0  ;;  %168 = vmatprep.subr.bf16.mxu1 %v178_v0  ;;  %v147_v1 = vld [vmem:[%s239_s1 + $0x20] sm:$0xff]  ;;  %v148_v2 = vld [vmem:[%s239_s1 + $0x28] sm:$0xff]  ;;  %v149_v6 = vld [vmem:[%s239_s1 + $0x30] sm:$0xff]  ;;  %20 = vst.msk [vmem:[#allocation2] sm:$0x3] %vm19_vm2, %v178_v0 }
   0x2   :  { %v26_v3 = vld [vmem:[%s239_s1] sm:$0xff]  ;;  %v37_v4 = vpack.c.bf16 %v148_v2, %v147_v1  ;;  %v27_v5 = vld [vmem:[%s239_s1 + $0x8] sm:$0xff]  ;;  %v150_v7 = vld [vmem:[%s239_s1 + $0x38] sm:$0xff]  ;;  %164 = vmatprep.mubr.msk.bf16.mxu0 %vm179_vm0, %v178_v0  ;;  %172 = vmatprep.mubr.msk.bf16.mxu1 %vm179_vm0, %v178_v0 }
   0x3   :  { %v30_v8 = vpack.c.bf16 %v27_v5, %v26_v3  ;;  %v28_v9 = vld [vmem:[%s239_s1 + $0x10] sm:$0xff]  ;;  %v29_v10 = vld [vmem:[%s239_s1 + $0x18] sm:$0xff]  ;;  %v38_v11 = vpack.c.bf16 %v150_v7, %v149_v6  ;;  %v23_v12 = vld [vmem:[%s240_s0 + $0x2] sm:$0x3] }
   0x4   :  { %161 = vmatpush3.bf16.msra.mxu0 %v37_v4  ;;  %v31_v13 = vpack.c.bf16 %v29_v10, %v28_v9  ;;  %v21_v14 = vld [vmem:[%s240_s0] sm:$0x3]  ;;  %v24_v15 = vpack.c.bf16 %v23_v12, %v23_v12 }
   0x5   :  { %169 = vmatpush3.bf16.msra.mxu1 %v30_v8  ;;  %162 = vmatprep.subr.bf16.mxu0 %v178_v0  ;;  %v22_v16 = vpack.c.bf16 %v21_v14, %v21_v14  ;;  %v153_v28 = vld [vmem:[%s241_s2] ss:$0 sm:$0xff] }
   0x6   :  { %170 = vmatprep.subr.bf16.mxu1 %v178_v0 }
   0x8   :  { %163 = vmatpush3.bf16.msra.mxu0 %v38_v11  ;;  %v25_v18 = vld [vmem:[#allocation2] sm:$0x3] }
   0x9   :  { %171 = vmatpush3.bf16.msra.mxu1 %v31_v13 }
   0xb   :  { %165 = vmatmul.mubr.msk.bf16.vlgmr.msra.gmra.mrb[0].mxu0 %vm39_vm1, %v24_v15 }
   0xc   :  { %173 = vmatmul.mubr.msk.bf16.vlgmr.msra.gmra.mrb[0].mxu1 %vm39_vm1, %v22_v16 }
  0xde   :  { %v77_v17 = vpop.f32.mrb[0].mxu0 }
  0xdf   :  { %v120_v19 = vpop.f32.mrb[0].mxu1  ;;  %v166_v20 = vpop.f32.mrb[1].mxu0 }
  0xe0   :  { %v121_v21 = vadd.f32 %v120_v19, %v77_v17  ;;  %v174_v22 = vpop.f32.mrb[1].mxu1  ;;  %v80_v23 = vpop.f32.mrb[2].mxu0 }
  0xe1   :  { %v123_v24 = vpop.f32.mrb[2].mxu1  ;;  %v167_v25 = vpop.f32.mrb[3].mxu0 }
  0xe2   :  { %v126_v26 = vadd.f32 %v121_v21, %v25_v18  ;;  %v175_v27 = vpop.f32.mrb[3].mxu1 }
  0xe4   :  { %128 = vst.msk [vmem:[#allocation2] sm:$0x3] %vm19_vm2, %v126_v26 }
  0xeb   :  { %v132_v29 = vld [vmem:[#allocation2] sm:$0x3] }
  0xec   :  { %v140_v30 = vadd.f32 %v153_v28, %v132_v29 }
  0xee   :  { %v141_v31 = vmax.f32 %v140_v30, 0.0 }
  0xf0   :  { %142 = vst.msk [vmem:[%s242_s3] sm:$0x3] %vm19_vm2, %v141_v31 }

// kernel: cnn_model3_forward.5
= control target key start
LH: loop header
LB: loop body
LE: loop exit
PB: predicated region body
PF: predicated region fallthrough
CT: control target
= control target key end

     0   :  { %s963_s15 = smov 0   ;;  %s1453_s0 = inlined_call_operand.vmem [shape: f32[4,8,8,16], index: 0, kind: input, shape index: {}]   ;;  %s1454_s1 = inlined_call_operand.vmem [shape: f32[400,32], index: 1, kind: input, shape index: {}]   ;;  %s1455_s2 = inlined_call_operand.vmem [shape: f32[1,32], index: 2, kind: input, shape index: {}]   ;;  %s1456_s3 = inlined_call_operand.vmem [shape: f32[1,32], index: 3, kind: input, shape index: {}]   ;;  %s1457_s4 = inlined_call_operand.vmem [shape: f32[4,1,32], index: 4, kind: output, shape index: {}]  }
   0x1 LB: > { %s814_s16 = sadd.s32 4294967295, %s928_s15   ;;  %p818_p0 = scmp.ge.s32.totalorder %s928_s15, 1  ;;  %s928_s15 = sphi %s963_s15, %s14_s15  }
   0x2   : > { %p162_p1 = scmp.lt.s32.totalorder %s928_s15, 5 }
   0x4   : > { %p163_p2 = pnand %p818_p0, %p162_p1 }
   0x5   : > { %p186_p3 = scmp.lt.s32.totalorder (!%p163_p2), %s814_s16, 3  ;;  %vm295_vm0 = vcmask (!%p163_p2), 1042432   ;;  %vm296_vm1 = vcmask (!%p163_p2), 1046532   ;;  %vm325_vm2 = vcmask (!%p163_p2), 1041408   ;;  %vm326_vm3 = vcmask (!%p163_p2), 1045508   ;;  %s930_s21 = smov (!%p163_p2), 32  }
   0x6   : > { %166 = sbr.rel (%p163_p2) target bundleno = 429 (0x1ad), region = 36  ;;  %vm289_vm4 = vcmask (!%p163_p2), 130048   ;;  %vm355_vm5 = vcmask (!%p163_p2), 1040384   ;;  %vm356_vm6 = vcmask (!%p163_p2), 1044484   ;;  %vm1037_vm7 = vmor (!%p163_p2), %vm295_vm0, %vm296_vm1  ;;  %s931_s22 = smov (!%p163_p2), 16   ;;  %v233_v56 = vld [vmem:[%s1454_s1 + $0x130] sm:$0xff] (!%p163_p2) }
   0x7   : > { %vm1051_vm8 = vmor (!%p163_p2), %vm325_vm2, %vm326_vm3  ;;  %s932_s23 = smov (!%p163_p2), 64   ;;  %s933_s24 = smov (!%p163_p2), 48   ;;  %vm323_vm10 = vcmask (!%p163_p2), 261248   ;;  %vm353_vm11 = vcmask (!%p163_p2), 392448   ;;  %vm383_vm12 = vcmask (!%p163_p2), 523648   ;;  %vm394_vm13 = vcmask (!%p163_p2), 654848  }
   0x8   : > { %vm1102_vm9 = vmor (!%p163_p2), %vm355_vm5, %vm356_vm6  ;;  %s934_s25 = smov (!%p163_p2), 80   ;;  %s935_s26 = smov (!%p163_p2), 96   ;;  %vm406_vm14 = vcmask (!%p163_p2), 786048   ;;  %vm422_vm15 = vcmask (!%p163_p2), 917248   ;;  %vm437_vm0 = vcmask (!%p163_p2), 1048448   ;;  %vm765_vm1 = vcmask (!%p163_p2), 253952  }
   0x9   : > { %s937_s27 = smov (!%p163_p2), 112  }
   0xd   : > { %s1465_s16 = smov (!%p186_p3, %s814_s16), 3 }
   0xe   : > { %s865_s17 = sshll.u32 %s1465_s16, 6 }
   0xf   : > { %s977_s20 = scalar_lea.vmem %s1453_s0, %s865_s17 }
  0x10   : > { %v980_v0 = vld [vmem:[%s977_s20 + $0x10] sm:$0xff]  ;;  %v983_v1 = vld [vmem:[%s977_s20 + $0x18] sm:$0xff]  ;;  %v986_v2 = vld [vmem:[%s977_s20 + $0x20] sm:$0xff] }
  0x11   : > { %v989_v3 = vld [vmem:[%s977_s20 + $0x28] sm:$0xff]  ;;  %v285_v4 = vcombine.low %v980_v0, %v983_v1  ;;  %v994_v5 = vld [vmem:[%s977_s20] sm:$0xff]  ;;  %v1001_v7 = vcombine.high %v983_v1, %v986_v2  ;;  %v1005_v8 = vcombine.high %v980_v0, %v983_v1  ;;  %v1009_v9 = vcombine.high %v980_v0, %v980_v0 }
  0x12   : > { %v997_v6 = vld [vmem:[%s977_s20 + $0x8] sm:$0xff]  ;;  %v1013_v10 = vcombine.low %v986_v2, %v989_v3  ;;  %v291_v14 = vcombine.high %v994_v5, %v994_v5  ;;  %v1029_v16 = vcombine.high %v983_v1, %v983_v1  ;;  %v821_v17 = vrot.slane %v994_v5, 9 }
  0x13   : > { %v284_v11 = vcombine.low %v994_v5, %v997_v6  ;;  %v838_v12 = vcombine.high %v997_v6, %v980_v0  ;;  %v833_v13 = vcombine.high %v994_v5, %v997_v6  ;;  %v1025_v15 = vcombine.high %v997_v6, %v997_v6 }
  0x14   : > { %v462_v18 = vpack.c.bf16 %v1013_v10, %v285_v4  ;;  %v300_v23 = vrot.slane %v291_v14, 5  ;;  %v822_v24 = vrot.slane %v997_v6, 9  ;;  %v823_v26 = vrot.slane %v980_v0, 9 }
  0x15   : > { %v288_v19 = vpack.c.bf16 %v285_v4, %v284_v11  ;;  %v453_v20 = vpack.c.bf16 %v1001_v7, %v838_v12  ;;  %v389_v21 = vpack.c.bf16 %v1005_v8, %v833_v13  ;;  %v304_v25 = vrot.slane %v1025_v15, 5 }
  0x16   : > { %464 = vrot.lane.b32.xlu1 %v462_v18, %s930_s21  ;;  %v308_v27 = vrot.slane %v1009_v9, 5  ;;  %v824_v28 = vrot.slane %v983_v1, 9  ;;  %v312_v29 = vrot.slane %v1029_v16, 5  ;;  %v825_v31 = vrot.slane %v994_v5, 10 }
  0x17   : > { %455 = vrot.lane.b32.xlu0 %v453_v20, %s931_s22  ;;  %290 = vst.msk [vmem:[#allocation2] sm:$0xff] %vm289_vm4, %v288_v19  ;;  %v301_v32 = vsel %vm1037_vm7, %v821_v17, %v300_v23  ;;  %v1061_v33 = vsel %vm1037_vm7, %v822_v24, %v304_v25  ;;  %v330_v34 = vrot.slane %v291_v14, 6  ;;  %v826_v35 = vrot.slane %v997_v6, 10 }
  0x18   : > { %v1066_v36 = vsel %vm1037_vm7, %v823_v26, %v308_v27  ;;  %v1070_v37 = vsel %vm1037_vm7, %v824_v28, %v312_v29  ;;  %v314_v38 = vcombine.low %v301_v32, %v1061_v33  ;;  %v334_v39 = vrot.slane %v1025_v15, 6  ;;  %v1142_v26 = vld [vmem:[%s977_s20 + $0x30] sm:$0xff] }
  0x19   : > { %v315_v40 = vcombine.low %v1066_v36, %v1070_v37  ;;  %v331_v41 = vsel %vm1051_vm8, %v825_v31, %v330_v34  ;;  %v827_v42 = vrot.slane %v980_v0, 10  ;;  %v338_v43 = vrot.slane %v1009_v9, 6 }
  0x1a   : > { %391 = vrot.lane.b32.xlu1 %v389_v21, %s932_s23  ;;  %v1083_v44 = vsel %vm1051_vm8, %v826_v35, %v334_v39  ;;  %v828_v45 = vrot.slane %v983_v1, 10  ;;  %v342_v46 = vrot.slane %v1029_v16, 6  ;;  %v408_v47 = vcombine.high %v986_v2, %v986_v2 }
  0x1b   : > { %v318_v48 = vpack.c.bf16 %v315_v40, %v314_v38  ;;  %v1091_v49 = vsel %vm1051_vm8, %v827_v42, %v338_v43  ;;  %v344_v50 = vcombine.low %v331_v41, %v1083_v44  ;;  %v835_v51 = vrot.slane %v986_v2, 9 }
  0x1c   : > { %v343_v52 = vsel %vm1051_vm8, %v828_v45, %v342_v46  ;;  %v411_v53 = vrot.slane %v408_v47, 5  ;;  %v468_v54 = vcombine.high %v989_v3, %v989_v3  ;;  %v840_v55 = vrot.slane %v989_v3, 9 }
  0x1d   : > { %320 = vrot.lane.b32.xlu0 %v318_v48, %s931_s22  ;;  %v345_v57 = vcombine.low %v1091_v49, %v343_v52  ;;  %v829_v58 = vrot.slane %v994_v5, 11  ;;  %v360_v59 = vrot.slane %v291_v14, 7  ;;  %v830_v60 = vrot.slane %v997_v6, 11 }
  0x1e   : > { %v412_v61 = vsel %vm1037_vm7, %v835_v51, %v411_v53  ;;  %v471_v62 = vrot.slane %v468_v54, 5  ;;  %v364_v63 = vrot.slane %v1025_v15, 7  ;;  %v831_v4 = vrot.slane %v980_v0, 11 }
  0x1f   : > { %v348_v11 = vpack.c.bf16 %v345_v57, %v344_v50  ;;  %v361_v12 = vsel %vm1102_vm9, %v829_v58, %v360_v59  ;;  %v368_v13 = vrot.slane %v1009_v9, 7  ;;  %v832_v5 = vrot.slane %v983_v1, 11  ;;  %v1171_v50 = vld [vmem:[%s977_s20 + $0x38] sm:$0xff] }
  0x20   : > { %v1120_v14 = vsel %vm1037_vm7, %v840_v55, %v471_v62  ;;  %v1124_v17 = vsel %vm1102_vm9, %v830_v60, %v364_v63  ;;  %v372_v15 = vrot.slane %v1029_v16, 7  ;;  %v836_v18 = vrot.slane %v986_v2, 10 }
  0x21   : > { %350 = vrot.lane.b32.xlu1 %v348_v11, %s930_s21  ;;  %v1130_v19 = vcombine.low %v412_v61, %v1120_v14  ;;  %v1134_v9 = vsel %vm1102_vm9, %v831_v4, %v368_v13  ;;  %v374_v20 = vcombine.low %v361_v12, %v1124_v17  ;;  %v426_v21 = vrot.slane %v408_v47, 6  ;;  %v211_v12 = vld [vmem:[%s1454_s1 + $0x80] sm:$0xff] }
  0x22   : > { %v373_v23 = vsel %vm1102_vm9, %v832_v5, %v372_v15  ;;  %v841_v24 = vrot.slane %v989_v3, 10  ;;  %v483_v16 = vrot.slane %v468_v54, 6  ;;  %v837_v25 = vrot.slane %v986_v2, 11 }
  0x23   : > { %v475_v27 = vpack.c.bf16 %v1130_v19, %v315_v40  ;;  %v375_v28 = vcombine.low %v1134_v9, %v373_v23  ;;  %v427_v29 = vsel %vm1051_vm8, %v836_v18, %v426_v21  ;;  %v441_v31 = vrot.slane %v408_v47, 7  ;;  %v214_v21 = vld [vmem:[%s1454_s1 + $0x98] sm:$0xff] }
  0x24   : > { %v484_v32 = vsel %vm1051_vm8, %v841_v24, %v483_v16  ;;  %v842_v34 = vrot.slane %v989_v3, 11  ;;  %v495_v35 = vrot.slane %v468_v54, 7  ;;  %v1158_v41 = vcombine.high %v1142_v26, %v1142_v26 }
  0x25   : > { %477 = vrot.lane.b32.xlu0 %v475_v27, %s933_s24  ;;  %v378_v38 = vpack.c.bf16 %v375_v28, %v374_v20  ;;  %v1152_v39 = vcombine.low %v427_v29, %v484_v32  ;;  %v442_v40 = vsel %vm1102_vm9, %v837_v25, %v441_v31  ;;  %v845_v43 = vrot.slane %v1142_v26, 10  ;;  %v213_v20 = vld [vmem:[%s1454_s1 + $0x90] sm:$0xff]  ;;  %v227_v25 = vld [vmem:[%s1454_s1 + $0x100] sm:$0xff]  ;;  %v228_v27 = vld [vmem:[%s1454_s1 + $0x108] sm:$0xff] }
  0x26   : > { %v496_v42 = vsel %vm1102_vm9, %v842_v34, %v495_v35  ;;  %v1167_v47 = vcombine.low %v343_v52, %v427_v29  ;;  %v533_v48 = vrot.slane %v1158_v41, 6  ;;  %v397_v51 = vcombine.low %v997_v6, %v980_v0 }
  0x27   : > { %380 = vrot.lane.b32.xlu1 %v378_v38, %s933_s24  ;;  %v487_v45 = vpack.c.bf16 %v1152_v39, %v345_v57  ;;  %v1165_v46 = vcombine.low %v442_v40, %v496_v42  ;;  %v843_v53 = vcombine.high %v986_v2, %v989_v3  ;;  %v851_v54 = vcombine.high %v1142_v26, %v1171_v50 }
  0x28   : > { %v846_v55 = vrot.slane %v1142_v26, 11  ;;  %v1184_v57 = vsel %vm1051_vm8, %v845_v43, %v533_v48  ;;  %v398_v58 = vcombine.low %v983_v1, %v986_v2  ;;  %v545_v0 = vrot.slane %v1158_v41, 7  ;;  %v229_v48 = vld [vmem:[%s1454_s1 + $0x110] sm:$0xff] }
  0x29   : > { %489 = vrot.lane.b32.xlu0 %v487_v45, %s932_s23  ;;  %v499_v52 = vpack.c.bf16 %v1165_v46, %v375_v28  ;;  %v535_v6 = vcombine.low %v484_v32, %v1184_v57  ;;  %v611_v59 = vpack.c.bf16 %v851_v54, %v843_v53  ;;  %v413_v63 = vcombine.low %v1061_v33, %v1066_v36  ;;  %v212_v36 = vld [vmem:[%s1454_s1 + $0x88] sm:$0xff] }
  0x2a   : > { %v1192_v60 = vsel %vm1102_vm9, %v846_v55, %v545_v0  ;;  %v1199_v4 = vcombine.low %v1070_v37, %v412_v61  ;;  %v401_v1 = vpack.c.bf16 %v398_v58, %v397_v51  ;;  %v444_v2 = vcombine.low %v373_v23, %v442_v40  ;;  %v195_v37 = vld [vmem:[%s1454_s1] sm:$0xff]  ;;  %v196_v61 = vld [vmem:[%s1454_s1 + $0x8] sm:$0xff]  ;;  %v230_v51 = vld [vmem:[%s1454_s1 + $0x118] sm:$0xff] }
  0x2b   : > { %v537_v62 = vpack.c.bf16 %v535_v6, %v1167_v47  ;;  %612 = vst.msk [vmem:[#allocation2 + $0x18] sm:$0xff] %vm289_vm4, %v611_v59  ;;  %v547_v11 = vcombine.low %v496_v42, %v1192_v60  ;;  %v507_v13 = vpack.c.bf16 %v843_v53, %v1005_v8  ;;  %v1210_v33 = vcombine.high %v1171_v50, %v1171_v50  ;;  %v215_v40 = vld [vmem:[%s1454_s1 + $0xa0] sm:$0xff]  ;;  %v217_v6 = vld [vmem:[%s1454_s1 + $0xb0] sm:$0xff]  ;;  %v218_v59 = vld [vmem:[%s1454_s1 + $0xb8] sm:$0xff] }
  0x2c   : > { %v443_v5 = vcombine.low %v1124_v17, %v1134_v9  ;;  %v417_v8 = vpack.c.bf16 %v1199_v4, %v413_v63  ;;  %v514_v15 = vcombine.low %v989_v3, %v1142_v26  ;;  %v847_v18 = vcombine.high %v989_v3, %v1142_v26  ;;  %v197_v17 = vld [vmem:[%s1454_s1 + $0x10] sm:$0xff]  ;;  %v198_v3 = vld [vmem:[%s1454_s1 + $0x18] sm:$0xff] }
  0x2d   : > { %501 = vrot.lane.b32.xlu0 %v499_v52, %s934_s25  ;;  %539 = vrot.lane.b32.xlu1 %v537_v62, %s931_s22  ;;  %v549_v9 = vpack.c.bf16 %v547_v11, %v444_v2  ;;  %v253_v24 = vpack.c.bf16 %v212_v36, %v211_v12  ;;  %v245_v16 = vpack.c.bf16 %v196_v61, %v195_v37  ;;  %v844_v28 = vrot.slane %v1142_v26, 9  ;;  %v200_v52 = vld [vmem:[%s1454_s1 + $0x28] sm:$0xff]  ;;  %v231_v11 = vld [vmem:[%s1454_s1 + $0x120] sm:$0xff]  ;;  %s193_s22 = scalar_lea.vmem %s1457_s4, %s1465_s16 }
  0x2e   : > { %v447_v23 = vpack.c.bf16 %v444_v2, %v443_v5  ;;  %v525_v29 = vrot.slane %v1158_v41, 5  ;;  %v848_v31 = vrot.slane %v1171_v50, 9  ;;  %v575_v32 = vrot.slane %v1210_v33, 5  ;;  %v216_v41 = vld [vmem:[%s1454_s1 + $0xa8] sm:$0xff] }
  0x2f   : > { %v849_v34 = vrot.slane %v1171_v50, 10  ;;  %v587_v35 = vrot.slane %v1210_v33, 6  ;;  %866 = vmatprep.subr.bf16.mxu0 %v253_v24  ;;  %v254_v38 = vpack.c.bf16 %v214_v21, %v213_v20  ;;  %v428_v42 = vcombine.low %v1083_v44, %v1091_v49  ;;  %v199_v49 = vld [vmem:[%s1454_s1 + $0x20] sm:$0xff]  ;;  %v232_v12 = vld [vmem:[%s1454_s1 + $0x128] sm:$0xff] }
  0x30   : > { %448 = vst.msk [vmem:[#allocation2 + $0x8] sm:$0xff] %vm289_vm4, %v447_v23  ;;  %867 = vmatpush3.bf16.msra.mxu0 %v245_v16  ;;  %v246_v43 = vpack.c.bf16 %v198_v3, %v197_v17  ;;  %v261_v45 = vpack.c.bf16 %v228_v27, %v227_v25  ;;  %v516_v53 = vpack.c.bf16 %v514_v15, %v398_v58  ;;  %v850_v44 = vrot.slane %v1171_v50, 11  ;;  %v220_v5 = vld [vmem:[%s1454_s1 + $0xc8] sm:$0xff]  ;;  %v203_v17 = vld [vmem:[%s1454_s1 + $0x40] sm:$0xff] }
  0x31   : > { %403 = vrot.lane.b32.xlu0 %v401_v1, %s934_s25  ;;  %509 = vrot.lane.b32.xlu1 %v507_v13, %s935_s26  ;;  %v557_v54 = vpack.c.bf16 %v847_v18, %v1001_v7  ;;  %v564_v55 = vcombine.low %v1142_v26, %v1171_v50  ;;  %v526_v58 = vsel %vm1037_vm7, %v844_v28, %v525_v29  ;;  %v599_v26 = vrot.slane %v1210_v33, 7  ;;  %v201_v13 = vld [vmem:[%s1454_s1 + $0x30] sm:$0xff]  ;;  %v202_v33 = vld [vmem:[%s1454_s1 + $0x38] sm:$0xff] }
  0x32   : > { %868 = vmatprep.subr.bf16.mxu0 %v254_v38  ;;  %v576_v7 = vsel %vm1037_vm7, %v848_v31, %v575_v32  ;;  %v936_v50 = vmov 0   ;;  %v255_v0 = vpack.c.bf16 %v216_v41, %v215_v40  ;;  %v588_v62 = vsel %vm1051_vm8, %v849_v34, %v587_v35  ;;  %v616_v15 = vld [vmem:[#allocation2 + $0x18] sm:$0xff]  ;;  %v236_v3 = vld [vmem:[%s1454_s1 + $0x148] sm:$0xff]  ;;  %v205_v28 = vld [vmem:[%s1454_s1 + $0x50] sm:$0xff] }
  0x33   : > { %661 = vmatprep.subr.bf16.mxu1 %v936_v50  ;;  %v262_v22 = vpack.c.bf16 %v230_v51, %v229_v48  ;;  %v527_v63 = vcombine.low %v1120_v14, %v526_v58  ;;  %v432_v1 = vpack.c.bf16 %v1167_v47, %v428_v42  ;;  %v247_v2 = vpack.c.bf16 %v200_v52, %v199_v49  ;;  %v206_v29 = vld [vmem:[%s1454_s1 + $0x58] sm:$0xff]  ;;  %v223_v31 = vld [vmem:[%s1454_s1 + $0xe0] sm:$0xff]  ;;  %v237_v35 = vld [vmem:[%s1454_s1 + $0x150] sm:$0xff] }
  0x34   : > { %662 = vmatpush1.bf16.msra.mxu1 %v261_v45  ;;  %869 = vmatpush3.bf16.msra.mxu0 %v246_v43  ;;  %v577_v30 = vcombine.low %v526_v58, %v576_v7  ;;  %v256_v47 = vpack.c.bf16 %v218_v59, %v217_v6  ;;  %v566_v36 = vpack.c.bf16 %v564_v55, %v1013_v10  ;;  %v238_v38 = vld [vmem:[%s1454_s1 + $0x158] sm:$0xff]  ;;  %v207_v41 = vld [vmem:[%s1454_s1 + $0x60] sm:$0xff]  ;;  %v208_v42 = vld [vmem:[%s1454_s1 + $0x68] sm:$0xff] }
  0x35   : > { %551 = vrot.lane.b32.xlu0 %v549_v9, %s930_s21  ;;  %419 = vrot.lane.b32.xlu1 %v417_v8, %s935_s26  ;;  %v529_v14 = vpack.c.bf16 %v527_v63, %v1199_v4  ;;  %v589_v37 = vcombine.low %v1184_v57, %v588_v62  ;;  %v600_v61 = vsel %vm1102_vm9, %v850_v44, %v599_v26  ;;  %v219_v4 = vld [vmem:[%s1454_s1 + $0xc0] sm:$0xff]  ;;  %v234_v57 = vld [vmem:[%s1454_s1 + $0x138] sm:$0xff] }
  0x36   : > { %663 = vmatprep.subr.bf16.mxu1 %v936_v50  ;;  %870 = vmatprep.subr.bf16.mxu0 %v255_v0  ;;  %v263_v8 = vpack.c.bf16 %v232_v12, %v231_v11  ;;  %v248_v10 = vpack.c.bf16 %v202_v33, %v201_v13  ;;  %v579_v18 = vpack.c.bf16 %v577_v30, %v1130_v19  ;;  %v204_v9 = vld [vmem:[%s1454_s1 + $0x48] sm:$0xff]  ;;  %v221_v19 = vld [vmem:[%s1454_s1 + $0xd0] sm:$0xff]  ;;  %v226_v45 = vld [vmem:[%s1454_s1 + $0xf8] sm:$0xff] }
  0x37   : > { %530 = vst.msk [vmem:[#allocation2 + $0x10] sm:$0xff] %vm289_vm4, %v529_v14  ;;  %v601_v20 = vcombine.low %v1192_v60, %v600_v61  ;;  %v257_v21 = vpack.c.bf16 %v220_v5, %v219_v4  ;;  %v591_v23 = vpack.c.bf16 %v589_v37, %v1152_v39  ;;  %v222_v60 = vld [vmem:[%s1454_s1 + $0xd8] sm:$0xff]  ;;  %852 = vmatprep.mubr.msk.bf16.mxu1 %vm289_vm4, %v616_v15  ;;  %v235_v39 = vld [vmem:[%s1454_s1 + $0x140] sm:$0xff]  ;;  %v225_v43 = vld [vmem:[%s1454_s1 + $0xf0] sm:$0xff] }
  0x38   : > { %664 = vmatpush1.bf16.msra.mxu1 %v262_v22  ;;  %871 = vmatpush3.bf16.msra.mxu0 %v247_v2  ;;  %v264_v24 = vpack.c.bf16 %v234_v57, %v233_v56  ;;  %v249_v16 = vpack.c.bf16 %v204_v9, %v203_v17  ;;  %v258_v27 = vpack.c.bf16 %v222_v60, %v221_v19  ;;  %v209_v44 = vld [vmem:[%s1454_s1 + $0x70] sm:$0xff]  ;;  %v210_v49 = vld [vmem:[%s1454_s1 + $0x78] sm:$0xff]  ;;  %v243_v6 = vld [vmem:[%s1454_s1 + $0x180] sm:$0xff] }
  0x39   : > { %518 = vrot.lane.b32.xlu0 %v516_v53, %s937_s27  ;;  %559 = vrot.lane.b32.xlu1 %v557_v54, %s933_s24  ;;  %v603_v25 = vpack.c.bf16 %v601_v20, %v1165_v46  ;;  %v224_v46 = vld [vmem:[%s1454_s1 + $0xe8] sm:$0xff]  ;;  %v265_v32 = vpack.c.bf16 %v236_v3, %v235_v39  ;;  %v250_v34 = vpack.c.bf16 %v206_v29, %v205_v28  ;;  %v239_v53 = vld [vmem:[%s1454_s1 + $0x160] sm:$0xff] }
  0x3a   : > { %665 = vmatprep.subr.bf16.mxu1 %v936_v50  ;;  %872 = vmatprep.subr.bf16.mxu0 %v256_v47  ;;  %v259_v40 = vpack.c.bf16 %v224_v46, %v223_v31  ;;  %v266_v48 = vpack.c.bf16 %v238_v38, %v237_v35  ;;  %v251_v51 = vpack.c.bf16 %v208_v42, %v207_v41  ;;  %v240_v54 = vld [vmem:[%s1454_s1 + $0x168] sm:$0xff]  ;;  %v241_v7 = vld [vmem:[%s1454_s1 + $0x170] sm:$0xff]  ;;  %v242_v26 = vld [vmem:[%s1454_s1 + $0x178] sm:$0xff] }
  0x3b   : > { %v260_v55 = vpack.c.bf16 %v226_v45, %v225_v43  ;;  %v267_v52 = vpack.c.bf16 %v240_v54, %v239_v53  ;;  %v252_v58 = vpack.c.bf16 %v210_v49, %v209_v44  ;;  %v268_v0 = vpack.c.bf16 %v242_v26, %v241_v7  ;;  %v244_v59 = vld [vmem:[%s1454_s1 + $0x188] sm:$0xff] }
  0x3c   : > { %666 = vmatpush1.bf16.msra.mxu1 %v263_v8  ;;  %873 = vmatpush3.bf16.msra.mxu0 %v248_v10  ;;  %v269_v62 = vpack.c.bf16 %v244_v59, %v243_v6 }
  0x3d   : > { %434 = vrot.lane.b32.xlu0 %v432_v1, %s937_s27  ;;  %568 = vrot.lane.b32.xlu1 %v566_v36, %s932_s23 }
  0x3e   : > { %667 = vmatprep.subr.bf16.mxu1 %v936_v50  ;;  %874 = vmatprep.subr.bf16.mxu0 %v257_v21 }
  0x40   : > { %668 = vmatpush1.bf16.msra.mxu1 %v264_v24  ;;  %875 = vmatpush3.bf16.msra.mxu0 %v249_v16  ;;  %v853_v24 = vld [vmem:[%s1455_s2] ss:$0 sm:$0xff] }
  0x41   : > { %581 = vrot.lane.b32.xlu0 %v579_v18, %s934_s25  ;;  %593 = vrot.lane.b32.xlu1 %v591_v23, %s935_s26 }
  0x42   : > { %669 = vmatprep.subr.bf16.mxu1 %v936_v50  ;;  %876 = vmatprep.subr.bf16.mxu0 %v258_v27 }
  0x44   : > { %670 = vmatpush1.bf16.msra.mxu1 %v265_v32  ;;  %877 = vmatpush3.bf16.msra.mxu0 %v250_v34 }
  0x45   : > { %605 = vrot.lane.b32.xlu0 %v603_v25, %s937_s27  ;;  %671 = vmatprep.subr.bf16.mxu1 %v936_v50  ;;  %v854_v25 = vld [vmem:[%s1456_s3] ss:$0 sm:$0xff] }
  0x46   : > { %878 = vmatprep.subr.bf16.mxu0 %v259_v40 }
  0x48   : > { %672 = vmatpush1.bf16.msra.mxu1 %v266_v48  ;;  %879 = vmatpush3.bf16.msra.mxu0 %v251_v51 }
  0x49   : > { %673 = vmatprep.subr.bf16.mxu1 %v936_v50  ;;  %880 = vmatprep.subr.bf16.mxu0 %v260_v55 }
  0x4c   : > { %674 = vmatpush1.bf16.msra.mxu1 %v267_v52  ;;  %881 = vmatpush3.bf16.msra.mxu0 %v252_v58 }
  0x4d   : > { %675 = vmatprep.subr.bf16.mxu1 %v936_v50 }
  0x50   : > { %676 = vmatpush1.bf16.msra.mxu1 %v268_v0 }
  0x51   : > { %677 = vmatprep.subr.bf16.mxu1 %v936_v50 }
  0x54   : > { %678 = vmatpush1.bf16.msra.mxu1 %v269_v62 }
  0x88   : > { %v465_v22 = vpop.permute.xlu1 %464 }
  0x89   : > { %v456_v63 = vpop.permute.xlu0 %455 }
  0x8a   : > { %458 = vst.msk [vmem:[#allocation2 + $0x8] sm:$0xff] %vm323_vm10, %v456_v63 }
  0x8b   : > { %467 = vst.msk [vmem:[#allocation2 + $0x8] sm:$0xff] %vm353_vm11, %v465_v22 }
  0x8c   : > { %v392_v1 = vpop.permute.xlu1 %391 }
  0x8f   : > { %v321_v2 = vpop.permute.xlu0 %320 }
  0x90   : > { %324 = vst.msk [vmem:[#allocation2] sm:$0xff] %vm323_vm10, %v321_v2 }
  0x93   : > { %v351_v11 = vpop.permute.xlu1 %350 }
  0x94   : > { %354 = vst.msk [vmem:[#allocation2] sm:$0xff] %vm353_vm11, %v351_v11 }
  0x97   : > { %v478_v12 = vpop.permute.xlu0 %477 }
  0x98   : > { %480 = vst.msk [vmem:[#allocation2 + $0x8] sm:$0xff] %vm383_vm12, %v478_v12 }
  0x99   : > { %v381_v50 = vpop.permute.xlu1 %380 }
  0x9a   : > { %384 = vst.msk [vmem:[#allocation2] sm:$0xff] %vm383_vm12, %v381_v50 }
  0x9b   : > { %v490_v30 = vpop.permute.xlu0 %489  ;;  %395 = vst.msk [vmem:[#allocation2] sm:$0xff] %vm394_vm13, %v392_v1 }
  0x9c   : > { %492 = vst.msk [vmem:[#allocation2 + $0x8] sm:$0xff] %vm394_vm13, %v490_v30 }
  0x9f   : > { %v502_v14 = vpop.permute.xlu0 %501  ;;  %v540_v47 = vpop.permute.xlu1 %539 }
  0xa0   : > { %504 = vst.msk [vmem:[#allocation2 + $0x8] sm:$0xff] %vm406_vm14, %v502_v14 }
  0xa1   : > { %542 = vst.msk [vmem:[#allocation2 + $0x10] sm:$0xff] %vm323_vm10, %v540_v47 }
  0xa3   : > { %v404_v13 = vpop.permute.xlu0 %403  ;;  %v510_v33 = vpop.permute.xlu1 %509 }
  0xa4   : > { %407 = vst.msk [vmem:[#allocation2] sm:$0xff] %vm406_vm14, %v404_v13 }
  0xa5   : > { %512 = vst.msk [vmem:[#allocation2 + $0x8] sm:$0xff] %vm422_vm15, %v510_v33 }
  0xa7   : > { %v552_v36 = vpop.permute.xlu0 %551  ;;  %v420_v37 = vpop.permute.xlu1 %419 }
  0xa8   : > { %554 = vst.msk [vmem:[#allocation2 + $0x10] sm:$0xff] %vm353_vm11, %v552_v36 }
  0xa9   : > { %423 = vst.msk [vmem:[#allocation2] sm:$0xff] %vm422_vm15, %v420_v37 }
  0xab   : > { %v519_v61 = vpop.permute.xlu0 %518  ;;  %v560_v4 = vpop.permute.xlu1 %559 }
  0xac   : > { %521 = vst.msk [vmem:[#allocation2 + $0x8] sm:$0xff] %vm437_vm0, %v519_v61 }
  0xad   : > { %562 = vst.msk [vmem:[#allocation2 + $0x10] sm:$0xff] %vm383_vm12, %v560_v4 }
  0xaf   : > { %v435_v5 = vpop.permute.xlu0 %434  ;;  %v569_v8 = vpop.permute.xlu1 %568 }
  0xb0   : > { %438 = vst.msk [vmem:[#allocation2] sm:$0xff] %vm437_vm0, %v435_v5 }
  0xb1   : > { %571 = vst.msk [vmem:[#allocation2 + $0x10] sm:$0xff] %vm394_vm13, %v569_v8 }
  0xb3   : > { %v582_v15 = vpop.permute.xlu0 %581  ;;  %v614_v10 = vld [vmem:[#allocation2 + $0x8] sm:$0xff]  ;;  %v594_v56 = vpop.permute.xlu1 %593 }
  0xb4   : > { %584 = vst.msk [vmem:[#allocation2 + $0x10] sm:$0xff] %vm406_vm14, %v582_v15  ;;  %652 = vmatprep.mubr.bf16.mxu0 %v614_v10 }
  0xb5   : > { %596 = vst.msk [vmem:[#allocation2 + $0x10] sm:$0xff] %vm422_vm15, %v594_v56 }
  0xb7   : > { %v606_v57 = vpop.permute.xlu0 %605  ;;  %v613_v18 = vld [vmem:[#allocation2] sm:$0xff] }
  0xb8   : > { %608 = vst.msk [vmem:[#allocation2 + $0x10] sm:$0xff] %vm437_vm0, %v606_v57  ;;  %653 = vmatmul.mubr.bf16.vlgmr.msra.gmra.mrb[0].mxu0 %v613_v18 }
  0xbf   : > { %v615_v20 = vld [vmem:[#allocation2 + $0x10] sm:$0xff] }
  0xc0   : > { %694 = vmatmul.mubr.bf16.vlgmr.msra.gmra.mrb[0].mxu1 %v615_v20 }
 0x18b   : > { %v882_v21 = vpop.f32.mrb[0].mxu0 }
 0x18c   : > { %v883_v17 = vpop.f32.mrb[1].mxu0 }
 0x18d   : > { %v884_v9 = vadd.f32 %v883_v17, %v882_v21  ;;  %v885_v23 = vpop.f32.mrb[2].mxu0 }
 0x18e   : > { %v886_v19 = vpop.f32.mrb[3].mxu0 }
 0x18f   : > { %v887_v60 = vadd.f32 %v886_v19, %v885_v23 }
 0x193   : > { %v695_v16 = vpop.f32.mrb[0].mxu1 }
 0x194   : > { %v696_v39 = vadd.f32 %v884_v9, %v695_v16  ;;  %v697_v3 = vpop.f32.mrb[1].mxu1 }
 0x195   : > { %v698_v27 = vpop.f32.mrb[2].mxu1 }
 0x196   : > { %v708_v28 = vmul.f32 %v853_v24, %v696_v39  ;;  %v699_v29 = vadd.f32 %v887_v60, %v698_v27  ;;  %v700_v31 = vpop.f32.mrb[3].mxu1 }
 0x198   : > { %v716_v46 = vadd.f32 %v854_v25, %v708_v28  ;;  %v709_v32 = vmul.f32 %v853_v24, %v699_v29 }
 0x19a   : > { %v718_v34 = vmax.f32 %v716_v46, 0.0  ;;  %v717_v35 = vadd.f32 %v854_v25, %v709_v32 }
 0x19c   : > { %v722_v38 = vcombine.high %v718_v34, %v718_v34  ;;  %v855_v40 = vrot.slane %v718_v34, 9  ;;  %v719_v41 = vmax.f32 %v717_v35, 0.0 }
 0x19e   : > { %v856_v42 = vrot.slane %v722_v38, 9  ;;  %v738_v43 = vmax.f32 %v718_v34, %v855_v40  ;;  %v723_v45 = vcombine.high %v719_v41, %v719_v41  ;;  %v857_v48 = vrot.slane %v719_v41, 9 }
 0x1a0   : > { %v739_v51 = vmax.f32 %v722_v38, %v856_v42  ;;  %v858_v53 = vrot.slane %v723_v45, 9  ;;  %v740_v54 = vmax.f32 %v719_v41, %v857_v48  ;;  %v859_v55 = vrot.slane %v738_v43, 10 }
 0x1a2   : > { %v860_v44 = vrot.slane %v739_v51, 10  ;;  %v741_v49 = vmax.f32 %v723_v45, %v858_v53  ;;  %v861_v52 = vrot.slane %v740_v54, 10  ;;  %v758_v26 = vmax.f32 %v738_v43, %v859_v55 }
 0x1a4   : > { %v759_v58 = vmax.f32 %v739_v51, %v860_v44  ;;  %v862_v7 = vrot.slane %v741_v49, 10  ;;  %v760_v0 = vmax.f32 %v740_v54, %v861_v52 }
 0x1a6   : > { %v761_v6 = vmax.f32 %v741_v49, %v862_v7  ;;  %v762_v59 = vmax.f32 %v758_v26, %v759_v58 }
 0x1a8   : > { %v763_v62 = vmax.f32 %v760_v0, %v761_v6 }
 0x1aa   : > { %v764_v22 = vmax.f32 %v762_v59, %v763_v62 }
 0x1ac   : > { %766 = vst.msk [vmem:[%s193_s22] sm:$0x1] %vm765_vm1, %v764_v22 }
 0x1ad PF: > { %s14_s15 = sadd.s32 1, %s928_s15  }
 0x1ae   : > { %p11_p4 = scmp.ge.s32.totalorder %s14_s15, 6  }
 0x1b0   :  { %13 = sbr.rel (!%p11_p4) target bundleno = 1 (0x1), region = 66 }

// kernel: cnn_model3_forward.7
= control target key start
LH: loop header
LB: loop body
LE: loop exit
PB: predicated region body
PF: predicated region fallthrough
CT: control target
= control target key end

     0   :  { %v125_v3 = vmov 0.0   ;;  %vm126_vm0 = vmmov 0   ;;  %s172_s0 = inlined_call_operand.vmem [shape: f32[2,16], index: 0, kind: input, shape index: {}]   ;;  %s173_s1 = inlined_call_operand.vmem [shape: f32[16,8], index: 1, kind: input, shape index: {}]   ;;  %s174_s2 = inlined_call_operand.vmem [shape: f32[1,8], index: 2, kind: input, shape index: {}]   ;;  %s175_s3 = inlined_call_operand.hbm [shape: f32[2,8], index: 3, kind: output, shape index: {}]  }
   0x1   :  { %v18_v0 = vld [vmem:[%s173_s1] sm:$0xff]  ;;  %v19_v1 = vld [vmem:[%s173_s1 + $0x8] sm:$0xff]  ;;  %92 = vmatprep.subr.bf16.mxu0 %v125_v3  ;;  %94 = vmatprep.mubr.msk.bf16.mxu0 %vm126_vm0, %v125_v3 }
   0x2   :  { %v16_v2 = vld [vmem:[%s172_s0] sm:$0x3]  ;;  %v20_v4 = vpack.c.bf16 %v19_v1, %v18_v0 }
   0x3   :  { %8 = vsyncpa [#allocation3], 0  ;;  %v17_v5 = vpack.c.bf16 %v16_v2, %v16_v2  ;;  %vm28_vm1 = vcmask 130048   ;;  %v88_v6 = vld [vmem:[%s174_s2] ss:$0 sm:$0xff]  ;;  %s127_s20 = smov [#allocation2]  }
   0x4   :  { %93 = vmatpush3.bf16.msra.mxu0 %v20_v4  ;;  %s80_s1 = sshll.u32 %s127_s20, 4  ;;  %vm72_vm2 = vcmask 58368   ;;  %s81_s1 = int_to_ptr.vmem [resolvable:$true] %s80_s1 }
   0x5   :  { %s101_s0 = scalar_lea.vmem %s81_s1, 32  ;;  %p106_p1 = scmp.lt.s32.totalorder %s81_s1, %s81_s1 }
   0x6   :  { %p102_p0 = scmp.ne.s32.totalorder %s81_s1, %s101_s0  ;;  %p107_p2 = scmp.lt.s32.totalorder %s101_s0, %s101_s0 }
   0x7   :  { %95 = vmatmul.mubr.msk.bf16.vlgmr.msra.gmra.mrb[0].mxu0 %vm28_vm1, %v17_v5 }
   0x8   :  { %p108_p3 = por %p107_p2, %p106_p1 }
   0xa   :  { %p109_p4 = pnand %p108_p3, %p102_p0 }
  0xda   :  { %v66_v7 = vpop.f32.mrb[0].mxu0 }
  0xdb   :  { %v67_v8 = vadd.f32 %v88_v6, %v66_v7  ;;  %v96_v9 = vpop.f32.mrb[1].mxu0 }
  0xdc   :  { %v69_v10 = vpop.f32.mrb[2].mxu0 }
  0xdd   :  { %v97_v11 = vpop.f32.mrb[3].mxu0  ;;  %73 = vst.msk [vmem:[#allocation2] sm:$0x3] %vm72_vm2, %v67_v8 }
  0xde   :  { %112 = shalt.err (!%p109_p4)
}
  0xdf   :  { %s113_s2 = scalar_lea.hbm %s175_s3, 32 }
  0xe0   :  { %p114_p5 = scmp.ne.s32.totalorder %s175_s3, %s113_s2  ;;  %p117_p6 = scmp.lt.u32.totalorder %s113_s2, %s175_s3 }
  0xe2   :  { %p119_p7 = pnand %p117_p6, %p114_p5 }
  0xe4   :  { %122 = shalt.err (!%p119_p7)
}
  0xe5   :  { %83 = dma.vmem_to_hbm [thread:$0]  %s81_s1, 32, %s175_s3, [#allocation3]  }
  0xe6   :  { %123 = dma.done.wait [#allocation3], 32  }
  0xe7   :  { %124 = vsyncadd [#allocation3], 4294967264 }
  0xe8   :  { %87 = vsyncpa [#allocation3], 1 }

// kernel: cnn_model3_forward.4
= control target key start
LH: loop header
LB: loop body
LE: loop exit
PB: predicated region body
PF: predicated region fallthrough
CT: control target
= control target key end

     0   :  { %s4211_s15 = smov 0   ;;  %s6493_s0 = inlined_call_operand.vmem [shape: f32[4,20,20,1], index: 0, kind: input, shape index: {}]   ;;  %s6494_s1 = inlined_call_operand.vmem [shape: f32[25,16], index: 1, kind: input, shape index: {}]   ;;  %s6495_s2 = inlined_call_operand.vmem [shape: f32[1,16], index: 2, kind: input, shape index: {}]   ;;  %s6496_s3 = inlined_call_operand.vmem [shape: f32[1,16], index: 3, kind: input, shape index: {}]   ;;  %s6497_s4 = inlined_call_operand.vmem [shape: f32[4,4,64], index: 4, kind: output, shape index: {}]  }
   0x1 LB: > { %s3893_s16 = sadd.s32 4294967295, %s4154_s15   ;;  %p3897_p0 = scmp.ge.s32.totalorder %s4154_s15, 1  ;;  %s4154_s15 = sphi %s4211_s15, %s14_s15  }
   0x2   : > { %p162_p1 = scmp.lt.s32.totalorder %s4154_s15, 5 }
   0x4   : > { %p163_p2 = pnand %p3897_p0, %p162_p1 }
   0x6   : > { %166 = sbr.rel (%p163_p2) target bundleno = 1297 (0x511), region = 36 }
   0xd   : > { %p187_p3 = scmp.lt.s32.totalorder %s3893_s16, 3  ;;  %vm6612_vm0 = vcmask 1046528   ;;  %vm281_vm1 = vcmask 7168   ;;  %s4156_s21 = smov 1   ;;  %vm556_vm2 = vcmask 1045504   ;;  %vm766_vm3 = vcmask 1044480  }
   0xe   : > { %s4157_s22 = smov 2   ;;  %s4158_s23 = smov 3   ;;  %vm976_vm4 = vcmask 1043456   ;;  %vm539_vm5 = vcmask 15368   ;;  %vm749_vm6 = vcmask 23568   ;;  %vm959_vm7 = vcmask 31768  }
   0xf   : > { %s6802_s16 = smov (!%p187_p3, %s3893_s16), 3  ;;  %s4159_s24 = smov 4   ;;  %vm1169_vm8 = vcmask 39968   ;;  %vm1251_vm9 = vcmask 48168   ;;  %vm1328_vm10 = vcmask 56368   ;;  %vm1402_vm11 = vcmask 64568  }
  0x10   : > { %s4106_s17 = smul.u32 480, %s6802_s16  ;;  %s4160_s25 = smov 5   ;;  %vm1476_vm12 = vcmask 72768   ;;  %vm1550_vm13 = vcmask 80968   ;;  %vm1617_vm14 = vcmask 89168   ;;  %vm1694_vm15 = vcmask 97368  }
  0x11   : > { %s4161_s26 = smov 6   ;;  %s4162_s27 = smov 7  }
  0x12   : > { %s4225_s20 = scalar_lea.vmem %s6493_s0, %s4106_s17  ;;  %s4163_s28 = smov 8  }
  0x13   : > { %v4228_v0 = vld [vmem:[%s4225_s20 + $0x30] sm:$0xff]  ;;  %v4231_v1 = vld [vmem:[%s4225_s20 + $0x38] sm:$0xff]  ;;  %v4234_v2 = vld [vmem:[%s4225_s20 + $0x40] sm:$0xf]  ;;  %s4164_s29 = smov 9   ;;  %s4165_s30 = smov 10  }
  0x14   : > { %v357_v3 = vrot.slane %v4228_v0, 1  ;;  %v358_v4 = vrot.slane %v4231_v1, 1  ;;  %v360_v5 = vrot.slane %v4234_v2, 1  ;;  %v4240_v6 = vld [vmem:[%s4225_s20] sm:$0xff]  ;;  %v4243_v7 = vld [vmem:[%s4225_s20 + $0x8] sm:$0xff]  ;;  %v4250_v9 = vpack.c.bf16 %v4231_v1, %v4228_v0  ;;  %v4258_v13 = vld [vmem:[%s4225_s20 + $0x50] sm:$0xff] }
  0x15   : > { %v4246_v8 = vld [vmem:[%s4225_s20 + $0x48] sm:$0xff]  ;;  %v4253_v10 = vld [vmem:[%s4225_s20 + $0x10] sm:$0xf]  ;;  %v347_v11 = vrot.slane %v4240_v6, 1  ;;  %v348_v12 = vrot.slane %v4243_v7, 1  ;;  %6619 = vst [vmem:[#allocation4_spill] sm:$0xff] %v4258_v13  ;;  %v265_v15 = vpack.c.bf16 %v4243_v7, %v4240_v6 }
  0x16   : > { %6618 = vst [vmem:[#allocation3_spill] sm:$0xff] %v4250_v9  ;;  %v362_v14 = vrot.slane %v4246_v8, 1  ;;  %v359_v16 = vsel %vm6612_vm0, %v357_v3, %v358_v4  ;;  %v361_v17 = vsel %vm6612_vm0, %v358_v4, %v360_v5  ;;  %v350_v18 = vrot.slane %v4253_v10, 1  ;;  %v4267_v19 = vld [vmem:[%s4225_s20 + $0x58] sm:$0xf]  ;;  %v4274_v22 = vld [vmem:[%s4225_s20 + $0x20] sm:$0xff] }
  0x17   : > { %v363_v20 = vrot.slane %v4258_v13, 1  ;;  %v4271_v21 = vld [vmem:[%s4225_s20 + $0x18] sm:$0xff]  ;;  %284 = vst.msk [vmem:[#allocation2 + $0x10] sm:$0xff] %vm281_vm1, %v4250_v9  ;;  %v4278_v23 = vpack.c.bf16 %v361_v17, %v359_v16  ;;  %v349_v24 = vsel %vm6612_vm0, %v347_v11, %v348_v12  ;;  %v365_v25 = vrot.slane %v4267_v19, 1  ;;  %v4283_v26 = vld [vmem:[%s4225_s20 + $0x28] sm:$0xf] }
  0x18   : > { %v352_v27 = vrot.slane %v4271_v21, 1  ;;  %v4287_v28 = vld [vmem:[%s4225_s20 + $0x78] sm:$0xff]  ;;  %v4290_v29 = vld [vmem:[%s4225_s20 + $0x80] sm:$0xff]  ;;  %282 = vst.msk [vmem:[#allocation2] sm:$0xff] %vm281_vm1, %v265_v15  ;;  %v351_v30 = vsel %vm6612_vm0, %v348_v12, %v350_v18  ;;  %v353_v32 = vrot.slane %v4274_v22, 1  ;;  %v355_v33 = vrot.slane %v4283_v26, 1 }
  0x19   : > { %6620 = vst [vmem:[#allocation5_spill] sm:$0xff] %v4278_v23  ;;  %v364_v31 = vsel %vm6612_vm0, %v362_v14, %v363_v20  ;;  %v4298_v34 = vld [vmem:[%s4225_s20 + $0x88] sm:$0xf]  ;;  %v4301_v35 = vld [vmem:[%s4225_s20 + $0x60] sm:$0xff]  ;;  %495 = vrot.lane.b32.xlu1 %v4278_v23, %s4156_s21  ;;  %v459_v37 = vpack.c.bf16 %v351_v30, %v349_v24  ;;  %v366_v38 = vsel %vm6612_vm0, %v363_v20, %v365_v25  ;;  %v372_v39 = vrot.slane %v4287_v28, 1  ;;  %v4318_v43 = vld [vmem:[%s4225_s20 + $0xb0] sm:$0xff] }
  0x1a   : > { %6621 = vst [vmem:[#allocation6_spill] sm:$0xff] %v4298_v34  ;;  %v4304_v36 = vld [vmem:[%s4225_s20 + $0x68] sm:$0xff]  ;;  %v373_v40 = vrot.slane %v4290_v29, 1  ;;  %v4312_v41 = vld [vmem:[%s4225_s20 + $0x70] sm:$0xf]  ;;  %v4320_v44 = vpack.c.bf16 %v366_v38, %v364_v31  ;;  %v354_v45 = vsel %vm6612_vm0, %v352_v27, %v353_v32  ;;  %v356_v46 = vsel %vm6612_vm0, %v353_v32, %v355_v33  ;;  %v4338_v54 = vld [vmem:[%s4225_s20 + $0x98] sm:$0xff] }
  0x1b   : > { %v4315_v42 = vld [vmem:[%s4225_s20 + $0xa8] sm:$0xff]  ;;  %v375_v47 = vrot.slane %v4298_v34, 1  ;;  %v4326_v48 = vld [vmem:[%s4225_s20 + $0xb8] sm:$0xf]  ;;  %v4329_v49 = vld [vmem:[%s4225_s20 + $0x90] sm:$0xff]  ;;  %491 = vrot.lane.b32.xlu0 %v459_v37, %s4156_s21  ;;  %v4332_v50 = vpack.c.bf16 %v356_v46, %v354_v45  ;;  %v367_v52 = vrot.slane %v4301_v35, 1 }
  0x1c   : > { %6622 = vst [vmem:[#allocation7_spill] sm:$0xff] %v4320_v44  ;;  %v374_v51 = vsel %vm6612_vm0, %v372_v39, %v373_v40  ;;  %v368_v53 = vrot.slane %v4304_v36, 1  ;;  %v4341_v55 = vld [vmem:[%s4225_s20 + $0xa0] sm:$0xf]  ;;  %v370_v57 = vrot.slane %v4312_v41, 1  ;;  %v382_v58 = vrot.slane %v4315_v42, 1 }
  0x1d   : > { %6623 = vst [vmem:[#allocation8_spill] sm:$0xff] %v4332_v50  ;;  %v376_v56 = vsel %vm6612_vm0, %v373_v40, %v375_v47  ;;  %v383_v59 = vrot.slane %v4318_v43, 1  ;;  %v4348_v60 = vld [vmem:[%s4225_s20 + $0xd8] sm:$0xff]  ;;  %v4351_v61 = vld [vmem:[%s4225_s20 + $0xe0] sm:$0xff]  ;;  %497 = vrot.lane.b32.xlu1 %v4320_v44, %s4156_s21  ;;  %v385_v3 = vrot.slane %v4326_v48, 1  ;;  %v377_v4 = vrot.slane %v4329_v49, 1 }
  0x1e   : > { %v4355_v62 = vpack.c.bf16 %v376_v56, %v374_v51  ;;  %v369_v63 = vsel %vm6612_vm0, %v367_v52, %v368_v53  ;;  %v4361_v5 = vld [vmem:[%s4225_s20 + $0xe8] sm:$0xf]  ;;  %v371_v11 = vsel %vm6612_vm0, %v368_v53, %v370_v57  ;;  %v378_v14 = vrot.slane %v4338_v54, 1  ;;  %v4368_v16 = vld [vmem:[%s4225_s20 + $0xc0] sm:$0xff]  ;;  %v4381_v27 = vld [vmem:[%s4225_s20 + $0xd0] sm:$0xf] }
  0x1f   : > { %v384_v12 = vsel %vm6612_vm0, %v382_v58, %v383_v59  ;;  %v380_v15 = vrot.slane %v4341_v55, 1  ;;  %v4371_v17 = vld [vmem:[%s4225_s20 + $0xc8] sm:$0xff]  ;;  %493 = vrot.lane.b32.xlu0 %v4332_v50, %s4156_s21  ;;  %v4375_v18 = vpack.c.bf16 %v371_v11, %v369_v63  ;;  %v386_v20 = vsel %vm6612_vm0, %v383_v59, %v385_v3  ;;  %6626 = vst [vmem:[#allocation11_spill] sm:$0xff] %v4381_v27  ;;  %v4387_v31 = vld [vmem:[%s4225_s20 + $0x110] sm:$0xff]  ;;  %v4393_v38 = vld [vmem:[%s4225_s20 + $0x118] sm:$0xf] }
  0x20   : > { %6624 = vst [vmem:[#allocation9_spill] sm:$0xff] %v4355_v62  ;;  %v392_v24 = vrot.slane %v4348_v60, 1  ;;  %v393_v25 = vrot.slane %v4351_v61, 1  ;;  %v4384_v30 = vld [vmem:[%s4225_s20 + $0x108] sm:$0xff]  ;;  %v379_v32 = vsel %vm6612_vm0, %v377_v4, %v378_v14  ;;  %v395_v37 = vrot.slane %v4361_v5, 1  ;;  %6627 = vst [vmem:[#allocation12_spill] sm:$0xff] %v4393_v38 }
  0x21   : > { %6625 = vst [vmem:[#allocation10_spill] sm:$0xff] %v4375_v18  ;;  %v381_v33 = vsel %vm6612_vm0, %v378_v14, %v380_v15  ;;  %v4396_v39 = vld [vmem:[%s4225_s20 + $0xf0] sm:$0xff]  ;;  %501 = vrot.lane.b32.xlu1 %v4355_v62, %s4156_s21  ;;  %v4400_v40 = vpack.c.bf16 %v386_v20, %v384_v12  ;;  %v387_v46 = vrot.slane %v4368_v16, 1  ;;  %v388_v47 = vrot.slane %v4371_v17, 1  ;;  %v4406_v51 = vld [vmem:[%s4225_s20 + $0xf8] sm:$0xff]  ;;  %v4419_v63 = vld [vmem:[%s4225_s20 + $0x140] sm:$0xff] }
  0x22   : > { %v394_v45 = vsel %vm6612_vm0, %v392_v24, %v393_v25  ;;  %v4409_v52 = vld [vmem:[%s4225_s20 + $0x100] sm:$0xf]  ;;  %v396_v53 = vsel %vm6612_vm0, %v393_v25, %v395_v37  ;;  %v390_v56 = vrot.slane %v4381_v27, 1  ;;  %v402_v57 = vrot.slane %v4384_v30, 1  ;;  %v4416_v59 = vld [vmem:[%s4225_s20 + $0x138] sm:$0xff]  ;;  %6630 = vst [vmem:[#allocation15_spill] sm:$0xff] %v4419_v63 }
  0x23   : > { %6628 = vst [vmem:[#allocation13_spill] sm:$0xff] %v4400_v40  ;;  %6629 = vst [vmem:[#allocation14_spill] sm:$0xff] %v4409_v52  ;;  %v403_v58 = vrot.slane %v4387_v31, 1  ;;  %499 = vrot.lane.b32.xlu0 %v4375_v18, %s4156_s21  ;;  %v4423_v3 = vpack.c.bf16 %v381_v33, %v379_v32  ;;  %v389_v4 = vsel %vm6612_vm0, %v387_v46, %v388_v47  ;;  %v405_v11 = vrot.slane %v4393_v38, 1  ;;  %v4429_v14 = vld [vmem:[%s4225_s20 + $0x148] sm:$0xf] }
  0x24   : > { %v397_v12 = vrot.slane %v4396_v39, 1  ;;  %6632 = vst [vmem:[#allocation17_spill] sm:$0xff] %v4429_v14  ;;  %v391_v15 = vsel %vm6612_vm0, %v388_v47, %v390_v56  ;;  %v398_v20 = vrot.slane %v4406_v51, 1  ;;  %v400_v24 = vrot.slane %v4409_v52, 1  ;;  %v4435_v25 = vld [vmem:[%s4225_s20 + $0x120] sm:$0xff]  ;;  %v4438_v32 = vld [vmem:[%s4225_s20 + $0x128] sm:$0xff] }
  0x25   : > { %6631 = vst [vmem:[#allocation16_spill] sm:$0xff] %v4423_v3  ;;  %6633 = vst [vmem:[#allocation18_spill] sm:$0xff] %v4435_v25  ;;  %505 = vrot.lane.b32.xlu1 %v4400_v40, %s4156_s21  ;;  %v4442_v33 = vpack.c.bf16 %v396_v53, %v394_v45  ;;  %v404_v37 = vsel %vm6612_vm0, %v402_v57, %v403_v58  ;;  %v412_v46 = vrot.slane %v4416_v59, 1  ;;  %v413_v47 = vrot.slane %v4419_v63, 1  ;;  %v4448_v56 = vld [vmem:[%s4225_s20 + $0x130] sm:$0xf] }
  0x26   : > { %6634 = vst [vmem:[#allocation19_spill] sm:$0xff] %v4438_v32  ;;  %6636 = vst [vmem:[#allocation21_spill] sm:$0xff] %v4448_v56  ;;  %v4451_v62 = vld [vmem:[%s4225_s20 + $0x168] sm:$0xff]  ;;  %v4454_v44 = vld [vmem:[%s4225_s20 + $0x170] sm:$0xff]  ;;  %v4456_v18 = vpack.c.bf16 %v391_v15, %v389_v4  ;;  %v406_v40 = vsel %vm6612_vm0, %v403_v58, %v405_v11  ;;  %v399_v45 = vsel %vm6612_vm0, %v397_v12, %v398_v20  ;;  %v415_v53 = vrot.slane %v4429_v14, 1  ;;  %s4166_s5 = smov 11  }
  0x27   : > { %6635 = vst [vmem:[#allocation20_spill] sm:$0xff] %v4442_v33  ;;  %v4462_v57 = vld [vmem:[%s4225_s20 + $0x178] sm:$0xf]  ;;  %v4465_v50 = vld [vmem:[%s4225_s20 + $0x150] sm:$0xff]  ;;  %503 = vrot.lane.b32.xlu0 %v4423_v3, %s4156_s21  ;;  %v401_v23 = vsel %vm6612_vm0, %v398_v20, %v400_v24  ;;  %v414_v9 = vsel %vm6612_vm0, %v412_v46, %v413_v47  ;;  %v407_v4 = vrot.slane %v4435_v25, 1  ;;  %v408_v15 = vrot.slane %v4438_v32, 1 }
  0x28   : > { %6637 = vst [vmem:[#allocation22_spill] sm:$0xff] %v4456_v18  ;;  %6638 = vst [vmem:[#allocation23_spill] sm:$0xff] %v4462_v57  ;;  %v4474_v58 = vld [vmem:[%s4225_s20 + $0x158] sm:$0xff]  ;;  %v4477_v11 = vld [vmem:[%s4225_s20 + $0x160] sm:$0xf]  ;;  %v416_v12 = vsel %vm6612_vm0, %v413_v47, %v415_v53  ;;  %v410_v14 = vrot.slane %v4448_v56, 1  ;;  %v4485_v20 = vpack.c.bf16 %v406_v40, %v404_v37  ;;  %v4489_v32 = vpack.c.bf16 %v401_v23, %v399_v45 }
  0x29   : > { %6639 = vst [vmem:[#allocation24_spill] sm:$0xff] %v4465_v50  ;;  %6640 = vst [vmem:[#allocation25_spill] sm:$0xff] %v4474_v58  ;;  %v422_v63 = vrot.slane %v4451_v62, 1  ;;  %v423_v3 = vrot.slane %v4454_v44, 1  ;;  %509 = vrot.lane.b32.xlu1 %v4442_v33, %s4156_s21  ;;  %v425_v24 = vrot.slane %v4462_v57, 1  ;;  %v417_v46 = vrot.slane %v4465_v50, 1 }
  0x2a   : > { %6641 = vst [vmem:[#allocation26_spill] sm:$0xff] %v4477_v11  ;;  %6642 = vst [vmem:[#allocation27_spill] sm:$0xff] %v4485_v20  ;;  %v418_v25 = vrot.slane %v4474_v58, 1  ;;  %v420_v47 = vrot.slane %v4477_v11, 1  ;;  %v4495_v53 = vpack.c.bf16 %v416_v12, %v414_v9  ;;  %v409_v33 = vsel %vm6612_vm0, %v407_v4, %v408_v15  ;;  %s4167_s6 = smov 12   ;;  %s4168_s7 = smov 13  }
  0x2b   : > { %6643 = vst [vmem:[#allocation28_spill] sm:$0xff] %v4489_v32  ;;  %507 = vrot.lane.b32.xlu0 %v4456_v18, %s4156_s21  ;;  %v411_v40 = vsel %vm6612_vm0, %v408_v15, %v410_v14  ;;  %v424_v37 = vsel %vm6612_vm0, %v422_v63, %v423_v3  ;;  %v426_v50 = vsel %vm6612_vm0, %v423_v3, %v425_v24  ;;  %v562_v45 = vrot.slane %v4271_v21, 2  ;;  %s4169_s8 = smov 14   ;;  %s4170_s9 = smov 15  }
  0x2c   : > { %6644 = vst [vmem:[#allocation29_spill] sm:$0xff] %v4495_v53  ;;  %v419_v23 = vsel %vm6612_vm0, %v417_v46, %v418_v25  ;;  %v563_v11 = vrot.slane %v4274_v22, 2  ;;  %v421_v9 = vsel %vm6612_vm0, %v418_v25, %v420_v47  ;;  %v565_v12 = vrot.slane %v4283_v26, 2  ;;  %s4171_s10 = smov 16   ;;  %s4172_s11 = smov 17  }
  0x2d   : > { %513 = vrot.lane.b32.xlu1 %v4485_v20, %s4156_s21  ;;  %v557_v4 = vrot.slane %v4240_v6, 2  ;;  %v558_v14 = vrot.slane %v4243_v7, 2  ;;  %v4512_v63 = vpack.c.bf16 %v411_v40, %v409_v33  ;;  %v560_v3 = vrot.slane %v4253_v10, 2  ;;  %s4173_s12 = smov 18   ;;  %s4174_s13 = smov 19  }
  0x2e   : > { %v4515_v15 = vpack.c.bf16 %v426_v50, %v424_v37  ;;  %v4517_v24 = vpack.c.bf16 %v421_v9, %v419_v23  ;;  %v564_v46 = vsel %vm556_vm2, %v562_v45, %v563_v11  ;;  %v566_v25 = vsel %vm556_vm2, %v563_v11, %v565_v12  ;;  %s4175_s14 = smov 20   ;;  %s4176_s17 = smov 21  }
  0x2f   : > { %511 = vrot.lane.b32.xlu0 %v4489_v32, %s4156_s21  ;;  %6645 = vst [vmem:[#allocation30_spill] sm:$0xff] %v4512_v63  ;;  %v559_v47 = vsel %vm556_vm2, %v557_v4, %v558_v14  ;;  %v572_v20 = vrot.slane %v4246_v8, 2  ;;  %v573_v33 = vrot.slane %v4258_v13, 2  ;;  %v575_v40 = vrot.slane %v4267_v19, 2  ;;  %s4177_s18 = smov 22   ;;  %s4178_s19 = smov 23  }
  0x30   : > { %6646 = vst [vmem:[#allocation31_spill] sm:$0xff] %v4515_v15  ;;  %6647 = vst [vmem:[#allocation32_spill] sm:$0xff] %v4517_v24  ;;  %v567_v50 = vrot.slane %v4228_v0, 2  ;;  %v568_v37 = vrot.slane %v4231_v1, 2  ;;  %v570_v23 = vrot.slane %v4234_v2, 2  ;;  %v561_v45 = vsel %vm556_vm2, %v558_v14, %v560_v3 }
  0x31   : > { %517 = vrot.lane.b32.xlu1 %v4495_v53, %s4156_s21  ;;  %v582_v11 = vrot.slane %v4287_v28, 2  ;;  %v583_v9 = vrot.slane %v4290_v29, 2  ;;  %v585_v12 = vrot.slane %v4298_v34, 2  ;;  %v4538_v4 = vpack.c.bf16 %v566_v25, %v564_v46 }
  0x32   : > { %v574_v53 = vsel %vm556_vm2, %v572_v20, %v573_v33  ;;  %v669_v32 = vpack.c.bf16 %v561_v45, %v559_v47  ;;  %v576_v18 = vsel %vm556_vm2, %v573_v33, %v575_v40  ;;  %v571_v14 = vsel %vm556_vm2, %v568_v37, %v570_v23 }
  0x33   : > { %515 = vrot.lane.b32.xlu0 %v4512_v63, %s4156_s21  ;;  %6648 = vst [vmem:[#allocation33_spill] sm:$0xff] %v4538_v4  ;;  %v569_v63 = vsel %vm556_vm2, %v567_v50, %v568_v37  ;;  %v584_v3 = vsel %vm556_vm2, %v582_v11, %v583_v9  ;;  %v586_v34 = vsel %vm556_vm2, %v583_v9, %v585_v12  ;;  %v578_v46 = vrot.slane %v4304_v36, 2 }
  0x34   : > { %v580_v20 = vrot.slane %v4312_v41, 2  ;;  %v592_v25 = vrot.slane %v4315_v42, 2  ;;  %v593_v47 = vrot.slane %v4318_v43, 2  ;;  %v595_v33 = vrot.slane %v4326_v48, 2 }
  0x35   : > { %521 = vrot.lane.b32.xlu1 %v4515_v15, %s4156_s21  ;;  %v577_v15 = vrot.slane %v4301_v35, 2  ;;  %v4556_v40 = vpack.c.bf16 %v576_v18, %v574_v53  ;;  %v587_v50 = vrot.slane %v4329_v49, 2  ;;  %v588_v37 = vrot.slane %v4338_v54, 2 }
  0x36   : > { %v590_v23 = vrot.slane %v4341_v55, 2  ;;  %v4562_v45 = vpack.c.bf16 %v571_v14, %v569_v63  ;;  %v4564_v11 = vpack.c.bf16 %v586_v34, %v584_v3  ;;  %v581_v12 = vsel %vm556_vm2, %v578_v46, %v580_v20 }
  0x37   : > { %519 = vrot.lane.b32.xlu0 %v4517_v24, %s4156_s21  ;;  %6649 = vst [vmem:[#allocation34_spill] sm:$0xff] %v4556_v40  ;;  %v579_v9 = vsel %vm556_vm2, %v577_v15, %v578_v46  ;;  %v596_v18 = vsel %vm556_vm2, %v593_v47, %v595_v33  ;;  %v602_v53 = vrot.slane %v4348_v60, 2  ;;  %v589_v24 = vsel %vm556_vm2, %v587_v50, %v588_v37 }
  0x38   : > { %6650 = vst [vmem:[#allocation35_spill] sm:$0xff] %v4562_v45  ;;  %6651 = vst [vmem:[#allocation36_spill] sm:$0xff] %v4564_v11  ;;  %v603_v34 = vrot.slane %v4351_v61, 2  ;;  %v605_v63 = vrot.slane %v4361_v5, 2  ;;  %v4579_v15 = vpack.c.bf16 %v581_v12, %v579_v9  ;;  %v597_v14 = vrot.slane %v4368_v16, 2 }
  0x39   : > { %703 = vrot.lane.b32.xlu1 %v4538_v4, %s4157_s22  ;;  %v594_v4 = vsel %vm556_vm2, %v592_v25, %v593_v47  ;;  %v598_v3 = vrot.slane %v4371_v17, 2  ;;  %v600_v46 = vrot.slane %v4381_v27, 2  ;;  %v612_v50 = vrot.slane %v4384_v30, 2 }
  0x3a   : > { %6652 = vst [vmem:[#allocation37_spill] sm:$0xff] %v4579_v15  ;;  %v4584_v20 = vpack.c.bf16 %v596_v18, %v594_v4  ;;  %v604_v47 = vsel %vm556_vm2, %v602_v53, %v603_v34  ;;  %v606_v33 = vsel %vm556_vm2, %v603_v34, %v605_v63  ;;  %v607_v9 = vrot.slane %v4396_v39, 2  ;;  %v6656_v63 = vld [vmem:[#allocation17_spill] sm:$0xff] }
  0x3b   : > { %701 = vrot.lane.b32.xlu0 %v669_v32, %s4157_s22  ;;  %v591_v32 = vsel %vm556_vm2, %v588_v37, %v590_v23  ;;  %v613_v37 = vrot.slane %v4387_v31, 2  ;;  %v615_v23 = vrot.slane %v4393_v38, 2  ;;  %v608_v4 = vrot.slane %v4406_v51, 2 }
  0x3c   : > { %6653 = vst [vmem:[#allocation38_spill] sm:$0xff] %v4584_v20  ;;  %v4586_v25 = vpack.c.bf16 %v591_v32, %v589_v24  ;;  %v610_v24 = vrot.slane %v4409_v52, 2  ;;  %v599_v12 = vsel %vm556_vm2, %v597_v14, %v598_v3  ;;  %v601_v18 = vsel %vm556_vm2, %v598_v3, %v600_v46  ;;  %v6655_v32 = vld [vmem:[#allocation15_spill] sm:$0xff] }
  0x3d   : > { %707 = vrot.lane.b32.xlu1 %v4556_v40, %s4157_s22  ;;  %v622_v53 = vrot.slane %v4416_v59, 2  ;;  %v623_v34 = vrot.slane %v6655_v32, 2  ;;  %v4607_v40 = vpack.c.bf16 %v606_v33, %v604_v47  ;;  %v4610_v52 = vpack.c.bf16 %v601_v18, %v599_v12 }
  0x3e   : > { %6654 = vst [vmem:[#allocation39_spill] sm:$0xff] %v4586_v25  ;;  %v609_v14 = vsel %vm556_vm2, %v607_v9, %v608_v4  ;;  %v611_v3 = vsel %vm556_vm2, %v608_v4, %v610_v24  ;;  %v620_v33 = vrot.slane %v4448_v56, 2  ;;  %v632_v12 = vrot.slane %v4451_v62, 2  ;;  %v6662_v4 = vld [vmem:[#allocation24_spill] sm:$0xff] }
  0x3f   : > { %705 = vrot.lane.b32.xlu0 %v4562_v45, %s4157_s22  ;;  %6657 = vst [vmem:[#allocation40_spill] sm:$0xff] %v4607_v40  ;;  %v614_v45 = vsel %vm556_vm2, %v612_v50, %v613_v37  ;;  %6658 = vst [vmem:[#allocation41_spill] sm:$0xff] %v4610_v52  ;;  %v624_v46 = vsel %vm556_vm2, %v622_v53, %v623_v34  ;;  %v627_v24 = vrot.slane %v6662_v4, 2  ;;  %v628_v18 = vrot.slane %v4474_v58, 2  ;;  %v6663_v53 = vld [vmem:[#allocation26_spill] sm:$0xff] }
  0x40   : > { %v772_v58 = vrot.slane %v4271_v21, 3 }
  0x41   : > { %711 = vrot.lane.b32.xlu1 %v4564_v11, %s4157_s22  ;;  %v625_v11 = vrot.slane %v6656_v63, 2  ;;  %v6659_v63 = vld [vmem:[#allocation18_spill] sm:$0xff] }
  0x42   : > { %v617_v32 = vrot.slane %v6659_v63, 2 }
  0x43   : > { %709 = vrot.lane.b32.xlu0 %v4579_v15, %s4157_s22  ;;  %v616_v15 = vsel %vm556_vm2, %v613_v37, %v615_v23  ;;  %v626_v50 = vsel %vm556_vm2, %v623_v34, %v625_v11  ;;  %v633_v37 = vrot.slane %v4454_v44, 2  ;;  %v635_v23 = vrot.slane %v4462_v57, 2 }
  0x44   : > { %v4627_v9 = vpack.c.bf16 %v616_v15, %v614_v45  ;;  %v4634_v11 = vpack.c.bf16 %v611_v3, %v609_v14  ;;  %v4636_v34 = vpack.c.bf16 %v626_v50, %v624_v46  ;;  %v629_v14 = vsel %vm556_vm2, %v627_v24, %v628_v18 }
  0x45   : > { %715 = vrot.lane.b32.xlu1 %v4584_v20, %s4157_s22  ;;  %v6660_v20 = vld [vmem:[#allocation19_spill] sm:$0xff]  ;;  %v634_v45 = vsel %vm556_vm2, %v632_v12, %v633_v37  ;;  %v636_v15 = vsel %vm556_vm2, %v633_v37, %v635_v23  ;;  %v775_v3 = vrot.slane %v4283_v26, 3  ;;  %v767_v46 = vrot.slane %v4240_v6, 3 }
  0x46   : > { %v618_v47 = vrot.slane %v6660_v20, 2  ;;  %6661 = vst [vmem:[#allocation18_spill] sm:$0xff] %v4627_v9  ;;  %6664 = vst [vmem:[#allocation19_spill] sm:$0xff] %v4634_v11  ;;  %v782_v50 = vrot.slane %v4246_v8, 3  ;;  %v783_v12 = vrot.slane %v4258_v13, 3  ;;  %v785_v23 = vrot.slane %v4267_v19, 3 }
  0x47   : > { %713 = vrot.lane.b32.xlu0 %v4586_v25, %s4157_s22  ;;  %v630_v25 = vrot.slane %v6663_v53, 2  ;;  %6665 = vst [vmem:[#allocation24_spill] sm:$0xff] %v4636_v34  ;;  %v773_v53 = vrot.slane %v4274_v22, 3  ;;  %v4659_v24 = vpack.c.bf16 %v636_v15, %v634_v45  ;;  %v778_v45 = vrot.slane %v4231_v1, 3 }
  0x48   : > { %v619_v57 = vsel %vm556_vm2, %v617_v32, %v618_v47  ;;  %v768_v32 = vrot.slane %v4243_v7, 3  ;;  %v786_v15 = vsel %vm766_vm3, %v783_v12, %v785_v23 }
  0x49   : > { %719 = vrot.lane.b32.xlu1 %v4607_v40, %s4157_s22  ;;  %v621_v40 = vsel %vm556_vm2, %v618_v47, %v620_v33  ;;  %v631_v47 = vsel %vm556_vm2, %v628_v18, %v630_v25  ;;  %v770_v33 = vrot.slane %v4253_v10, 3  ;;  %6667 = vst [vmem:[#allocation43_spill] sm:$0xff] %v4659_v24  ;;  %v774_v25 = vsel %vm766_vm3, %v772_v58, %v773_v53 }
  0x4a   : > { %v4656_v37 = vpack.c.bf16 %v621_v40, %v619_v57  ;;  %v776_v18 = vsel %vm766_vm3, %v773_v53, %v775_v3  ;;  %v784_v57 = vsel %vm766_vm3, %v782_v50, %v783_v12  ;;  %v777_v40 = vrot.slane %v4228_v0, 3 }
  0x4b   : > { %717 = vrot.lane.b32.xlu0 %v4610_v52, %s4157_s22  ;;  %v769_v52 = vsel %vm766_vm3, %v767_v46, %v768_v32  ;;  %v771_v13 = vsel %vm766_vm3, %v768_v32, %v770_v33  ;;  %v792_v58 = vrot.slane %v4287_v28, 3  ;;  %v793_v53 = vrot.slane %v4290_v29, 3  ;;  %v6670_v46 = vld [vmem:[#allocation6_spill] sm:$0xff] }
  0x4c   : > { %6666 = vst [vmem:[#allocation42_spill] sm:$0xff] %v4656_v37  ;;  %v4680_v3 = vpack.c.bf16 %v776_v18, %v774_v25  ;;  %v795_v32 = vrot.slane %v6670_v46, 3  ;;  %v4683_v33 = vpack.c.bf16 %v786_v15, %v784_v57  ;;  %v779_v50 = vsel %vm766_vm3, %v777_v40, %v778_v45 }
  0x4d   : > { %723 = vrot.lane.b32.xlu1 %v4627_v9, %s4157_s22  ;;  %v4663_v9 = vpack.c.bf16 %v631_v47, %v629_v14  ;;  %v780_v14 = vrot.slane %v4234_v2, 3  ;;  %v879_v47 = vpack.c.bf16 %v771_v13, %v769_v52  ;;  %v794_v23 = vsel %vm766_vm3, %v792_v58, %v793_v53 }
  0x4e   : > { %6669 = vst [vmem:[#allocation45_spill] sm:$0xff] %v4680_v3  ;;  %6671 = vst [vmem:[#allocation6_spill] sm:$0xff] %v4683_v33  ;;  %v790_v25 = vrot.slane %v4312_v41, 3  ;;  %v802_v18 = vrot.slane %v4315_v42, 3  ;;  %v803_v13 = vrot.slane %v4318_v43, 3  ;;  %v796_v52 = vsel %vm766_vm3, %v793_v53, %v795_v32 }
  0x4f   : > { %721 = vrot.lane.b32.xlu0 %v4634_v11, %s4157_s22  ;;  %6668 = vst [vmem:[#allocation44_spill] sm:$0xff] %v4663_v9  ;;  %v781_v12 = vsel %vm766_vm3, %v778_v45, %v780_v14  ;;  %v805_v57 = vrot.slane %v4326_v48, 3  ;;  %v797_v40 = vrot.slane %v4329_v49, 3  ;;  %v798_v45 = vrot.slane %v4338_v54, 3 }
  0x50   : > { %v800_v15 = vrot.slane %v4341_v55, 3  ;;  %v4703_v14 = vpack.c.bf16 %v781_v12, %v779_v50  ;;  %v4705_v58 = vpack.c.bf16 %v796_v52, %v794_v23  ;;  %v804_v53 = vsel %vm766_vm3, %v802_v18, %v803_v13 }
  0x51   : > { %727 = vrot.lane.b32.xlu1 %v4636_v34, %s4157_s22  ;;  %v787_v34 = vrot.slane %v4301_v35, 3  ;;  %v806_v32 = vsel %vm766_vm3, %v803_v13, %v805_v57  ;;  %v812_v11 = vrot.slane %v4348_v60, 3  ;;  %v815_v12 = vrot.slane %v4361_v5, 3 }
  0x52   : > { %6672 = vst [vmem:[#allocation46_spill] sm:$0xff] %v4703_v14  ;;  %6673 = vst [vmem:[#allocation47_spill] sm:$0xff] %v4705_v58  ;;  %v801_v50 = vsel %vm766_vm3, %v798_v45, %v800_v15  ;;  %v822_v18 = vrot.slane %v4384_v30, 3  ;;  %v823_v13 = vrot.slane %v4387_v31, 3  ;;  %v825_v52 = vrot.slane %v4393_v38, 3 }
  0x53   : > { %725 = vrot.lane.b32.xlu0 %v4656_v37, %s4157_s22  ;;  %v799_v37 = vsel %vm766_vm3, %v797_v40, %v798_v45  ;;  %v4730_v57 = vpack.c.bf16 %v806_v32, %v804_v53  ;;  %v817_v15 = vrot.slane %v4396_v39, 3  ;;  %v818_v53 = vrot.slane %v4406_v51, 3  ;;  %v6677_v32 = vld [vmem:[#allocation14_spill] sm:$0xff] }
  0x54   : > { %v4732_v40 = vpack.c.bf16 %v801_v50, %v799_v37  ;;  %v820_v37 = vrot.slane %v6677_v32, 3  ;;  %v826_v50 = vsel %vm766_vm3, %v823_v13, %v825_v52  ;;  %v842_v32 = vrot.slane %v4451_v62, 3 }
  0x55   : > { %731 = vrot.lane.b32.xlu1 %v4659_v24, %s4157_s22  ;;  %v788_v24 = vrot.slane %v4304_v36, 3  ;;  %6675 = vst [vmem:[#allocation49_spill] sm:$0xff] %v4730_v57  ;;  %v980_v38 = vrot.slane %v4253_v10, 4 }
  0x56   : > { %6676 = vst [vmem:[#allocation50_spill] sm:$0xff] %v4732_v40 }
  0x57   : > { %729 = vrot.lane.b32.xlu0 %v4663_v9, %s4157_s22  ;;  %v789_v9 = vsel %vm766_vm3, %v787_v34, %v788_v24  ;;  %v807_v34 = vrot.slane %v4368_v16, 3 }
  0x59   : > { %913 = vrot.lane.b32.xlu1 %v4680_v3, %s4158_s23  ;;  %v791_v3 = vsel %vm766_vm3, %v788_v24, %v790_v25  ;;  %v808_v24 = vrot.slane %v4371_v17, 3  ;;  %v810_v25 = vrot.slane %v4381_v27, 3 }
  0x5a   : > { %v4722_v23 = vpack.c.bf16 %v791_v3, %v789_v9 }
  0x5b   : > { %911 = vrot.lane.b32.xlu0 %v879_v47, %s4158_s23  ;;  %v813_v47 = vrot.slane %v4351_v61, 3  ;;  %v809_v3 = vsel %vm766_vm3, %v807_v34, %v808_v24  ;;  %v6679_v34 = vld [vmem:[#allocation17_spill] sm:$0xff] }
  0x5c   : > { %6674 = vst [vmem:[#allocation48_spill] sm:$0xff] %v4722_v23 }
  0x5d   : > { %917 = vrot.lane.b32.xlu1 %v4683_v33, %s4158_s23  ;;  %v814_v45 = vsel %vm766_vm3, %v812_v11, %v813_v47  ;;  %v816_v9 = vsel %vm766_vm3, %v813_v47, %v815_v12  ;;  %v811_v33 = vsel %vm766_vm3, %v808_v24, %v810_v25  ;;  %v832_v11 = vrot.slane %v4416_v59, 3  ;;  %v6678_v47 = vld [vmem:[#allocation15_spill] sm:$0xff] }
  0x5e   : > { %v833_v12 = vrot.slane %v6678_v47, 3  ;;  %v827_v24 = vrot.slane %v6659_v63, 3  ;;  %v828_v25 = vrot.slane %v6660_v20, 3 }
  0x5f   : > { %915 = vrot.lane.b32.xlu0 %v4703_v14, %s4158_s23  ;;  %v824_v14 = vsel %vm766_vm3, %v822_v18, %v823_v13  ;;  %v830_v18 = vrot.slane %v4448_v56, 3  ;;  %v4757_v13 = vpack.c.bf16 %v811_v33, %v809_v3  ;;  %v843_v56 = vrot.slane %v4454_v44, 3  ;;  %v6682_v3 = vld [vmem:[#allocation23_spill] sm:$0xff] }
  0x60   : > { %v4759_v52 = vpack.c.bf16 %v826_v50, %v824_v14  ;;  %v829_v33 = vsel %vm766_vm3, %v827_v24, %v828_v25  ;;  %v845_v50 = vrot.slane %v6682_v3, 3  ;;  %v985_v24 = vrot.slane %v4283_v26, 4 }
  0x61   : > { %921 = vrot.lane.b32.xlu1 %v4705_v58, %s4158_s23  ;;  %v835_v58 = vrot.slane %v6679_v34, 3  ;;  %6681 = vst [vmem:[#allocation51_spill] sm:$0xff] %v4757_v13  ;;  %v819_v34 = vsel %vm766_vm3, %v817_v15, %v818_v53  ;;  %v831_v14 = vsel %vm766_vm3, %v828_v25, %v830_v18  ;;  %v837_v15 = vrot.slane %v6662_v4, 3 }
  0x62   : > { %v977_v25 = vrot.slane %v4240_v6, 4  ;;  %v978_v18 = vrot.slane %v4243_v7, 4  ;;  %v844_v27 = vsel %vm766_vm3, %v842_v32, %v843_v56  ;;  %v4798_v6 = vpack.c.bf16 %v4274_v22, %v4271_v21 }
  0x63   : > { %919 = vrot.lane.b32.xlu0 %v4722_v23, %s4158_s23  ;;  %v4750_v23 = vpack.c.bf16 %v816_v9, %v814_v45  ;;  %v834_v45 = vsel %vm766_vm3, %v832_v11, %v833_v12  ;;  %v836_v9 = vsel %vm766_vm3, %v833_v12, %v835_v58  ;;  %v6684_v11 = vld [vmem:[#allocation26_spill] sm:$0xff]  ;;  %v982_v58 = vrot.slane %v4271_v21, 4 }
  0x64   : > { %v983_v12 = vrot.slane %v4274_v22, 4  ;;  %v4784_v3 = vpack.c.bf16 %v836_v9, %v834_v45  ;;  %v846_v7 = vsel %vm766_vm3, %v843_v56, %v845_v50  ;;  %v979_v9 = vsel %vm976_vm4, %v977_v25, %v978_v18  ;;  %283 = vst.msk [vmem:[#allocation2 + $0x8] sm:$0xff] %vm281_vm1, %v4798_v6 }
  0x65   : > { %925 = vrot.lane.b32.xlu1 %v4730_v57, %s4158_s23  ;;  %6680 = vst [vmem:[#allocation15_spill] sm:$0xff] %v4750_v23  ;;  %v821_v57 = vsel %vm766_vm3, %v818_v53, %v820_v37  ;;  %v6683_v53 = vld [vmem:[#allocation25_spill] sm:$0xff]  ;;  %v981_v22 = vsel %vm976_vm4, %v978_v18, %v980_v38  ;;  %v995_v56 = vrot.slane %v4267_v19, 4  ;;  %v987_v38 = vrot.slane %v4228_v0, 4 }
  0x66   : > { %v838_v37 = vrot.slane %v6683_v53, 3  ;;  %v984_v45 = vsel %vm976_vm4, %v982_v58, %v983_v12  ;;  %v986_v32 = vsel %vm976_vm4, %v983_v12, %v985_v24  ;;  %v1089_v19 = vpack.c.bf16 %v981_v22, %v979_v9 }
  0x67   : > { %923 = vrot.lane.b32.xlu0 %v4732_v40, %s4158_s23  ;;  %v840_v40 = vrot.slane %v6684_v11, 3  ;;  %v4789_v11 = vpack.c.bf16 %v831_v14, %v829_v33  ;;  %v992_v33 = vrot.slane %v4246_v8, 4  ;;  %v4822_v14 = vpack.c.bf16 %v4304_v36, %v4301_v35 }
  0x68   : > { %v839_v26 = vsel %vm766_vm3, %v837_v15, %v838_v37  ;;  %v4830_v15 = vpack.c.bf16 %v986_v32, %v984_v45  ;;  %v990_v58 = vrot.slane %v4234_v2, 4  ;;  %v1002_v0 = vrot.slane %v4287_v28, 4 }
  0x69   : > { %929 = vrot.lane.b32.xlu1 %v4750_v23, %s4158_s23  ;;  %v4779_v23 = vpack.c.bf16 %v821_v57, %v819_v34  ;;  %v6685_v57 = vld [vmem:[#allocation4_spill] sm:$0xff]  ;;  %v841_v10 = vsel %vm766_vm3, %v838_v37, %v840_v40  ;;  %v4818_v40 = vpack.c.bf16 %v4290_v29, %v4287_v28  ;;  %286 = vst.msk [vmem:[#allocation2 + $0x20] sm:$0xff] %vm281_vm1, %v4822_v14  ;;  %v1003_v18 = vrot.slane %v4290_v29, 4 }
  0x6a   : > { %v4794_v34 = vpack.c.bf16 %v6685_v57, %v4246_v8  ;;  %v993_v21 = vrot.slane %v6685_v57, 4  ;;  %v4826_v8 = vpack.c.bf16 %v846_v7, %v844_v27  ;;  %v4828_v50 = vpack.c.bf16 %v841_v10, %v839_v26 }
  0x6b   : > { %927 = vrot.lane.b32.xlu0 %v4757_v13, %s4158_s23  ;;  %287 = vst.msk [vmem:[#allocation2 + $0x28] sm:$0xff] %vm281_vm1, %v4818_v40  ;;  %v988_v27 = vrot.slane %v4231_v1, 4  ;;  %v4846_v24 = vpack.c.bf16 %v4318_v43, %v4315_v42  ;;  %v4850_v25 = vpack.c.bf16 %v4338_v54, %v4329_v49  ;;  %v1005_v1 = vrot.slane %v6670_v46, 4 }
  0x6c   : > { %285 = vst.msk [vmem:[#allocation2 + $0x18] sm:$0xff] %vm281_vm1, %v4794_v34  ;;  %v994_v37 = vsel %vm976_vm4, %v992_v33, %v993_v21  ;;  %v996_v12 = vsel %vm976_vm4, %v993_v21, %v995_v56  ;;  %v4858_v2 = vpack.c.bf16 %v4351_v61, %v4348_v60  ;;  %v4862_v28 = vpack.c.bf16 %v4371_v17, %v4368_v16 }
  0x6d   : > { %933 = vrot.lane.b32.xlu1 %v4759_v52, %s4158_s23  ;;  %v997_v57 = vrot.slane %v4301_v35, 4  ;;  %289 = vst.msk [vmem:[#allocation2 + $0x38] sm:$0xff] %vm281_vm1, %v4846_v24  ;;  %288 = vst.msk [vmem:[#allocation2 + $0x30] sm:$0xff] %vm281_vm1, %v4850_v25  ;;  %v4871_v29 = vpack.c.bf16 %v4387_v31, %v4384_v30  ;;  %v4875_v46 = vpack.c.bf16 %v4406_v51, %v4396_v39  ;;  %v998_v35 = vrot.slane %v4304_v36, 4 }
  0x6e   : > { %v4879_v7 = vpack.c.bf16 %v6678_v47, %v4416_v59  ;;  %291 = vst.msk [vmem:[#allocation2 + $0x48] sm:$0xff] %vm281_vm1, %v4858_v2  ;;  %290 = vst.msk [vmem:[#allocation2 + $0x40] sm:$0xff] %vm281_vm1, %v4862_v28  ;;  %v4890_v26 = vpack.c.bf16 %v6660_v20, %v6659_v63  ;;  %v4894_v10 = vpack.c.bf16 %v4454_v44, %v4451_v62  ;;  %v1000_v9 = vrot.slane %v4312_v41, 4 }
  0x6f   : > { %931 = vrot.lane.b32.xlu0 %v4779_v23, %s4158_s23  ;;  %6686 = vst [vmem:[#allocation25_spill] sm:$0xff] %v4875_v46  ;;  %v4898_v45 = vpack.c.bf16 %v6683_v53, %v6662_v4  ;;  %v989_v36 = vsel %vm976_vm4, %v987_v38, %v988_v27  ;;  %v991_v32 = vsel %vm976_vm4, %v988_v27, %v990_v58  ;;  %293 = vst.msk [vmem:[#allocation2 + $0x58] sm:$0xff] %vm281_vm1, %v4871_v29 }
  0x70   : > { %292 = vst.msk [vmem:[#allocation2 + $0x50] sm:$0xff] %vm281_vm1, %v4875_v46  ;;  %295 = vst.msk [vmem:[#allocation2 + $0x68] sm:$0xff] %vm281_vm1, %v4879_v7  ;;  %v4911_v33 = vpack.c.bf16 %v996_v12, %v994_v37  ;;  %v1004_v21 = vsel %vm976_vm4, %v1002_v0, %v1003_v18  ;;  %v1006_v41 = vsel %vm976_vm4, %v1003_v18, %v1005_v1  ;;  %v1012_v22 = vrot.slane %v4315_v42, 4 }
  0x71   : > { %937 = vrot.lane.b32.xlu1 %v4784_v3, %s4158_s23  ;;  %294 = vst.msk [vmem:[#allocation2 + $0x60] sm:$0xff] %vm281_vm1, %v4890_v26  ;;  %297 = vst.msk [vmem:[#allocation2 + $0x78] sm:$0xff] %vm281_vm1, %v4894_v10  ;;  %v1013_v56 = vrot.slane %v4318_v43, 4  ;;  %v1015_v38 = vrot.slane %v4326_v48, 4  ;;  %v4925_v37 = vpack.c.bf16 %v991_v32, %v989_v36  ;;  %v999_v27 = vsel %vm976_vm4, %v997_v57, %v998_v35 }
  0x72   : > { %296 = vst.msk [vmem:[#allocation2 + $0x70] sm:$0xff] %vm281_vm1, %v4898_v45  ;;  %v1001_v58 = vsel %vm976_vm4, %v998_v35, %v1000_v9  ;;  %v1007_v12 = vrot.slane %v4329_v49, 4  ;;  %v1008_v0 = vrot.slane %v4338_v54, 4  ;;  %v1010_v18 = vrot.slane %v4341_v55, 4 }
  0x73   : > { %935 = vrot.lane.b32.xlu0 %v4789_v11, %s4158_s23  ;;  %v4934_v42 = vpack.c.bf16 %v1006_v41, %v1004_v21  ;;  %v1022_v43 = vrot.slane %v4348_v60, 4  ;;  %v1023_v48 = vrot.slane %v4351_v61, 4  ;;  %v1016_v1 = vsel %vm976_vm4, %v1013_v56, %v1015_v38  ;;  %v6687_v61 = vld [vmem:[#allocation11_spill] sm:$0xff] }
  0x74   : > { %v1025_v57 = vrot.slane %v4361_v5, 4  ;;  %v4943_v49 = vpack.c.bf16 %v1001_v58, %v999_v27  ;;  %v1017_v54 = vrot.slane %v4368_v16, 4  ;;  %v1018_v55 = vrot.slane %v4371_v17, 4  ;;  %v6688_v17 = vld [vmem:[#allocation12_spill] sm:$0xff] }
  0x75   : > { %941 = vrot.lane.b32.xlu1 %v4826_v8, %s4158_s23  ;;  %v1009_v35 = vsel %vm976_vm4, %v1007_v12, %v1008_v0  ;;  %v1011_v60 = vsel %vm976_vm4, %v1008_v0, %v1010_v18  ;;  %v1020_v36 = vrot.slane %v6687_v61, 4  ;;  %v1024_v5 = vsel %vm976_vm4, %v1022_v43, %v1023_v48  ;;  %v6689_v12 = vld [vmem:[#allocation14_spill] sm:$0xff] }
  0x76   : > { %v1026_v9 = vsel %vm976_vm4, %v1023_v48, %v1025_v57  ;;  %v1032_v21 = vrot.slane %v4384_v30, 4  ;;  %v1033_v16 = vrot.slane %v4387_v31, 4  ;;  %v1035_v41 = vrot.slane %v6688_v17, 4 }
  0x77   : > { %939 = vrot.lane.b32.xlu0 %v4828_v50, %s4158_s23  ;;  %v1021_v38 = vsel %vm976_vm4, %v1018_v55, %v1020_v36  ;;  %v1027_v27 = vrot.slane %v4396_v39, 4  ;;  %v1028_v58 = vrot.slane %v4406_v51, 4  ;;  %v1030_v0 = vrot.slane %v6689_v12, 4  ;;  %v6693_v36 = vld [vmem:[#allocation23_spill] sm:$0xff] }
  0x78   : > { %v4970_v30 = vpack.c.bf16 %v1026_v9, %v1024_v5  ;;  %v1042_v31 = vrot.slane %v4416_v59, 4  ;;  %v1043_v18 = vrot.slane %v6678_v47, 4  ;;  %v1034_v43 = vsel %vm976_vm4, %v1032_v21, %v1033_v16  ;;  %v6692_v47 = vld [vmem:[#allocation21_spill] sm:$0xff] }
  0x79   : > { %1123 = vrot.lane.b32.xlu1 %v4830_v15, %s4159_s24  ;;  %v1036_v48 = vsel %vm976_vm4, %v1033_v16, %v1035_v41  ;;  %v1037_v51 = vrot.slane %v6659_v63, 4  ;;  %v1038_v57 = vrot.slane %v6660_v20, 4  ;;  %v1031_v59 = vsel %vm976_vm4, %v1028_v58, %v1030_v0 }
  0x7a   : > { %6690 = vst [vmem:[#allocation4_spill] sm:$0xff] %v4970_v30  ;;  %v1052_v63 = vrot.slane %v4451_v62, 4  ;;  %v1053_v20 = vrot.slane %v4454_v44, 4  ;;  %v1055_v5 = vrot.slane %v6693_v36, 4  ;;  %v1047_v41 = vrot.slane %v6662_v4, 4 }
  0x7b   : > { %1121 = vrot.lane.b32.xlu0 %v1089_v19, %s4159_s24  ;;  %v1014_v19 = vsel %vm976_vm4, %v1012_v22, %v1013_v56  ;;  %v4961_v22 = vpack.c.bf16 %v1011_v60, %v1009_v35  ;;  %v1019_v56 = vsel %vm976_vm4, %v1017_v54, %v1018_v55  ;;  %v1029_v54 = vsel %vm976_vm4, %v1027_v27, %v1028_v58 }
  0x7c   : > { %v4952_v32 = vpack.c.bf16 %v1016_v1, %v1014_v19  ;;  %v6691_v19 = vld [vmem:[#allocation17_spill] sm:$0xff]  ;;  %v4979_v39 = vpack.c.bf16 %v1021_v38, %v1019_v56  ;;  %v1040_v55 = vrot.slane %v6692_v47, 4  ;;  %v4988_v35 = vpack.c.bf16 %v1036_v48, %v1034_v43  ;;  %v6694_v56 = vld [vmem:[#allocation26_spill] sm:$0xff]  ;;  %v5024_v48 = vld [vmem:[%s4225_s20 + $0x180] sm:$0xff] }
  0x7d   : > { %1127 = vrot.lane.b32.xlu1 %v4911_v33, %s4159_s24  ;;  %v1045_v1 = vrot.slane %v6691_v19, 4  ;;  %v1044_v60 = vsel %vm976_vm4, %v1042_v31, %v1043_v18  ;;  %v4997_v21 = vpack.c.bf16 %v1031_v59, %v1029_v54  ;;  %v1039_v16 = vsel %vm976_vm4, %v1037_v51, %v1038_v57  ;;  %v5027_v19 = vld [vmem:[%s4225_s20 + $0x188] sm:$0xff] }
  0x7e   : > { %v1041_v17 = vsel %vm976_vm4, %v1038_v57, %v1040_v55  ;;  %v1048_v62 = vrot.slane %v6683_v53, 4  ;;  %v1050_v44 = vrot.slane %v6694_v56, 4  ;;  %v1054_v58 = vsel %vm976_vm4, %v1052_v63, %v1053_v20 }
  0x7f   : > { %1125 = vrot.lane.b32.xlu0 %v4925_v37, %s4159_s24  ;;  %v1046_v61 = vsel %vm976_vm4, %v1043_v18, %v1045_v1  ;;  %v1056_v12 = vsel %vm976_vm4, %v1053_v20, %v1055_v5  ;;  %v5014_v53 = vpack.c.bf16 %v1041_v17, %v1039_v16  ;;  %v5030_v1 = vld [vmem:[%s4225_s20 + $0x190] sm:$0xf]  ;;  %v1419_v51 = vrot.slane %v5024_v48, 3  ;;  %v6695_v5 = vld [vmem:[#allocation3_spill] sm:$0xff] }
  0x80   : > { %v5007_v27 = vpack.c.bf16 %v1046_v61, %v1044_v60  ;;  %v1049_v0 = vsel %vm976_vm4, %v1047_v41, %v1048_v62  ;;  %v1051_v31 = vsel %vm976_vm4, %v1048_v62, %v1050_v44  ;;  %v5021_v43 = vpack.c.bf16 %v1056_v12, %v1054_v58 }
  0x81   : > { %1131 = vrot.lane.b32.xlu1 %v4934_v42, %s4159_s24  ;;  %v1420_v57 = vrot.slane %v5027_v19, 3  ;;  %v1422_v54 = vrot.slane %v5030_v1, 3  ;;  %v5038_v47 = vpack.c.bf16 %v1051_v31, %v1049_v0  ;;  %v5091_v0 = vpack.c.bf16 %v5027_v19, %v5024_v48 }
  0x82   : > { %v1493_v31 = vrot.slane %v5024_v48, 4  ;;  %vm1768_vm1 = vcmask 105568  }
  0x83   : > { %1129 = vrot.lane.b32.xlu0 %v4943_v49, %s4159_s24  ;;  %v1421_v55 = vsel %vm766_vm3, %v1419_v51, %v1420_v57  ;;  %v1423_v60 = vsel %vm766_vm3, %v1420_v57, %v1422_v54  ;;  %v1496_v51 = vrot.slane %v5030_v1, 4 }
  0x84   : > { %v5045_v63 = vpack.c.bf16 %v1423_v60, %v1421_v55 }
  0x85   : > { %1135 = vrot.lane.b32.xlu1 %v4952_v32, %s4159_s24 }
  0x87   : > { %1133 = vrot.lane.b32.xlu0 %v4961_v22, %s4159_s24 }
  0x89   : > { %1139 = vrot.lane.b32.xlu1 %v4970_v30, %s4159_s24 }
  0x8b   : > { %1137 = vrot.lane.b32.xlu0 %v4979_v39, %s4159_s24  ;;  %v496_v9 = vpop.permute.xlu1 %495 }
  0x8c   : > { %542 = vst.msk [vmem:[#allocation2 + $0x10] sm:$0xff] %vm539_vm5, %v496_v9 }
  0x8d   : > { %v492_v38 = vpop.permute.xlu0 %491  ;;  %1143 = vrot.lane.b32.xlu1 %v4988_v35, %s4159_s24 }
  0x8e   : > { %540 = vst.msk [vmem:[#allocation2] sm:$0xff] %vm539_vm5, %v492_v38 }
  0x8f   : > { %1141 = vrot.lane.b32.xlu0 %v4997_v21, %s4159_s24  ;;  %v498_v4 = vpop.permute.xlu1 %497 }
  0x90   : > { %543 = vst.msk [vmem:[#allocation2 + $0x18] sm:$0xff] %vm539_vm5, %v498_v4 }
  0x91   : > { %v494_v18 = vpop.permute.xlu0 %493  ;;  %1147 = vrot.lane.b32.xlu1 %v5007_v27, %s4159_s24 }
  0x92   : > { %541 = vst.msk [vmem:[#allocation2 + $0x8] sm:$0xff] %vm539_vm5, %v494_v18  ;;  %v1494_v18 = vrot.slane %v5027_v19, 4 }
  0x93   : > { %1145 = vrot.lane.b32.xlu0 %v5014_v53, %s4159_s24  ;;  %v502_v59 = vpop.permute.xlu1 %501 }
  0x94   : > { %545 = vst.msk [vmem:[#allocation2 + $0x28] sm:$0xff] %vm539_vm5, %v502_v59  ;;  %v1495_v54 = vsel %vm976_vm4, %v1493_v31, %v1494_v18  ;;  %v1497_v59 = vsel %vm976_vm4, %v1494_v18, %v1496_v51  ;;  %v6703_v31 = vld [vmem:[#allocation13_spill] sm:$0xff] }
  0x95   : > { %v500_v61 = vpop.permute.xlu0 %499  ;;  %1151 = vrot.lane.b32.xlu1 %v5021_v43, %s4159_s24  ;;  %v5104_v60 = vpack.c.bf16 %v1497_v59, %v1495_v54  ;;  %v1271_v54 = vrot.slane %v5024_v48, 1  ;;  %v1272_v59 = vrot.slane %v5027_v19, 1 }
  0x96   : > { %544 = vst.msk [vmem:[#allocation2 + $0x20] sm:$0xff] %vm539_vm5, %v500_v61 }
  0x97   : > { %1149 = vrot.lane.b32.xlu0 %v5038_v47, %s4159_s24  ;;  %v506_v20 = vpop.permute.xlu1 %505 }
  0x98   : > { %547 = vst.msk [vmem:[#allocation2 + $0x38] sm:$0xff] %vm539_vm5, %v506_v20 }
  0x99   : > { %v504_v36 = vpop.permute.xlu0 %503  ;;  %1205 = vrot.lane.b32.xlu1 %v6695_v5, %s4160_s25 }
  0x9a   : > { %546 = vst.msk [vmem:[#allocation2 + $0x30] sm:$0xff] %vm539_vm5, %v504_v36  ;;  %v6696_v36 = vld [vmem:[#allocation5_spill] sm:$0xff] }
  0x9b   : > { %1203 = vrot.lane.b32.xlu0 %v4798_v6, %s4160_s25  ;;  %v510_v9 = vpop.permute.xlu1 %509 }
  0x9c   : > { %549 = vst.msk [vmem:[#allocation2 + $0x48] sm:$0xff] %vm539_vm5, %v510_v9  ;;  %v6697_v9 = vld [vmem:[#allocation8_spill] sm:$0xff] }
  0x9d   : > { %v508_v16 = vpop.permute.xlu0 %507  ;;  %1209 = vrot.lane.b32.xlu1 %v4822_v14, %s4160_s25 }
  0x9e   : > { %548 = vst.msk [vmem:[#allocation2 + $0x40] sm:$0xff] %vm539_vm5, %v508_v16 }
  0x9f   : > { %1207 = vrot.lane.b32.xlu0 %v4794_v34, %s4160_s25  ;;  %v514_v17 = vpop.permute.xlu1 %513 }
  0xa0   : > { %551 = vst.msk [vmem:[#allocation2 + $0x58] sm:$0xff] %vm539_vm5, %v514_v17 }
  0xa1   : > { %v512_v41 = vpop.permute.xlu0 %511  ;;  %1213 = vrot.lane.b32.xlu1 %v4850_v25, %s4160_s25 }
  0xa2   : > { %550 = vst.msk [vmem:[#allocation2 + $0x50] sm:$0xff] %vm539_vm5, %v512_v41  ;;  %v6698_v41 = vld [vmem:[#allocation10_spill] sm:$0xff] }
  0xa3   : > { %1211 = vrot.lane.b32.xlu0 %v4818_v40, %s4160_s25  ;;  %v518_v6 = vpop.permute.xlu1 %517 }
  0xa4   : > { %553 = vst.msk [vmem:[#allocation2 + $0x68] sm:$0xff] %vm539_vm5, %v518_v6  ;;  %v6699_v6 = vld [vmem:[#allocation7_spill] sm:$0xff] }
  0xa5   : > { %v516_v62 = vpop.permute.xlu0 %515  ;;  %1217 = vrot.lane.b32.xlu1 %v4862_v28, %s4160_s25 }
  0xa6   : > { %552 = vst.msk [vmem:[#allocation2 + $0x60] sm:$0xff] %vm539_vm5, %v516_v62 }
  0xa7   : > { %1215 = vrot.lane.b32.xlu0 %v4846_v24, %s4160_s25  ;;  %v522_v56 = vpop.permute.xlu1 %521 }
  0xa8   : > { %555 = vst.msk [vmem:[#allocation2 + $0x78] sm:$0xff] %vm539_vm5, %v522_v56 }
  0xa9   : > { %v520_v44 = vpop.permute.xlu0 %519  ;;  %1221 = vrot.lane.b32.xlu1 %v4875_v46, %s4160_s25 }
  0xaa   : > { %554 = vst.msk [vmem:[#allocation2 + $0x70] sm:$0xff] %vm539_vm5, %v520_v44  ;;  %v6700_v44 = vld [vmem:[#allocation16_spill] sm:$0xff]  ;;  %vm6616_vm5 = vcmask 113768  }
  0xab   : > { %1219 = vrot.lane.b32.xlu0 %v4858_v2, %s4160_s25  ;;  %v704_v38 = vpop.permute.xlu1 %703 }
  0xac   : > { %751 = vst.msk [vmem:[#allocation2 + $0x8] sm:$0xff] %vm749_vm6, %v704_v38  ;;  %v6701_v38 = vld [vmem:[#allocation9_spill] sm:$0xff] }
  0xad   : > { %v702_v58 = vpop.permute.xlu0 %701  ;;  %1225 = vrot.lane.b32.xlu1 %v4890_v26, %s4160_s25 }
  0xae   : > { %750 = vst.msk [vmem:[#allocation2] sm:$0xff] %vm749_vm6, %v702_v58 }
  0xaf   : > { %1223 = vrot.lane.b32.xlu0 %v4871_v29, %s4160_s25  ;;  %v708_v12 = vpop.permute.xlu1 %707 }
  0xb0   : > { %753 = vst.msk [vmem:[#allocation2 + $0x18] sm:$0xff] %vm749_vm6, %v708_v12 }
  0xb1   : > { %v706_v4 = vpop.permute.xlu0 %705  ;;  %1229 = vrot.lane.b32.xlu1 %v4898_v45, %s4160_s25 }
  0xb2   : > { %752 = vst.msk [vmem:[#allocation2 + $0x10] sm:$0xff] %vm749_vm6, %v706_v4  ;;  %v6702_v4 = vld [vmem:[#allocation22_spill] sm:$0xff] }
  0xb3   : > { %1227 = vrot.lane.b32.xlu0 %v4879_v7, %s4160_s25  ;;  %v712_v57 = vpop.permute.xlu1 %711 }
  0xb4   : > { %755 = vst.msk [vmem:[#allocation2 + $0x28] sm:$0xff] %vm749_vm6, %v712_v57  ;;  %v6704_v57 = vld [vmem:[#allocation28_spill] sm:$0xff] }
  0xb5   : > { %v710_v55 = vpop.permute.xlu0 %709  ;;  %1233 = vrot.lane.b32.xlu1 %v5091_v0, %s4160_s25 }
  0xb6   : > { %754 = vst.msk [vmem:[#allocation2 + $0x20] sm:$0xff] %vm749_vm6, %v710_v55  ;;  %v1274_v55 = vrot.slane %v5030_v1, 1 }
  0xb7   : > { %1231 = vrot.lane.b32.xlu0 %v4894_v10, %s4160_s25  ;;  %v716_v61 = vpop.permute.xlu1 %715  ;;  %s4179_s25 = smov 24  }
  0xb8   : > { %757 = vst.msk [vmem:[#allocation2 + $0x38] sm:$0xff] %vm749_vm6, %v716_v61  ;;  %v6705_v61 = vld [vmem:[#allocation20_spill] sm:$0xff] }
  0xb9   : > { %v714_v20 = vpop.permute.xlu0 %713  ;;  %1282 = vrot.lane.b32.xlu1 %v6696_v36, %s4161_s26 }
  0xba   : > { %756 = vst.msk [vmem:[#allocation2 + $0x30] sm:$0xff] %vm749_vm6, %v714_v20 }
  0xbb   : > { %1280 = vrot.lane.b32.xlu0 %v6697_v9, %s4161_s26  ;;  %v720_v16 = vpop.permute.xlu1 %719 }
  0xbc   : > { %759 = vst.msk [vmem:[#allocation2 + $0x48] sm:$0xff] %vm749_vm6, %v720_v16  ;;  %v6706_v16 = vld [vmem:[#allocation30_spill] sm:$0xff] }
  0xbd   : > { %v718_v17 = vpop.permute.xlu0 %717  ;;  %1286 = vrot.lane.b32.xlu1 %v6698_v41, %s4161_s26 }
  0xbe   : > { %758 = vst.msk [vmem:[#allocation2 + $0x40] sm:$0xff] %vm749_vm6, %v718_v17  ;;  %v1273_v17 = vsel %vm6612_vm0, %v1271_v54, %v1272_v59 }
  0xbf   : > { %1284 = vrot.lane.b32.xlu0 %v6699_v6, %s4161_s26  ;;  %v724_v62 = vpop.permute.xlu1 %723 }
  0xc0   : > { %761 = vst.msk [vmem:[#allocation2 + $0x58] sm:$0xff] %vm749_vm6, %v724_v62  ;;  %v1275_v62 = vsel %vm6612_vm0, %v1272_v59, %v1274_v55  ;;  %v6711_v55 = vld [vmem:[#allocation31_spill] sm:$0xff] }
  0xc1   : > { %v722_v56 = vpop.permute.xlu0 %721  ;;  %1290 = vrot.lane.b32.xlu1 %v6700_v44, %s4161_s26 }
  0xc2   : > { %760 = vst.msk [vmem:[#allocation2 + $0x50] sm:$0xff] %vm749_vm6, %v722_v56  ;;  %v6707_v56 = vld [vmem:[#allocation27_spill] sm:$0xff] }
  0xc3   : > { %1288 = vrot.lane.b32.xlu0 %v6701_v38, %s4161_s26  ;;  %v728_v58 = vpop.permute.xlu1 %727 }
  0xc4   : > { %763 = vst.msk [vmem:[#allocation2 + $0x68] sm:$0xff] %vm749_vm6, %v728_v58 }
  0xc5   : > { %v726_v12 = vpop.permute.xlu0 %725  ;;  %1294 = vrot.lane.b32.xlu1 %v6702_v4, %s4161_s26 }
  0xc6   : > { %762 = vst.msk [vmem:[#allocation2 + $0x60] sm:$0xff] %vm749_vm6, %v726_v12 }
  0xc7   : > { %1292 = vrot.lane.b32.xlu0 %v6703_v31, %s4161_s26  ;;  %v732_v18 = vpop.permute.xlu1 %731 }
  0xc8   : > { %765 = vst.msk [vmem:[#allocation2 + $0x78] sm:$0xff] %vm749_vm6, %v732_v18  ;;  %v6708_v18 = vld [vmem:[#allocation32_spill] sm:$0xff] }
  0xc9   : > { %v730_v51 = vpop.permute.xlu0 %729  ;;  %1298 = vrot.lane.b32.xlu1 %v6704_v57, %s4161_s26 }
  0xca   : > { %764 = vst.msk [vmem:[#allocation2 + $0x70] sm:$0xff] %vm749_vm6, %v730_v51  ;;  %v5153_v51 = vpack.c.bf16 %v1275_v62, %v1273_v17  ;;  %v6712_v62 = vld [vmem:[#allocation35_spill] sm:$0xff]  ;;  %vm6614_vm6 = vcmask 121968  }
  0xcb   : > { %1296 = vrot.lane.b32.xlu0 %v6705_v61, %s4161_s26  ;;  %v914_v20 = vpop.permute.xlu1 %913 }
  0xcc   : > { %961 = vst.msk [vmem:[#allocation2 + $0x8] sm:$0xff] %vm959_vm7, %v914_v20  ;;  %6709 = vst [vmem:[#allocation11_spill] sm:$0xff] %v5153_v51  ;;  %v6710_v20 = vld [vmem:[#allocation29_spill] sm:$0xff] }
  0xcd   : > { %v912_v9 = vpop.permute.xlu0 %911  ;;  %1302 = vrot.lane.b32.xlu1 %v6706_v16, %s4161_s26 }
  0xce   : > { %960 = vst.msk [vmem:[#allocation2] sm:$0xff] %vm959_vm7, %v912_v9 }
  0xcf   : > { %1300 = vrot.lane.b32.xlu0 %v6707_v56, %s4161_s26  ;;  %v918_v58 = vpop.permute.xlu1 %917 }
  0xd0   : > { %963 = vst.msk [vmem:[#allocation2 + $0x18] sm:$0xff] %vm959_vm7, %v918_v58  ;;  %v6713_v58 = vld [vmem:[#allocation33_spill] sm:$0xff] }
  0xd1   : > { %v916_v12 = vpop.permute.xlu0 %915  ;;  %1306 = vrot.lane.b32.xlu1 %v6708_v18, %s4161_s26  ;;  %v6722_v18 = vld [vmem:[#allocation42_spill] sm:$0xff] }
  0xd2   : > { %962 = vst.msk [vmem:[#allocation2 + $0x10] sm:$0xff] %vm959_vm7, %v916_v12 }
  0xd3   : > { %1304 = vrot.lane.b32.xlu0 %v6710_v20, %s4161_s26  ;;  %v922_v54 = vpop.permute.xlu1 %921 }
  0xd4   : > { %965 = vst.msk [vmem:[#allocation2 + $0x28] sm:$0xff] %vm959_vm7, %v922_v54 }
  0xd5   : > { %v920_v59 = vpop.permute.xlu0 %919  ;;  %1310 = vrot.lane.b32.xlu1 %v5153_v51, %s4161_s26 }
  0xd6   : > { %964 = vst.msk [vmem:[#allocation2 + $0x20] sm:$0xff] %vm959_vm7, %v920_v59  ;;  %v6714_v59 = vld [vmem:[#allocation37_spill] sm:$0xff] }
  0xd7   : > { %1308 = vrot.lane.b32.xlu0 %v6711_v55, %s4161_s26  ;;  %v926_v9 = vpop.permute.xlu1 %925 }
  0xd8   : > { %967 = vst.msk [vmem:[#allocation2 + $0x38] sm:$0xff] %vm959_vm7, %v926_v9  ;;  %v6715_v9 = vld [vmem:[#allocation34_spill] sm:$0xff] }
  0xd9   : > { %v924_v17 = vpop.permute.xlu0 %923  ;;  %1356 = vrot.lane.b32.xlu1 %v6712_v62, %s4162_s27 }
  0xda   : > { %966 = vst.msk [vmem:[#allocation2 + $0x30] sm:$0xff] %vm959_vm7, %v924_v17  ;;  %v6716_v17 = vld [vmem:[#allocation39_spill] sm:$0xff] }
  0xdb   : > { %1354 = vrot.lane.b32.xlu0 %v6713_v58, %s4162_s27  ;;  %v930_v12 = vpop.permute.xlu1 %929  ;;  %v6717_v58 = vld [vmem:[#allocation36_spill] sm:$0xff] }
  0xdc   : > { %969 = vst.msk [vmem:[#allocation2 + $0x48] sm:$0xff] %vm959_vm7, %v930_v12 }
  0xdd   : > { %v928_v54 = vpop.permute.xlu0 %927  ;;  %1360 = vrot.lane.b32.xlu1 %v6714_v59, %s4162_s27 }
  0xde   : > { %968 = vst.msk [vmem:[#allocation2 + $0x40] sm:$0xff] %vm959_vm7, %v928_v54  ;;  %v6718_v54 = vld [vmem:[#allocation41_spill] sm:$0xff] }
  0xdf   : > { %1358 = vrot.lane.b32.xlu0 %v6715_v9, %s4162_s27  ;;  %v934_v51 = vpop.permute.xlu1 %933 }
  0xe0   : > { %971 = vst.msk [vmem:[#allocation2 + $0x58] sm:$0xff] %vm959_vm7, %v934_v51  ;;  %v6719_v51 = vld [vmem:[#allocation38_spill] sm:$0xff] }
  0xe1   : > { %v932_v62 = vpop.permute.xlu0 %931  ;;  %1364 = vrot.lane.b32.xlu1 %v6716_v17, %s4162_s27 }
  0xe2   : > { %970 = vst.msk [vmem:[#allocation2 + $0x50] sm:$0xff] %vm959_vm7, %v932_v62  ;;  %v6720_v62 = vld [vmem:[#allocation19_spill] sm:$0xff] }
  0xe3   : > { %1362 = vrot.lane.b32.xlu0 %v6717_v58, %s4162_s27  ;;  %v938_v12 = vpop.permute.xlu1 %937  ;;  %v1346_v58 = vrot.slane %v5027_v19, 2  ;;  %v6723_v19 = vld [vmem:[#allocation18_spill] sm:$0xff] }
  0xe4   : > { %973 = vst.msk [vmem:[#allocation2 + $0x68] sm:$0xff] %vm959_vm7, %v938_v12  ;;  %v1345_v12 = vrot.slane %v5024_v48, 2 }
  0xe5   : > { %v936_v59 = vpop.permute.xlu0 %935  ;;  %1368 = vrot.lane.b32.xlu1 %v6718_v54, %s4162_s27  ;;  %v1348_v54 = vrot.slane %v5030_v1, 2 }
  0xe6   : > { %972 = vst.msk [vmem:[#allocation2 + $0x60] sm:$0xff] %vm959_vm7, %v936_v59  ;;  %v6721_v59 = vld [vmem:[#allocation40_spill] sm:$0xff] }
  0xe7   : > { %1366 = vrot.lane.b32.xlu0 %v6719_v51, %s4162_s27  ;;  %v942_v9 = vpop.permute.xlu1 %941  ;;  %v1349_v48 = vsel %vm556_vm2, %v1346_v58, %v1348_v54  ;;  %v6727_v54 = vld [vmem:[#allocation43_spill] sm:$0xff] }
  0xe8   : > { %975 = vst.msk [vmem:[#allocation2 + $0x78] sm:$0xff] %vm959_vm7, %v942_v9 }
  0xe9   : > { %v940_v17 = vpop.permute.xlu0 %939  ;;  %1372 = vrot.lane.b32.xlu1 %v6720_v62, %s4162_s27  ;;  %v6724_v62 = vld [vmem:[#allocation44_spill] sm:$0xff] }
  0xea   : > { %974 = vst.msk [vmem:[#allocation2 + $0x70] sm:$0xff] %vm959_vm7, %v940_v17  ;;  %v1347_v17 = vsel %vm556_vm2, %v1345_v12, %v1346_v58  ;;  %vm1983_vm7 = vcmask 130168  }
  0xeb   : > { %1370 = vrot.lane.b32.xlu0 %v6721_v59, %s4162_s27  ;;  %v1124_v51 = vpop.permute.xlu1 %1123 }
  0xec   : > { %1171 = vst.msk [vmem:[#allocation2 + $0x8] sm:$0xff] %vm1169_vm8, %v1124_v51  ;;  %v5208_v51 = vpack.c.bf16 %v1349_v48, %v1347_v17  ;;  %v6729_v48 = vld [vmem:[#allocation45_spill] sm:$0xff] }
  0xed   : > { %v1122_v9 = vpop.permute.xlu0 %1121  ;;  %1376 = vrot.lane.b32.xlu1 %v6722_v18, %s4162_s27 }
  0xee   : > { %1170 = vst.msk [vmem:[#allocation2] sm:$0xff] %vm1169_vm8, %v1122_v9  ;;  %6725 = vst [vmem:[#allocation12_spill] sm:$0xff] %v5208_v51  ;;  %v6726_v9 = vld [vmem:[#allocation24_spill] sm:$0xff] }
  0xef   : > { %1374 = vrot.lane.b32.xlu0 %v6723_v19, %s4162_s27  ;;  %v1128_v1 = vpop.permute.xlu1 %1127 }
  0xf0   : > { %1173 = vst.msk [vmem:[#allocation2 + $0x18] sm:$0xff] %vm1169_vm8, %v1128_v1 }
  0xf1   : > { %v1126_v59 = vpop.permute.xlu0 %1125  ;;  %1380 = vrot.lane.b32.xlu1 %v6724_v62, %s4162_s27 }
  0xf2   : > { %1172 = vst.msk [vmem:[#allocation2 + $0x10] sm:$0xff] %vm1169_vm8, %v1126_v59  ;;  %v6728_v59 = vld [vmem:[#allocation46_spill] sm:$0xff] }
  0xf3   : > { %1378 = vrot.lane.b32.xlu0 %v6726_v9, %s4162_s27  ;;  %v1132_v12 = vpop.permute.xlu1 %1131 }
  0xf4   : > { %1175 = vst.msk [vmem:[#allocation2 + $0x28] sm:$0xff] %vm1169_vm8, %v1132_v12 }
  0xf5   : > { %v1130_v58 = vpop.permute.xlu0 %1129  ;;  %1384 = vrot.lane.b32.xlu1 %v5208_v51, %s4162_s27  ;;  %v6730_v51 = vld [vmem:[#allocation48_spill] sm:$0xff] }
  0xf6   : > { %1174 = vst.msk [vmem:[#allocation2 + $0x20] sm:$0xff] %vm1169_vm8, %v1130_v58 }
  0xf7   : > { %1382 = vrot.lane.b32.xlu0 %v6727_v54, %s4162_s27  ;;  %v1136_v1 = vpop.permute.xlu1 %1135 }
  0xf8   : > { %1177 = vst.msk [vmem:[#allocation2 + $0x38] sm:$0xff] %vm1169_vm8, %v1136_v1  ;;  %v6731_v1 = vld [vmem:[#allocation6_spill] sm:$0xff] }
  0xf9   : > { %v1134_v17 = vpop.permute.xlu0 %1133  ;;  %1430 = vrot.lane.b32.xlu1 %v6728_v59, %s4163_s28 }
  0xfa   : > { %1176 = vst.msk [vmem:[#allocation2 + $0x30] sm:$0xff] %vm1169_vm8, %v1134_v17  ;;  %v6732_v17 = vld [vmem:[#allocation50_spill] sm:$0xff] }
  0xfb   : > { %1428 = vrot.lane.b32.xlu0 %v6729_v48, %s4163_s28  ;;  %v1140_v12 = vpop.permute.xlu1 %1139  ;;  %v6733_v48 = vld [vmem:[#allocation47_spill] sm:$0xff] }
  0xfc   : > { %1179 = vst.msk [vmem:[#allocation2 + $0x48] sm:$0xff] %vm1169_vm8, %v1140_v12 }
  0xfd   : > { %v1138_v58 = vpop.permute.xlu0 %1137  ;;  %1434 = vrot.lane.b32.xlu1 %v6730_v51, %s4163_s28 }
  0xfe   : > { %1178 = vst.msk [vmem:[#allocation2 + $0x40] sm:$0xff] %vm1169_vm8, %v1138_v58 }
  0xff   : > { %1432 = vrot.lane.b32.xlu0 %v6731_v1, %s4163_s28  ;;  %v1144_v54 = vpop.permute.xlu1 %1143 }
 0x100   : > { %1181 = vst.msk [vmem:[#allocation2 + $0x58] sm:$0xff] %vm1169_vm8, %v1144_v54  ;;  %v6734_v54 = vld [vmem:[#allocation49_spill] sm:$0xff] }
 0x101   : > { %v1142_v62 = vpop.permute.xlu0 %1141  ;;  %1438 = vrot.lane.b32.xlu1 %v6732_v17, %s4163_s28 }
 0x102   : > { %1180 = vst.msk [vmem:[#allocation2 + $0x50] sm:$0xff] %vm1169_vm8, %v1142_v62  ;;  %v6735_v62 = vld [vmem:[#allocation15_spill] sm:$0xff] }
 0x103   : > { %1436 = vrot.lane.b32.xlu0 %v6733_v48, %s4163_s28  ;;  %v1148_v12 = vpop.permute.xlu1 %1147 }
 0x104   : > { %1183 = vst.msk [vmem:[#allocation2 + $0x68] sm:$0xff] %vm1169_vm8, %v1148_v12 }
 0x105   : > { %v1146_v9 = vpop.permute.xlu0 %1145  ;;  %1442 = vrot.lane.b32.xlu1 %v4757_v13, %s4163_s28 }
 0x106   : > { %1182 = vst.msk [vmem:[#allocation2 + $0x60] sm:$0xff] %vm1169_vm8, %v1146_v9 }
 0x107   : > { %1440 = vrot.lane.b32.xlu0 %v6734_v54, %s4163_s28  ;;  %v1152_v58 = vpop.permute.xlu1 %1151 }
 0x108   : > { %1185 = vst.msk [vmem:[#allocation2 + $0x78] sm:$0xff] %vm1169_vm8, %v1152_v58 }
 0x109   : > { %v1150_v17 = vpop.permute.xlu0 %1149  ;;  %1446 = vrot.lane.b32.xlu1 %v4779_v23, %s4163_s28 }
 0x10a   : > { %1184 = vst.msk [vmem:[#allocation2 + $0x70] sm:$0xff] %vm1169_vm8, %v1150_v17  ;;  %vm2060_vm8 = vcmask 138368  }
 0x10b   : > { %1444 = vrot.lane.b32.xlu0 %v6735_v62, %s4163_s28  ;;  %v1206_v12 = vpop.permute.xlu1 %1205 }
 0x10c   : > { %1253 = vst.msk [vmem:[#allocation2 + $0x8] sm:$0xff] %vm1251_vm9, %v1206_v12 }
 0x10d   : > { %v1204_v9 = vpop.permute.xlu0 %1203  ;;  %1450 = vrot.lane.b32.xlu1 %v4789_v11, %s4163_s28 }
 0x10e   : > { %1252 = vst.msk [vmem:[#allocation2] sm:$0xff] %vm1251_vm9, %v1204_v9 }
 0x10f   : > { %1448 = vrot.lane.b32.xlu0 %v4759_v52, %s4163_s28  ;;  %v1210_v58 = vpop.permute.xlu1 %1209 }
 0x110   : > { %1255 = vst.msk [vmem:[#allocation2 + $0x18] sm:$0xff] %vm1251_vm9, %v1210_v58 }
 0x111   : > { %v1208_v13 = vpop.permute.xlu0 %1207  ;;  %1454 = vrot.lane.b32.xlu1 %v4828_v50, %s4163_s28 }
 0x112   : > { %1254 = vst.msk [vmem:[#allocation2 + $0x10] sm:$0xff] %vm1251_vm9, %v1208_v13 }
 0x113   : > { %1452 = vrot.lane.b32.xlu0 %v4784_v3, %s4163_s28  ;;  %v1214_v17 = vpop.permute.xlu1 %1213 }
 0x114   : > { %1257 = vst.msk [vmem:[#allocation2 + $0x28] sm:$0xff] %vm1251_vm9, %v1214_v17 }
 0x115   : > { %v1212_v12 = vpop.permute.xlu0 %1211  ;;  %1458 = vrot.lane.b32.xlu1 %v5045_v63, %s4163_s28 }
 0x116   : > { %1256 = vst.msk [vmem:[#allocation2 + $0x20] sm:$0xff] %vm1251_vm9, %v1212_v12 }
 0x117   : > { %1456 = vrot.lane.b32.xlu0 %v4826_v8, %s4163_s28  ;;  %v1218_v9 = vpop.permute.xlu1 %1217 }
 0x118   : > { %1259 = vst.msk [vmem:[#allocation2 + $0x38] sm:$0xff] %vm1251_vm9, %v1218_v9 }
 0x119   : > { %v1216_v58 = vpop.permute.xlu0 %1215  ;;  %1504 = vrot.lane.b32.xlu1 %v4925_v37, %s4164_s29 }
 0x11a   : > { %1258 = vst.msk [vmem:[#allocation2 + $0x30] sm:$0xff] %vm1251_vm9, %v1216_v58 }
 0x11b   : > { %1502 = vrot.lane.b32.xlu0 %v4830_v15, %s4164_s29  ;;  %v1222_v13 = vpop.permute.xlu1 %1221 }
 0x11c   : > { %1261 = vst.msk [vmem:[#allocation2 + $0x48] sm:$0xff] %vm1251_vm9, %v1222_v13 }
 0x11d   : > { %v1220_v17 = vpop.permute.xlu0 %1219  ;;  %1508 = vrot.lane.b32.xlu1 %v4943_v49, %s4164_s29 }
 0x11e   : > { %1260 = vst.msk [vmem:[#allocation2 + $0x40] sm:$0xff] %vm1251_vm9, %v1220_v17 }
 0x11f   : > { %1506 = vrot.lane.b32.xlu0 %v4911_v33, %s4164_s29  ;;  %v1226_v12 = vpop.permute.xlu1 %1225 }
 0x120   : > { %1263 = vst.msk [vmem:[#allocation2 + $0x58] sm:$0xff] %vm1251_vm9, %v1226_v12 }
 0x121   : > { %v1224_v9 = vpop.permute.xlu0 %1223  ;;  %1512 = vrot.lane.b32.xlu1 %v4961_v22, %s4164_s29 }
 0x122   : > { %1262 = vst.msk [vmem:[#allocation2 + $0x50] sm:$0xff] %vm1251_vm9, %v1224_v9 }
 0x123   : > { %1510 = vrot.lane.b32.xlu0 %v4934_v42, %s4164_s29  ;;  %v1230_v15 = vpop.permute.xlu1 %1229 }
 0x124   : > { %1265 = vst.msk [vmem:[#allocation2 + $0x68] sm:$0xff] %vm1251_vm9, %v1230_v15 }
 0x125   : > { %v1228_v58 = vpop.permute.xlu0 %1227  ;;  %1516 = vrot.lane.b32.xlu1 %v4979_v39, %s4164_s29 }
 0x126   : > { %1264 = vst.msk [vmem:[#allocation2 + $0x60] sm:$0xff] %vm1251_vm9, %v1228_v58 }
 0x127   : > { %1514 = vrot.lane.b32.xlu0 %v4952_v32, %s4164_s29  ;;  %v1234_v13 = vpop.permute.xlu1 %1233 }
 0x128   : > { %1267 = vst.msk [vmem:[#allocation2 + $0x78] sm:$0xff] %vm1251_vm9, %v1234_v13 }
 0x129   : > { %v1232_v17 = vpop.permute.xlu0 %1231  ;;  %1520 = vrot.lane.b32.xlu1 %v4997_v21, %s4164_s29 }
 0x12a   : > { %1266 = vst.msk [vmem:[#allocation2 + $0x70] sm:$0xff] %vm1251_vm9, %v1232_v17  ;;  %vm2134_vm9 = vcmask 146568  }
 0x12b   : > { %1518 = vrot.lane.b32.xlu0 %v4970_v30, %s4164_s29  ;;  %v1283_v12 = vpop.permute.xlu1 %1282 }
 0x12c   : > { %1330 = vst.msk [vmem:[#allocation2 + $0x8] sm:$0xff] %vm1328_vm10, %v1283_v12 }
 0x12d   : > { %v1281_v9 = vpop.permute.xlu0 %1280  ;;  %1524 = vrot.lane.b32.xlu1 %v5014_v53, %s4164_s29 }
 0x12e   : > { %1329 = vst.msk [vmem:[#allocation2] sm:$0xff] %vm1328_vm10, %v1281_v9 }
 0x12f   : > { %1522 = vrot.lane.b32.xlu0 %v4988_v35, %s4164_s29  ;;  %v1287_v15 = vpop.permute.xlu1 %1286 }
 0x130   : > { %1332 = vst.msk [vmem:[#allocation2 + $0x18] sm:$0xff] %vm1328_vm10, %v1287_v15 }
 0x131   : > { %v1285_v58 = vpop.permute.xlu0 %1284  ;;  %1528 = vrot.lane.b32.xlu1 %v5038_v47, %s4164_s29 }
 0x132   : > { %1331 = vst.msk [vmem:[#allocation2 + $0x10] sm:$0xff] %vm1328_vm10, %v1285_v58 }
 0x133   : > { %1526 = vrot.lane.b32.xlu0 %v5007_v27, %s4164_s29  ;;  %v1291_v13 = vpop.permute.xlu1 %1290 }
 0x134   : > { %1334 = vst.msk [vmem:[#allocation2 + $0x28] sm:$0xff] %vm1328_vm10, %v1291_v13 }
 0x135   : > { %v1289_v17 = vpop.permute.xlu0 %1288  ;;  %1532 = vrot.lane.b32.xlu1 %v5104_v60, %s4164_s29 }
 0x136   : > { %1333 = vst.msk [vmem:[#allocation2 + $0x20] sm:$0xff] %vm1328_vm10, %v1289_v17 }
 0x137   : > { %1530 = vrot.lane.b32.xlu0 %v5021_v43, %s4164_s29  ;;  %v1295_v12 = vpop.permute.xlu1 %1294 }
 0x138   : > { %1336 = vst.msk [vmem:[#allocation2 + $0x38] sm:$0xff] %vm1328_vm10, %v1295_v12 }
 0x139   : > { %v1293_v9 = vpop.permute.xlu0 %1292  ;;  %1571 = vrot.lane.b32.xlu1 %v4794_v34, %s4165_s30 }
 0x13a   : > { %1335 = vst.msk [vmem:[#allocation2 + $0x30] sm:$0xff] %vm1328_vm10, %v1293_v9 }
 0x13b   : > { %1569 = vrot.lane.b32.xlu0 %v6695_v5, %s4165_s30  ;;  %v1299_v15 = vpop.permute.xlu1 %1298 }
 0x13c   : > { %1338 = vst.msk [vmem:[#allocation2 + $0x48] sm:$0xff] %vm1328_vm10, %v1299_v15 }
 0x13d   : > { %v1297_v58 = vpop.permute.xlu0 %1296  ;;  %1575 = vrot.lane.b32.xlu1 %v4818_v40, %s4165_s30 }
 0x13e   : > { %1337 = vst.msk [vmem:[#allocation2 + $0x40] sm:$0xff] %vm1328_vm10, %v1297_v58 }
 0x13f   : > { %1573 = vrot.lane.b32.xlu0 %v4822_v14, %s4165_s30  ;;  %v1303_v13 = vpop.permute.xlu1 %1302 }
 0x140   : > { %1340 = vst.msk [vmem:[#allocation2 + $0x58] sm:$0xff] %vm1328_vm10, %v1303_v13 }
 0x141   : > { %v1301_v17 = vpop.permute.xlu0 %1300  ;;  %1579 = vrot.lane.b32.xlu1 %v4846_v24, %s4165_s30 }
 0x142   : > { %1339 = vst.msk [vmem:[#allocation2 + $0x50] sm:$0xff] %vm1328_vm10, %v1301_v17  ;;  %v256_v17 = vld [vmem:[%s4225_s20 + $0x198] sm:$0xff] }
 0x143   : > { %1577 = vrot.lane.b32.xlu0 %v4850_v25, %s4165_s30  ;;  %v1307_v5 = vpop.permute.xlu1 %1306 }
 0x144   : > { %1342 = vst.msk [vmem:[#allocation2 + $0x68] sm:$0xff] %vm1328_vm10, %v1307_v5  ;;  %v257_v5 = vld [vmem:[%s4225_s20 + $0x1a0] sm:$0xff] }
 0x145   : > { %v1305_v12 = vpop.permute.xlu0 %1304  ;;  %1583 = vrot.lane.b32.xlu1 %v4858_v2, %s4165_s30 }
 0x146   : > { %1341 = vst.msk [vmem:[#allocation2 + $0x60] sm:$0xff] %vm1328_vm10, %v1305_v12 }
 0x147   : > { %1581 = vrot.lane.b32.xlu0 %v4862_v28, %s4165_s30  ;;  %v1311_v9 = vpop.permute.xlu1 %1310 }
 0x148   : > { %1344 = vst.msk [vmem:[#allocation2 + $0x78] sm:$0xff] %vm1328_vm10, %v1311_v9 }
 0x149   : > { %v1309_v15 = vpop.permute.xlu0 %1308  ;;  %1587 = vrot.lane.b32.xlu1 %v4871_v29, %s4165_s30 }
 0x14a   : > { %1343 = vst.msk [vmem:[#allocation2 + $0x70] sm:$0xff] %vm1328_vm10, %v1309_v15  ;;  %v5356_v15 = vpack.c.bf16 %v257_v5, %v256_v17  ;;  %vm2208_vm10 = vcmask 154768  }
 0x14b   : > { %1585 = vrot.lane.b32.xlu0 %v4875_v46, %s4165_s30  ;;  %v1357_v58 = vpop.permute.xlu1 %1356 }
 0x14c   : > { %1404 = vst.msk [vmem:[#allocation2 + $0x8] sm:$0xff] %vm1402_vm11, %v1357_v58 }
 0x14d   : > { %v1355_v13 = vpop.permute.xlu0 %1354  ;;  %1591 = vrot.lane.b32.xlu1 %v4879_v7, %s4165_s30 }
 0x14e   : > { %1403 = vst.msk [vmem:[#allocation2] sm:$0xff] %vm1402_vm11, %v1355_v13 }
 0x14f   : > { %1589 = vrot.lane.b32.xlu0 %v4890_v26, %s4165_s30  ;;  %v1361_v12 = vpop.permute.xlu1 %1360 }
 0x150   : > { %1406 = vst.msk [vmem:[#allocation2 + $0x18] sm:$0xff] %vm1402_vm11, %v1361_v12 }
 0x151   : > { %v1359_v9 = vpop.permute.xlu0 %1358  ;;  %1595 = vrot.lane.b32.xlu1 %v4894_v10, %s4165_s30 }
 0x152   : > { %1405 = vst.msk [vmem:[#allocation2 + $0x10] sm:$0xff] %vm1402_vm11, %v1359_v9 }
 0x153   : > { %1593 = vrot.lane.b32.xlu0 %v4898_v45, %s4165_s30  ;;  %v1365_v58 = vpop.permute.xlu1 %1364 }
 0x154   : > { %1408 = vst.msk [vmem:[#allocation2 + $0x28] sm:$0xff] %vm1402_vm11, %v1365_v58 }
 0x155   : > { %v1363_v13 = vpop.permute.xlu0 %1362  ;;  %1599 = vrot.lane.b32.xlu1 %v5356_v15, %s4165_s30 }
 0x156   : > { %1407 = vst.msk [vmem:[#allocation2 + $0x20] sm:$0xff] %vm1402_vm11, %v1363_v13 }
 0x157   : > { %1597 = vrot.lane.b32.xlu0 %v5091_v0, %s4165_s30  ;;  %v1369_v12 = vpop.permute.xlu1 %1368 }
 0x158   : > { %1410 = vst.msk [vmem:[#allocation2 + $0x38] sm:$0xff] %vm1402_vm11, %v1369_v12 }
 0x159   : > { %v1367_v46 = vpop.permute.xlu0 %1366  ;;  %1648 = vrot.lane.b32.xlu1 %v6699_v6, %s4166_s5 }
 0x15a   : > { %1409 = vst.msk [vmem:[#allocation2 + $0x30] sm:$0xff] %vm1402_vm11, %v1367_v46 }
 0x15b   : > { %1646 = vrot.lane.b32.xlu0 %v6696_v36, %s4166_s5  ;;  %v1373_v9 = vpop.permute.xlu1 %1372 }
 0x15c   : > { %1412 = vst.msk [vmem:[#allocation2 + $0x48] sm:$0xff] %vm1402_vm11, %v1373_v9 }
 0x15d   : > { %v1371_v58 = vpop.permute.xlu0 %1370  ;;  %1652 = vrot.lane.b32.xlu1 %v6701_v38, %s4166_s5 }
 0x15e   : > { %1411 = vst.msk [vmem:[#allocation2 + $0x40] sm:$0xff] %vm1402_vm11, %v1371_v58  ;;  %v5392_v58 = vld [vmem:[%s4225_s20 + $0x1a8] sm:$0xf] }
 0x15f   : > { %1650 = vrot.lane.b32.xlu0 %v6698_v41, %s4166_s5  ;;  %v1377_v13 = vpop.permute.xlu1 %1376  ;;  %v1640_v30 = vrot.slane %v5392_v58, 1 }
 0x160   : > { %1414 = vst.msk [vmem:[#allocation2 + $0x58] sm:$0xff] %vm1402_vm11, %v1377_v13 }
 0x161   : > { %v1375_v46 = vpop.permute.xlu0 %1374  ;;  %1656 = vrot.lane.b32.xlu1 %v6703_v31, %s4166_s5 }
 0x162   : > { %1413 = vst.msk [vmem:[#allocation2 + $0x50] sm:$0xff] %vm1402_vm11, %v1375_v46  ;;  %v1637_v46 = vrot.slane %v256_v17, 1 }
 0x163   : > { %1654 = vrot.lane.b32.xlu0 %v6700_v44, %s4166_s5  ;;  %v1381_v36 = vpop.permute.xlu1 %1380 }
 0x164   : > { %1416 = vst.msk [vmem:[#allocation2 + $0x68] sm:$0xff] %vm1402_vm11, %v1381_v36  ;;  %v1638_v36 = vrot.slane %v257_v5, 1 }
 0x165   : > { %v1379_v12 = vpop.permute.xlu0 %1378  ;;  %1660 = vrot.lane.b32.xlu1 %v6705_v61, %s4166_s5 }
 0x166   : > { %1415 = vst.msk [vmem:[#allocation2 + $0x60] sm:$0xff] %vm1402_vm11, %v1379_v12 }
 0x167   : > { %1658 = vrot.lane.b32.xlu0 %v6702_v4, %s4166_s5  ;;  %v1385_v9 = vpop.permute.xlu1 %1384 }
 0x168   : > { %1418 = vst.msk [vmem:[#allocation2 + $0x78] sm:$0xff] %vm1402_vm11, %v1385_v9  ;;  %v1639_v9 = vsel %vm6612_vm0, %v1637_v46, %v1638_v36 }
 0x169   : > { %v1383_v13 = vpop.permute.xlu0 %1382  ;;  %1664 = vrot.lane.b32.xlu1 %v6707_v56, %s4166_s5 }
 0x16a   : > { %1417 = vst.msk [vmem:[#allocation2 + $0x70] sm:$0xff] %vm1402_vm11, %v1383_v13  ;;  %v1641_v13 = vsel %vm6612_vm0, %v1638_v36, %v1640_v30  ;;  %v6738_v36 = vld [vmem:[#allocation11_spill] sm:$0xff]  ;;  %vm2282_vm11 = vcmask 162968   ;;  %vm2648_vm0 = vcmask 203968  }
 0x16b   : > { %1662 = vrot.lane.b32.xlu0 %v6704_v57, %s4166_s5  ;;  %v1431_v12 = vpop.permute.xlu1 %1430  ;;  %v6741_v57 = vld [vmem:[#allocation36_spill] sm:$0xff] }
 0x16c   : > { %1478 = vst.msk [vmem:[#allocation2 + $0x8] sm:$0xff] %vm1476_vm12, %v1431_v12  ;;  %v5412_v12 = vpack.c.bf16 %v1641_v13, %v1639_v9  ;;  %v6739_v13 = vld [vmem:[#allocation34_spill] sm:$0xff] }
 0x16d   : > { %v1429_v61 = vpop.permute.xlu0 %1428  ;;  %1668 = vrot.lane.b32.xlu1 %v6710_v20, %s4166_s5 }
 0x16e   : > { %1477 = vst.msk [vmem:[#allocation2] sm:$0xff] %vm1476_vm12, %v1429_v61  ;;  %6736 = vst [vmem:[#allocation14_spill] sm:$0xff] %v5412_v12  ;;  %v6737_v61 = vld [vmem:[#allocation32_spill] sm:$0xff] }
 0x16f   : > { %1666 = vrot.lane.b32.xlu0 %v6706_v16, %s4166_s5  ;;  %v1435_v17 = vpop.permute.xlu1 %1434 }
 0x170   : > { %1480 = vst.msk [vmem:[#allocation2 + $0x18] sm:$0xff] %vm1476_vm12, %v1435_v17 }
 0x171   : > { %v1433_v5 = vpop.permute.xlu0 %1432  ;;  %1672 = vrot.lane.b32.xlu1 %v6711_v55, %s4166_s5 }
 0x172   : > { %1479 = vst.msk [vmem:[#allocation2 + $0x10] sm:$0xff] %vm1476_vm12, %v1433_v5  ;;  %v6740_v5 = vld [vmem:[#allocation35_spill] sm:$0xff] }
 0x173   : > { %1670 = vrot.lane.b32.xlu0 %v6737_v61, %s4166_s5  ;;  %v1439_v46 = vpop.permute.xlu1 %1438 }
 0x174   : > { %1482 = vst.msk [vmem:[#allocation2 + $0x28] sm:$0xff] %vm1476_vm12, %v1439_v46 }
 0x175   : > { %v1437_v30 = vpop.permute.xlu0 %1436  ;;  %1676 = vrot.lane.b32.xlu1 %v5412_v12, %s4166_s5 }
 0x176   : > { %1481 = vst.msk [vmem:[#allocation2 + $0x20] sm:$0xff] %vm1476_vm12, %v1437_v30 }
 0x177   : > { %1674 = vrot.lane.b32.xlu0 %v6738_v36, %s4166_s5  ;;  %v1443_v17 = vpop.permute.xlu1 %1442 }
 0x178   : > { %1484 = vst.msk [vmem:[#allocation2 + $0x38] sm:$0xff] %vm1476_vm12, %v1443_v17  ;;  %v6742_v17 = vld [vmem:[#allocation37_spill] sm:$0xff] }
 0x179   : > { %v1441_v9 = vpop.permute.xlu0 %1440  ;;  %1722 = vrot.lane.b32.xlu1 %v6739_v13, %s4167_s6 }
 0x17a   : > { %1483 = vst.msk [vmem:[#allocation2 + $0x30] sm:$0xff] %vm1476_vm12, %v1441_v9  ;;  %v6743_v9 = vld [vmem:[#allocation19_spill] sm:$0xff] }
 0x17b   : > { %1720 = vrot.lane.b32.xlu0 %v6740_v5, %s4167_s6  ;;  %v1447_v46 = vpop.permute.xlu1 %1446 }
 0x17c   : > { %1486 = vst.msk [vmem:[#allocation2 + $0x48] sm:$0xff] %vm1476_vm12, %v1447_v46 }
 0x17d   : > { %v1445_v30 = vpop.permute.xlu0 %1444  ;;  %1726 = vrot.lane.b32.xlu1 %v6741_v57, %s4167_s6 }
 0x17e   : > { %1485 = vst.msk [vmem:[#allocation2 + $0x40] sm:$0xff] %vm1476_vm12, %v1445_v30 }
 0x17f   : > { %1724 = vrot.lane.b32.xlu0 %v6742_v17, %s4167_s6  ;;  %v1451_v12 = vpop.permute.xlu1 %1450 }
 0x180   : > { %1488 = vst.msk [vmem:[#allocation2 + $0x58] sm:$0xff] %vm1476_vm12, %v1451_v12 }
 0x181   : > { %v1449_v62 = vpop.permute.xlu0 %1448  ;;  %1738 = vrot.lane.b32.xlu1 %v6723_v19, %s4167_s6 }
 0x182   : > { %1487 = vst.msk [vmem:[#allocation2 + $0x50] sm:$0xff] %vm1476_vm12, %v1449_v62 }
 0x183   : > { %1736 = vrot.lane.b32.xlu0 %v6743_v9, %s4167_s6  ;;  %v1455_v5 = vpop.permute.xlu1 %1454 }
 0x184   : > { %1490 = vst.msk [vmem:[#allocation2 + $0x68] sm:$0xff] %vm1476_vm12, %v1455_v5 }
 0x185   : > { %v1453_v46 = vpop.permute.xlu0 %1452  ;;  %1810 = vrot.lane.b32.xlu1 %v4779_v23, %s4168_s7 }
 0x186   : > { %1489 = vst.msk [vmem:[#allocation2 + $0x60] sm:$0xff] %vm1476_vm12, %v1453_v46 }
 0x187   : > { %1794 = vrot.lane.b32.xlu0 %v6728_v59, %s4168_s7  ;;  %v1459_v12 = vpop.permute.xlu1 %1458 }
 0x188   : > { %1492 = vst.msk [vmem:[#allocation2 + $0x78] sm:$0xff] %vm1476_vm12, %v1459_v12 }
 0x189   : > { %v1457_v62 = vpop.permute.xlu0 %1456  ;;  %1812 = vrot.lane.b32.xlu1 %v4759_v52, %s4168_s7 }
 0x18a   : > { %1491 = vst.msk [vmem:[#allocation2 + $0x70] sm:$0xff] %vm1476_vm12, %v1457_v62  ;;  %vm2349_vm12 = vcmask 171168  }
 0x18b   : > { %1796 = vrot.lane.b32.xlu0 %v6731_v1, %s4168_s7  ;;  %v1505_v30 = vpop.permute.xlu1 %1504 }
 0x18c   : > { %1552 = vst.msk [vmem:[#allocation2 + $0x8] sm:$0xff] %vm1550_vm13, %v1505_v30 }
 0x18d   : > { %v1503_v5 = vpop.permute.xlu0 %1502  ;;  %1884 = vrot.lane.b32.xlu1 %v4997_v21, %s4169_s8 }
 0x18e   : > { %1551 = vst.msk [vmem:[#allocation2] sm:$0xff] %vm1550_vm13, %v1503_v5 }
 0x18f   : > { %1868 = vrot.lane.b32.xlu0 %v4925_v37, %s4169_s8  ;;  %v1509_v59 = vpop.permute.xlu1 %1508 }
 0x190   : > { %1554 = vst.msk [vmem:[#allocation2 + $0x18] sm:$0xff] %vm1550_vm13, %v1509_v59 }
 0x191   : > { %v1507_v46 = vpop.permute.xlu0 %1506  ;;  %1886 = vrot.lane.b32.xlu1 %v4988_v35, %s4169_s8 }
 0x192   : > { %1553 = vst.msk [vmem:[#allocation2 + $0x10] sm:$0xff] %vm1550_vm13, %v1507_v46 }
 0x193   : > { %1870 = vrot.lane.b32.xlu0 %v4911_v33, %s4169_s8  ;;  %v1513_v12 = vpop.permute.xlu1 %1512 }
 0x194   : > { %1556 = vst.msk [vmem:[#allocation2 + $0x28] sm:$0xff] %vm1550_vm13, %v1513_v12 }
 0x195   : > { %v1511_v62 = vpop.permute.xlu0 %1510  ;;  %1951 = vrot.lane.b32.xlu1 %v4871_v29, %s4170_s9 }
 0x196   : > { %1555 = vst.msk [vmem:[#allocation2 + $0x20] sm:$0xff] %vm1550_vm13, %v1511_v62 }
 0x197   : > { %1935 = vrot.lane.b32.xlu0 %v4794_v34, %s4170_s9  ;;  %v1517_v37 = vpop.permute.xlu1 %1516 }
 0x198   : > { %1558 = vst.msk [vmem:[#allocation2 + $0x38] sm:$0xff] %vm1550_vm13, %v1517_v37 }
 0x199   : > { %v1515_v30 = vpop.permute.xlu0 %1514  ;;  %1953 = vrot.lane.b32.xlu1 %v4890_v26, %s4170_s9 }
 0x19a   : > { %1557 = vst.msk [vmem:[#allocation2 + $0x30] sm:$0xff] %vm1550_vm13, %v1515_v30 }
 0x19b   : > { %1937 = vrot.lane.b32.xlu0 %v4822_v14, %s4170_s9  ;;  %v1521_v5 = vpop.permute.xlu1 %1520 }
 0x19c   : > { %1560 = vst.msk [vmem:[#allocation2 + $0x48] sm:$0xff] %vm1550_vm13, %v1521_v5 }
 0x19d   : > { %v1519_v59 = vpop.permute.xlu0 %1518  ;;  %2028 = vrot.lane.b32.xlu1 %v6707_v56, %s4171_s10 }
 0x19e   : > { %1559 = vst.msk [vmem:[#allocation2 + $0x40] sm:$0xff] %vm1550_vm13, %v1519_v59 }
 0x19f   : > { %2012 = vrot.lane.b32.xlu0 %v6699_v6, %s4171_s10  ;;  %v1525_v34 = vpop.permute.xlu1 %1524 }
 0x1a0   : > { %1562 = vst.msk [vmem:[#allocation2 + $0x58] sm:$0xff] %vm1550_vm13, %v1525_v34 }
 0x1a1   : > { %v1523_v46 = vpop.permute.xlu0 %1522  ;;  %2030 = vrot.lane.b32.xlu1 %v6706_v16, %s4171_s10 }
 0x1a2   : > { %1561 = vst.msk [vmem:[#allocation2 + $0x50] sm:$0xff] %vm1550_vm13, %v1523_v46 }
 0x1a3   : > { %2014 = vrot.lane.b32.xlu0 %v6698_v41, %s4171_s10  ;;  %v1529_v12 = vpop.permute.xlu1 %1528 }
 0x1a4   : > { %1564 = vst.msk [vmem:[#allocation2 + $0x68] sm:$0xff] %vm1550_vm13, %v1529_v12 }
 0x1a5   : > { %v1527_v62 = vpop.permute.xlu0 %1526  ;;  %2102 = vrot.lane.b32.xlu1 %v6723_v19, %s4172_s11 }
 0x1a6   : > { %1563 = vst.msk [vmem:[#allocation2 + $0x60] sm:$0xff] %vm1550_vm13, %v1527_v62 }
 0x1a7   : > { %2086 = vrot.lane.b32.xlu0 %v6739_v13, %s4172_s11  ;;  %v1533_v6 = vpop.permute.xlu1 %1532 }
 0x1a8   : > { %1566 = vst.msk [vmem:[#allocation2 + $0x78] sm:$0xff] %vm1550_vm13, %v1533_v6 }
 0x1a9   : > { %v1531_v37 = vpop.permute.xlu0 %1530  ;;  %2104 = vrot.lane.b32.xlu1 %v6722_v18, %s4172_s11 }
 0x1aa   : > { %1565 = vst.msk [vmem:[#allocation2 + $0x70] sm:$0xff] %vm1550_vm13, %v1531_v37  ;;  %vm6615_vm13 = vcmask 179368  }
 0x1ab   : > { %2088 = vrot.lane.b32.xlu0 %v6742_v17, %s4172_s11  ;;  %v1572_v30 = vpop.permute.xlu1 %1571 }
 0x1ac   : > { %1619 = vst.msk [vmem:[#allocation2 + $0x8] sm:$0xff] %vm1617_vm14, %v1572_v30  ;;  %v6744_v30 = vld [vmem:[#allocation24_spill] sm:$0xff] }
 0x1ad   : > { %v1570_v5 = vpop.permute.xlu0 %1569  ;;  %2176 = vrot.lane.b32.xlu1 %v4759_v52, %s4173_s12 }
 0x1ae   : > { %1618 = vst.msk [vmem:[#allocation2] sm:$0xff] %vm1617_vm14, %v1570_v5 }
 0x1af   : > { %2160 = vrot.lane.b32.xlu0 %v6731_v1, %s4173_s12  ;;  %v1576_v13 = vpop.permute.xlu1 %1575 }
 0x1b0   : > { %1621 = vst.msk [vmem:[#allocation2 + $0x18] sm:$0xff] %vm1617_vm14, %v1576_v13 }
 0x1b1   : > { %v1574_v59 = vpop.permute.xlu0 %1573  ;;  %2178 = vrot.lane.b32.xlu1 %v4789_v11, %s4173_s12 }
 0x1b2   : > { %1620 = vst.msk [vmem:[#allocation2 + $0x10] sm:$0xff] %vm1617_vm14, %v1574_v59 }
 0x1b3   : > { %2162 = vrot.lane.b32.xlu0 %v6730_v51, %s4173_s12  ;;  %v1580_v34 = vpop.permute.xlu1 %1579 }
 0x1b4   : > { %1623 = vst.msk [vmem:[#allocation2 + $0x28] sm:$0xff] %vm1617_vm14, %v1580_v34 }
 0x1b5   : > { %v1578_v46 = vpop.permute.xlu0 %1577  ;;  %2250 = vrot.lane.b32.xlu1 %v4988_v35, %s4174_s13 }
 0x1b6   : > { %1622 = vst.msk [vmem:[#allocation2 + $0x20] sm:$0xff] %vm1617_vm14, %v1578_v46 }
 0x1b7   : > { %2234 = vrot.lane.b32.xlu0 %v4911_v33, %s4174_s13  ;;  %v1584_v1 = vpop.permute.xlu1 %1583 }
 0x1b8   : > { %1625 = vst.msk [vmem:[#allocation2 + $0x38] sm:$0xff] %vm1617_vm14, %v1584_v1 }
 0x1b9   : > { %v1582_v12 = vpop.permute.xlu0 %1581  ;;  %2236 = vrot.lane.b32.xlu1 %v4943_v49, %s4174_s13 }
 0x1ba   : > { %1624 = vst.msk [vmem:[#allocation2 + $0x30] sm:$0xff] %vm1617_vm14, %v1582_v12 }
 0x1bb   : > { %1740 = vrot.lane.b32.xlu0 %v6722_v18, %s4167_s6  ;;  %v1588_v62 = vpop.permute.xlu1 %1587 }
 0x1bc   : > { %1627 = vst.msk [vmem:[#allocation2 + $0x48] sm:$0xff] %vm1617_vm14, %v1588_v62 }
 0x1bd   : > { %v1586_v6 = vpop.permute.xlu0 %1585  ;;  %2301 = vrot.lane.b32.xlu1 %v4822_v14, %s4175_s14 }
 0x1be   : > { %1626 = vst.msk [vmem:[#allocation2 + $0x40] sm:$0xff] %vm1617_vm14, %v1586_v6 }
 0x1bf   : > { %2252 = vrot.lane.b32.xlu0 %v5014_v53, %s4174_s13  ;;  %v1592_v33 = vpop.permute.xlu1 %1591 }
 0x1c0   : > { %1629 = vst.msk [vmem:[#allocation2 + $0x58] sm:$0xff] %vm1617_vm14, %v1592_v33 }
 0x1c1   : > { %v1590_v37 = vpop.permute.xlu0 %1589  ;;  %1742 = vrot.lane.b32.xlu1 %v6744_v30, %s4167_s6 }
 0x1c2   : > { %1628 = vst.msk [vmem:[#allocation2 + $0x50] sm:$0xff] %vm1617_vm14, %v1590_v37 }
 0x1c3   : > { %2317 = vrot.lane.b32.xlu0 %v4890_v26, %s4175_s14  ;;  %v1596_v5 = vpop.permute.xlu1 %1595 }
 0x1c4   : > { %1631 = vst.msk [vmem:[#allocation2 + $0x68] sm:$0xff] %vm1617_vm14, %v1596_v5 }
 0x1c5   : > { %v1594_v14 = vpop.permute.xlu0 %1593  ;;  %1814 = vrot.lane.b32.xlu1 %v4789_v11, %s4168_s7 }
 0x1c6   : > { %1630 = vst.msk [vmem:[#allocation2 + $0x60] sm:$0xff] %vm1617_vm14, %v1594_v14 }
 0x1c7   : > { %1798 = vrot.lane.b32.xlu0 %v6730_v51, %s4168_s7  ;;  %v1600_v13 = vpop.permute.xlu1 %1599 }
 0x1c8   : > { %1633 = vst.msk [vmem:[#allocation2 + $0x78] sm:$0xff] %vm1617_vm14, %v1600_v13 }
 0x1c9   : > { %v1598_v59 = vpop.permute.xlu0 %1597  ;;  %2319 = vrot.lane.b32.xlu1 %v4879_v7, %s4175_s14 }
 0x1ca   : > { %1632 = vst.msk [vmem:[#allocation2 + $0x70] sm:$0xff] %vm1617_vm14, %v1598_v59  ;;  %vm6617_vm14 = vcmask 187568  }
 0x1cb   : > { %2303 = vrot.lane.b32.xlu0 %v4818_v40, %s4175_s14  ;;  %v1649_v26 = vpop.permute.xlu1 %1648 }
 0x1cc   : > { %1696 = vst.msk [vmem:[#allocation2 + $0x8] sm:$0xff] %vm1694_vm15, %v1649_v26 }
 0x1cd   : > { %v1647_v34 = vpop.permute.xlu0 %1646  ;;  %2394 = vrot.lane.b32.xlu1 %v6706_v16, %s4176_s17 }
 0x1ce   : > { %1695 = vst.msk [vmem:[#allocation2] sm:$0xff] %vm1694_vm15, %v1647_v34 }
 0x1cf   : > { %2378 = vrot.lane.b32.xlu0 %v6698_v41, %s4176_s17  ;;  %v1653_v46 = vpop.permute.xlu1 %1652 }
 0x1d0   : > { %1698 = vst.msk [vmem:[#allocation2 + $0x18] sm:$0xff] %vm1694_vm15, %v1653_v46 }
 0x1d1   : > { %v1651_v1 = vpop.permute.xlu0 %1650  ;;  %1816 = vrot.lane.b32.xlu1 %v4784_v3, %s4168_s7 }
 0x1d2   : > { %1697 = vst.msk [vmem:[#allocation2 + $0x10] sm:$0xff] %vm1694_vm15, %v1651_v1 }
 0x1d3   : > { %1800 = vrot.lane.b32.xlu0 %v6733_v48, %s4168_s7  ;;  %v1657_v12 = vpop.permute.xlu1 %1656 }
 0x1d4   : > { %1700 = vst.msk [vmem:[#allocation2 + $0x28] sm:$0xff] %vm1694_vm15, %v1657_v12 }
 0x1d5   : > { %v1655_v16 = vpop.permute.xlu0 %1654  ;;  %1888 = vrot.lane.b32.xlu1 %v5014_v53, %s4169_s8 }
 0x1d6   : > { %1699 = vst.msk [vmem:[#allocation2 + $0x20] sm:$0xff] %vm1694_vm15, %v1655_v16 }
 0x1d7   : > { %1872 = vrot.lane.b32.xlu0 %v4943_v49, %s4169_s8  ;;  %v1661_v41 = vpop.permute.xlu1 %1660 }
 0x1d8   : > { %1702 = vst.msk [vmem:[#allocation2 + $0x38] sm:$0xff] %vm1694_vm15, %v1661_v41  ;;  %v199_v41 = vld [vmem:[%s6494_s1 + $0x10] sm:$0xff] }
 0x1d9   : > { %v1659_v62 = vpop.permute.xlu0 %1658  ;;  %2396 = vrot.lane.b32.xlu1 %v6710_v20, %s4176_s17 }
 0x1da   : > { %1701 = vst.msk [vmem:[#allocation2 + $0x30] sm:$0xff] %vm1694_vm15, %v1659_v62  ;;  %v200_v62 = vld [vmem:[%s6494_s1 + $0x18] sm:$0x1] }
 0x1db   : > { %2380 = vrot.lane.b32.xlu0 %v6701_v38, %s4176_s17  ;;  %v1665_v6 = vpop.permute.xlu1 %1664 }
 0x1dc   : > { %1704 = vst.msk [vmem:[#allocation2 + $0x48] sm:$0xff] %vm1694_vm15, %v1665_v6  ;;  %v202_v6 = vpack.c.bf16 %v200_v62, %v199_v41  ;;  %v6748_v62 = vld [vmem:[#allocation43_spill] sm:$0xff] }
 0x1dd   : > { %v1663_v33 = vpop.permute.xlu0 %1662  ;;  %2468 = vrot.lane.b32.xlu1 %v6722_v18, %s4177_s18 }
 0x1de   : > { %1703 = vst.msk [vmem:[#allocation2 + $0x40] sm:$0xff] %vm1694_vm15, %v1663_v33  ;;  %v4180_v33 = vmov 65535  }
 0x1df   : > { %2452 = vrot.lane.b32.xlu0 %v6742_v17, %s4177_s18  ;;  %v1669_v37 = vpop.permute.xlu1 %1668 }
 0x1e0   : > { %1706 = vst.msk [vmem:[#allocation2 + $0x58] sm:$0xff] %vm1694_vm15, %v1669_v37  ;;  %v2730_v37 = vsel %vm976_vm4, 4294967295, %v4180_v33 }
 0x1e1   : > { %v1667_v5 = vpop.permute.xlu0 %1666  ;;  %1890 = vrot.lane.b32.xlu1 %v5007_v27, %s4169_s8 }
 0x1e2   : > { %1705 = vst.msk [vmem:[#allocation2 + $0x50] sm:$0xff] %vm1694_vm15, %v1667_v5  ;;  %v2731_v5 = vsel %vm766_vm3, %v2730_v37, 0 }
 0x1e3   : > { %1874 = vrot.lane.b32.xlu0 %v4934_v42, %s4169_s8  ;;  %v1673_v14 = vpop.permute.xlu1 %1672 }
 0x1e4   : > { %1708 = vst.msk [vmem:[#allocation2 + $0x68] sm:$0xff] %vm1694_vm15, %v1673_v14  ;;  %v2733_v14 = vand.u32 %v2731_v5, %v202_v6  ;;  %v6749_v6 = vld [vmem:[#allocation38_spill] sm:$0xff] }
 0x1e5   : > { %v1671_v18 = vpop.permute.xlu0 %1670  ;;  %1955 = vrot.lane.b32.xlu1 %v4879_v7, %s4170_s9 }
 0x1e6   : > { %1707 = vst.msk [vmem:[#allocation2 + $0x60] sm:$0xff] %vm1694_vm15, %v1671_v18 }
 0x1e7   : > { %1939 = vrot.lane.b32.xlu0 %v4818_v40, %s4170_s9  ;;  %v1677_v17 = vpop.permute.xlu1 %1676 }
 0x1e8   : > { %1710 = vst.msk [vmem:[#allocation2 + $0x78] sm:$0xff] %vm1694_vm15, %v1677_v17 }
 0x1e9   : > { %v1675_v13 = vpop.permute.xlu0 %1674  ;;  %2470 = vrot.lane.b32.xlu1 %v6744_v30, %s4177_s18 }
 0x1ea   : > { %1709 = vst.msk [vmem:[#allocation2 + $0x70] sm:$0xff] %vm1694_vm15, %v1675_v13  ;;  %vm6613_vm15 = vcmask 195768  }
 0x1eb   : > { %2454 = vrot.lane.b32.xlu0 %v6741_v57, %s4177_s18  ;;  %v1723_v59 = vpop.permute.xlu1 %1722 }
 0x1ec   : > { %1770 = vst.msk [vmem:[#allocation2 + $0x8] sm:$0xff] %vm1768_vm1, %v1723_v59 }
 0x1ed   : > { %v1721_v7 = vpop.permute.xlu0 %1720  ;;  %2542 = vrot.lane.b32.xlu1 %v4789_v11, %s4178_s19 }
 0x1ee   : > { %1769 = vst.msk [vmem:[#allocation2] sm:$0xff] %vm1768_vm1, %v1721_v7 }
 0x1ef   : > { %2526 = vrot.lane.b32.xlu0 %v6730_v51, %s4178_s19  ;;  %v1727_v40 = vpop.permute.xlu1 %1726 }
 0x1f0   : > { %1772 = vst.msk [vmem:[#allocation2 + $0x18] sm:$0xff] %vm1768_vm1, %v1727_v40  ;;  %v6745_v40 = vld [vmem:[#allocation44_spill] sm:$0xff] }
 0x1f1   : > { %v1725_v26 = vpop.permute.xlu0 %1724  ;;  %1957 = vrot.lane.b32.xlu1 %v4898_v45, %s4170_s9 }
 0x1f2   : > { %1771 = vst.msk [vmem:[#allocation2 + $0x10] sm:$0xff] %vm1768_vm1, %v1725_v26 }
 0x1f3   : > { %1941 = vrot.lane.b32.xlu0 %v4850_v25, %s4170_s9  ;;  %v1739_v34 = vpop.permute.xlu1 %1738 }
 0x1f4   : > { %1778 = vst.msk [vmem:[#allocation2 + $0x48] sm:$0xff] %vm1768_vm1, %v1739_v34 }
 0x1f5   : > { %v1737_v11 = vpop.permute.xlu0 %1736  ;;  %2032 = vrot.lane.b32.xlu1 %v6710_v20, %s4171_s10  ;;  %v197_v20 = vld [vmem:[%s6494_s1] sm:$0xff] }
 0x1f6   : > { %1777 = vst.msk [vmem:[#allocation2 + $0x40] sm:$0xff] %vm1768_vm1, %v1737_v11 }
 0x1f7   : > { %2016 = vrot.lane.b32.xlu0 %v6701_v38, %s4171_s10  ;;  %v1811_v51 = vpop.permute.xlu1 %1810  ;;  %v198_v38 = vld [vmem:[%s6494_s1 + $0x8] sm:$0xff] }
 0x1f8   : > { %1851 = vst.msk [vmem:[#allocation2 + $0x40] sm:$0xff] %vm6616_vm5, %v1811_v51  ;;  %v201_v12 = vpack.c.bf16 %v198_v38, %v197_v20 }
 0x1f9   : > { %v1795_v46 = vpop.permute.xlu0 %1794  ;;  %2544 = vrot.lane.b32.xlu1 %v4784_v3, %s4178_s19 }
 0x1fa   : > { %1843 = vst.msk [vmem:[#allocation2] sm:$0xff] %vm6616_vm5, %v1795_v46  ;;  %4066 = vmatprep.subr.bf16.mxu0 %v201_v12  ;;  %4102 = vmatprep.subr.bf16.mxu1 %v201_v12  ;;  %v6747_v46 = vld [vmem:[#allocation50_spill] sm:$0xff] }
 0x1fb   : > { %2528 = vrot.lane.b32.xlu0 %v6733_v48, %s4178_s19  ;;  %v1813_v1 = vpop.permute.xlu1 %1812  ;;  %4067 = vmatpush3.bf16.msra.mxu0 %v201_v12 }
 0x1fc   : > { %1852 = vst.msk [vmem:[#allocation2 + $0x48] sm:$0xff] %vm6616_vm5, %v1813_v1  ;;  %4104 = vmatpush3.bf16.msra.mxu1 %v201_v12  ;;  %4068 = vmatprep.subr.bf16.mxu0 %v2733_v14 }
 0x1fd   : > { %v1797_v16 = vpop.permute.xlu0 %1796  ;;  %2616 = vrot.lane.b32.xlu1 %v5014_v53, %s4179_s25  ;;  %4103 = vmatprep.subr.bf16.mxu1 %v2733_v14 }
 0x1fe   : > { %1844 = vst.msk [vmem:[#allocation2 + $0x8] sm:$0xff] %vm6616_vm5, %v1797_v16 }
 0x1ff   : > { %2600 = vrot.lane.b32.xlu0 %v4943_v49, %s4179_s25  ;;  %v1885_v53 = vpop.permute.xlu1 %1884  ;;  %4069 = vmatpush3.bf16.msra.mxu0 %v2733_v14 }
 0x200   : > { %1925 = vst.msk [vmem:[#allocation2 + $0x40] sm:$0xff] %vm6614_vm6, %v1885_v53  ;;  %4105 = vmatpush3.bf16.msra.mxu1 %v2733_v14 }
 0x201   : > { %v1869_v18 = vpop.permute.xlu0 %1868  ;;  %2034 = vrot.lane.b32.xlu1 %v6737_v61, %s4171_s10 }
 0x202   : > { %1917 = vst.msk [vmem:[#allocation2] sm:$0xff] %vm6614_vm6, %v1869_v18 }
 0x203   : > { %2018 = vrot.lane.b32.xlu0 %v6700_v44, %s4171_s10  ;;  %v1887_v49 = vpop.permute.xlu1 %1886 }
 0x204   : > { %1926 = vst.msk [vmem:[#allocation2 + $0x48] sm:$0xff] %vm6614_vm6, %v1887_v49 }
 0x205   : > { %v1871_v17 = vpop.permute.xlu0 %1870  ;;  %2106 = vrot.lane.b32.xlu1 %v6744_v30, %s4172_s11 }
 0x206   : > { %1918 = vst.msk [vmem:[#allocation2 + $0x8] sm:$0xff] %vm6614_vm6, %v1871_v17 }
 0x207   : > { %2090 = vrot.lane.b32.xlu0 %v6741_v57, %s4172_s11  ;;  %v1952_v13 = vpop.permute.xlu1 %1951  ;;  %v6746_v57 = vld [vmem:[#allocation39_spill] sm:$0xff] }
 0x208   : > { %1992 = vst.msk [vmem:[#allocation2 + $0x40] sm:$0xff] %vm1983_vm7, %v1952_v13 }
 0x209   : > { %v1936_v59 = vpop.permute.xlu0 %1935  ;;  %2618 = vrot.lane.b32.xlu1 %v5007_v27, %s4179_s25 }
 0x20a   : > { %1984 = vst.msk [vmem:[#allocation2] sm:$0xff] %vm1983_vm7, %v1936_v59 }
 0x20b   : > { %2602 = vrot.lane.b32.xlu0 %v4934_v42, %s4179_s25  ;;  %v1954_v7 = vpop.permute.xlu1 %1953 }
 0x20c   : > { %1993 = vst.msk [vmem:[#allocation2 + $0x48] sm:$0xff] %vm1983_vm7, %v1954_v7 }
 0x20d   : > { %v1938_v30 = vpop.permute.xlu0 %1937  ;;  %2108 = vrot.lane.b32.xlu1 %v6745_v40, %s4172_s11 }
 0x20e   : > { %1985 = vst.msk [vmem:[#allocation2 + $0x8] sm:$0xff] %vm1983_vm7, %v1938_v30 }
 0x20f   : > { %2092 = vrot.lane.b32.xlu0 %v6746_v57, %s4172_s11  ;;  %v2029_v26 = vpop.permute.xlu1 %2028 }
 0x210   : > { %2069 = vst.msk [vmem:[#allocation2 + $0x40] sm:$0xff] %vm2060_vm8, %v2029_v26 }
 0x211   : > { %v2013_v34 = vpop.permute.xlu0 %2012  ;;  %2180 = vrot.lane.b32.xlu1 %v4784_v3, %s4173_s12 }
 0x212   : > { %2061 = vst.msk [vmem:[#allocation2] sm:$0xff] %vm2060_vm8, %v2013_v34 }
 0x213   : > { %2164 = vrot.lane.b32.xlu0 %v6733_v48, %s4173_s12  ;;  %v2031_v11 = vpop.permute.xlu1 %2030 }
 0x214   : > { %2070 = vst.msk [vmem:[#allocation2 + $0x48] sm:$0xff] %vm2060_vm8, %v2031_v11 }
 0x215   : > { %v2015_v51 = vpop.permute.xlu0 %2014  ;;  %2182 = vrot.lane.b32.xlu1 %v4828_v50, %s4173_s12 }
 0x216   : > { %2062 = vst.msk [vmem:[#allocation2 + $0x8] sm:$0xff] %vm2060_vm8, %v2015_v51 }
 0x217   : > { %2166 = vrot.lane.b32.xlu0 %v6747_v46, %s4173_s12  ;;  %v2103_v1 = vpop.permute.xlu1 %2102 }
 0x218   : > { %2143 = vst.msk [vmem:[#allocation2 + $0x40] sm:$0xff] %vm2134_vm9, %v2103_v1 }
 0x219   : > { %v2087_v3 = vpop.permute.xlu0 %2086  ;;  %2254 = vrot.lane.b32.xlu1 %v5007_v27, %s4174_s13 }
 0x21a   : > { %2135 = vst.msk [vmem:[#allocation2] sm:$0xff] %vm2134_vm9, %v2087_v3 }
 0x21b   : > { %2238 = vrot.lane.b32.xlu0 %v4934_v42, %s4174_s13  ;;  %v2105_v48 = vpop.permute.xlu1 %2104 }
 0x21c   : > { %2144 = vst.msk [vmem:[#allocation2 + $0x48] sm:$0xff] %vm2134_vm9, %v2105_v48 }
 0x21d   : > { %v2089_v20 = vpop.permute.xlu0 %2088  ;;  %1744 = vrot.lane.b32.xlu1 %v6745_v40, %s4167_s6 }
 0x21e   : > { %2136 = vst.msk [vmem:[#allocation2 + $0x8] sm:$0xff] %vm2134_vm9, %v2089_v20 }
 0x21f   : > { %1728 = vrot.lane.b32.xlu0 %v6746_v57, %s4167_s6  ;;  %v2177_v38 = vpop.permute.xlu1 %2176 }
 0x220   : > { %2217 = vst.msk [vmem:[#allocation2 + $0x40] sm:$0xff] %vm2208_vm10, %v2177_v38 }
 0x221   : > { %v2161_v27 = vpop.permute.xlu0 %2160  ;;  %2256 = vrot.lane.b32.xlu1 %v5038_v47, %s4174_s13 }
 0x222   : > { %2209 = vst.msk [vmem:[#allocation2] sm:$0xff] %vm2208_vm10, %v2161_v27 }
 0x223   : > { %2240 = vrot.lane.b32.xlu0 %v4961_v22, %s4174_s13  ;;  %v2179_v42 = vpop.permute.xlu1 %2178 }
 0x224   : > { %2218 = vst.msk [vmem:[#allocation2 + $0x48] sm:$0xff] %vm2208_vm10, %v2179_v42 }
 0x225   : > { %v2163_v12 = vpop.permute.xlu0 %2162  ;;  %2321 = vrot.lane.b32.xlu1 %v4898_v45, %s4175_s14 }
 0x226   : > { %2210 = vst.msk [vmem:[#allocation2 + $0x8] sm:$0xff] %vm2208_vm10, %v2163_v12 }
 0x227   : > { %2305 = vrot.lane.b32.xlu0 %v4850_v25, %s4175_s14  ;;  %v2251_v16 = vpop.permute.xlu1 %2250 }
 0x228   : > { %2291 = vst.msk [vmem:[#allocation2 + $0x40] sm:$0xff] %vm2282_vm11, %v2251_v16  ;;  %v6750_v16 = vld [vmem:[#allocation12_spill] sm:$0xff] }
 0x229   : > { %v2235_v41 = vpop.permute.xlu0 %2234  ;;  %1746 = vrot.lane.b32.xlu1 %v6748_v62, %s4167_s6 }
 0x22a   : > { %2283 = vst.msk [vmem:[#allocation2] sm:$0xff] %vm2282_vm11, %v2235_v41  ;;  %v6751_v41 = vld [vmem:[#allocation41_spill] sm:$0xff] }
 0x22b   : > { %1730 = vrot.lane.b32.xlu0 %v6749_v6, %s4167_s6  ;;  %v2237_v33 = vpop.permute.xlu1 %2236 }
 0x22c   : > { %2284 = vst.msk [vmem:[#allocation2 + $0x8] sm:$0xff] %vm2282_vm11, %v2237_v33 }
 0x22d   : > { %v1741_v45 = vpop.permute.xlu0 %1740  ;;  %1818 = vrot.lane.b32.xlu1 %v4828_v50, %s4168_s7 }
 0x22e   : > { %1779 = vst.msk [vmem:[#allocation2 + $0x50] sm:$0xff] %vm1768_vm1, %v1741_v45 }
 0x22f   : > { %1802 = vrot.lane.b32.xlu0 %v6747_v46, %s4168_s7  ;;  %v2302_v25 = vpop.permute.xlu1 %2301 }
 0x230   : > { %2350 = vst.msk [vmem:[#allocation2] sm:$0xff] %vm2349_vm12, %v2302_v25 }
 0x231   : > { %v2253_v37 = vpop.permute.xlu0 %2252  ;;  %2323 = vrot.lane.b32.xlu1 %v4894_v10, %s4175_s14 }
 0x232   : > { %2292 = vst.msk [vmem:[#allocation2 + $0x48] sm:$0xff] %vm2282_vm11, %v2253_v37 }
 0x233   : > { %2307 = vrot.lane.b32.xlu0 %v4846_v24, %s4175_s14  ;;  %v1743_v53 = vpop.permute.xlu1 %1742 }
 0x234   : > { %1780 = vst.msk [vmem:[#allocation2 + $0x58] sm:$0xff] %vm1768_vm1, %v1743_v53  ;;  %v6752_v53 = vld [vmem:[#allocation51_spill] sm:$0xff] }
 0x235   : > { %v2318_v5 = vpop.permute.xlu0 %2317  ;;  %2398 = vrot.lane.b32.xlu1 %v6737_v61, %s4176_s17 }
 0x236   : > { %2358 = vst.msk [vmem:[#allocation2 + $0x40] sm:$0xff] %vm2349_vm12, %v2318_v5 }
 0x237   : > { %2382 = vrot.lane.b32.xlu0 %v6700_v44, %s4176_s17  ;;  %v1815_v14 = vpop.permute.xlu1 %1814 }
 0x238   : > { %1853 = vst.msk [vmem:[#allocation2 + $0x50] sm:$0xff] %vm6616_vm5, %v1815_v14 }
 0x239   : > { %v1799_v18 = vpop.permute.xlu0 %1798  ;;  %1820 = vrot.lane.b32.xlu1 %v4826_v8, %s4168_s7 }
 0x23a   : > { %1845 = vst.msk [vmem:[#allocation2 + $0x10] sm:$0xff] %vm6616_vm5, %v1799_v18 }
 0x23b   : > { %1804 = vrot.lane.b32.xlu0 %v6734_v54, %s4168_s7  ;;  %v2320_v49 = vpop.permute.xlu1 %2319 }
 0x23c   : > { %2359 = vst.msk [vmem:[#allocation2 + $0x48] sm:$0xff] %vm2349_vm12, %v2320_v49 }
 0x23d   : > { %v2304_v61 = vpop.permute.xlu0 %2303  ;;  %1892 = vrot.lane.b32.xlu1 %v5038_v47, %s4169_s8 }
 0x23e   : > { %2351 = vst.msk [vmem:[#allocation2 + $0x8] sm:$0xff] %vm2349_vm12, %v2304_v61 }
 0x23f   : > { %1876 = vrot.lane.b32.xlu0 %v4961_v22, %s4169_s8  ;;  %v2395_v44 = vpop.permute.xlu1 %2394 }
 0x240   : > { %2435 = vst.msk [vmem:[#allocation2 + $0x40] sm:$0xff] %vm6615_vm13, %v2395_v44 }
 0x241   : > { %v2379_v17 = vpop.permute.xlu0 %2378  ;;  %2400 = vrot.lane.b32.xlu1 %v6711_v55, %s4176_s17 }
 0x242   : > { %2427 = vst.msk [vmem:[#allocation2] sm:$0xff] %vm6615_vm13, %v2379_v17  ;;  %v1714_v17 = vrot.slane %v5392_v58, 2 }
 0x243   : > { %2384 = vrot.lane.b32.xlu0 %v6703_v31, %s4176_s17  ;;  %v1817_v13 = vpop.permute.xlu1 %1816 }
 0x244   : > { %1854 = vst.msk [vmem:[#allocation2 + $0x58] sm:$0xff] %vm6616_vm5, %v1817_v13 }
 0x245   : > { %v1801_v59 = vpop.permute.xlu0 %1800  ;;  %2472 = vrot.lane.b32.xlu1 %v6745_v40, %s4177_s18 }
 0x246   : > { %1846 = vst.msk [vmem:[#allocation2 + $0x18] sm:$0xff] %vm6616_vm5, %v1801_v59 }
 0x247   : > { %2456 = vrot.lane.b32.xlu0 %v6746_v57, %s4177_s18  ;;  %v1889_v7 = vpop.permute.xlu1 %1888 }
 0x248   : > { %1927 = vst.msk [vmem:[#allocation2 + $0x50] sm:$0xff] %vm6614_vm6, %v1889_v7 }
 0x249   : > { %v1873_v30 = vpop.permute.xlu0 %1872  ;;  %1894 = vrot.lane.b32.xlu1 %v5021_v43, %s4169_s8 }
 0x24a   : > { %1919 = vst.msk [vmem:[#allocation2 + $0x10] sm:$0xff] %vm6614_vm6, %v1873_v30 }
 0x24b   : > { %1878 = vrot.lane.b32.xlu0 %v4952_v32, %s4169_s8  ;;  %v2397_v26 = vpop.permute.xlu1 %2396 }
 0x24c   : > { %2436 = vst.msk [vmem:[#allocation2 + $0x48] sm:$0xff] %vm6615_vm13, %v2397_v26 }
 0x24d   : > { %v2381_v40 = vpop.permute.xlu0 %2380  ;;  %1959 = vrot.lane.b32.xlu1 %v4894_v10, %s4170_s9 }
 0x24e   : > { %2428 = vst.msk [vmem:[#allocation2 + $0x8] sm:$0xff] %vm6615_vm13, %v2381_v40 }
 0x24f   : > { %1943 = vrot.lane.b32.xlu0 %v4846_v24, %s4170_s9  ;;  %v2469_v57 = vpop.permute.xlu1 %2468 }
 0x250   : > { %2509 = vst.msk [vmem:[#allocation2 + $0x40] sm:$0xff] %vm6617_vm14, %v2469_v57 }
 0x251   : > { %v2453_v34 = vpop.permute.xlu0 %2452  ;;  %2474 = vrot.lane.b32.xlu1 %v6748_v62, %s4177_s18 }
 0x252   : > { %2501 = vst.msk [vmem:[#allocation2] sm:$0xff] %vm6617_vm14, %v2453_v34 }
 0x253   : > { %2458 = vrot.lane.b32.xlu0 %v6749_v6, %s4177_s18  ;;  %v1891_v11 = vpop.permute.xlu1 %1890 }
 0x254   : > { %1928 = vst.msk [vmem:[#allocation2 + $0x58] sm:$0xff] %vm6614_vm6, %v1891_v11  ;;  %v6753_v11 = vld [vmem:[#allocation40_spill] sm:$0xff] }
 0x255   : > { %v1875_v10 = vpop.permute.xlu0 %1874  ;;  %2546 = vrot.lane.b32.xlu1 %v4828_v50, %s4178_s19 }
 0x256   : > { %1920 = vst.msk [vmem:[#allocation2 + $0x18] sm:$0xff] %vm6614_vm6, %v1875_v10 }
 0x257   : > { %2530 = vrot.lane.b32.xlu0 %v6747_v46, %s4178_s19  ;;  %v1956_v24 = vpop.permute.xlu1 %1955 }
 0x258   : > { %1994 = vst.msk [vmem:[#allocation2 + $0x50] sm:$0xff] %vm1983_vm7, %v1956_v24 }
 0x259   : > { %v1940_v51 = vpop.permute.xlu0 %1939  ;;  %1961 = vrot.lane.b32.xlu1 %v5091_v0, %s4170_s9 }
 0x25a   : > { %1986 = vst.msk [vmem:[#allocation2 + $0x10] sm:$0xff] %vm1983_vm7, %v1940_v51  ;;  %v4147_v51 = vld [vmem:[%s4225_s20 + $0x1a8] sm:$0xf] }
 0x25b   : > { %1945 = vrot.lane.b32.xlu0 %v4862_v28, %s4170_s9  ;;  %v2471_v1 = vpop.permute.xlu1 %2470 }
 0x25c   : > { %2510 = vst.msk [vmem:[#allocation2 + $0x48] sm:$0xff] %vm6617_vm14, %v2471_v1  ;;  %v1788_v1 = vrot.slane %v4147_v51, 3 }
 0x25d   : > { %v2455_v50 = vpop.permute.xlu0 %2454  ;;  %2036 = vrot.lane.b32.xlu1 %v6711_v55, %s4171_s10 }
 0x25e   : > { %2502 = vst.msk [vmem:[#allocation2 + $0x8] sm:$0xff] %vm6617_vm14, %v2455_v50 }
 0x25f   : > { %2020 = vrot.lane.b32.xlu0 %v6703_v31, %s4171_s10  ;;  %v2543_v46 = vpop.permute.xlu1 %2542 }
 0x260   : > { %2583 = vst.msk [vmem:[#allocation2 + $0x40] sm:$0xff] %vm6613_vm15, %v2543_v46 }
 0x261   : > { %v2527_v3 = vpop.permute.xlu0 %2526  ;;  %2548 = vrot.lane.b32.xlu1 %v4826_v8, %s4178_s19 }
 0x262   : > { %2575 = vst.msk [vmem:[#allocation2] sm:$0xff] %vm6613_vm15, %v2527_v3 }
 0x263   : > { %2532 = vrot.lane.b32.xlu0 %v6734_v54, %s4178_s19  ;;  %v1958_v48 = vpop.permute.xlu1 %1957 }
 0x264   : > { %1995 = vst.msk [vmem:[#allocation2 + $0x58] sm:$0xff] %vm1983_vm7, %v1958_v48 }
 0x265   : > { %v1942_v55 = vpop.permute.xlu0 %1941  ;;  %2620 = vrot.lane.b32.xlu1 %v5038_v47, %s4179_s25 }
 0x266   : > { %1987 = vst.msk [vmem:[#allocation2 + $0x18] sm:$0xff] %vm1983_vm7, %v1942_v55 }
 0x267   : > { %2604 = vrot.lane.b32.xlu0 %v4961_v22, %s4179_s25  ;;  %v2033_v31 = vpop.permute.xlu1 %2032 }
 0x268   : > { %2071 = vst.msk [vmem:[#allocation2 + $0x50] sm:$0xff] %vm2060_vm8, %v2033_v31 }
 0x269   : > { %v2017_v20 = vpop.permute.xlu0 %2016  ;;  %2038 = vrot.lane.b32.xlu1 %v6738_v36, %s4171_s10 }
 0x26a   : > { %2063 = vst.msk [vmem:[#allocation2 + $0x10] sm:$0xff] %vm2060_vm8, %v2017_v20 }
 0x26b   : > { %2022 = vrot.lane.b32.xlu0 %v6702_v4, %s4171_s10  ;;  %v2545_v38 = vpop.permute.xlu1 %2544 }
 0x26c   : > { %2584 = vst.msk [vmem:[#allocation2 + $0x48] sm:$0xff] %vm6613_vm15, %v2545_v38 }
 0x26d   : > { %v2529_v47 = vpop.permute.xlu0 %2528  ;;  %2110 = vrot.lane.b32.xlu1 %v6748_v62, %s4172_s11 }
 0x26e   : > { %2576 = vst.msk [vmem:[#allocation2 + $0x8] sm:$0xff] %vm6613_vm15, %v2529_v47  ;;  %vm2681_vm15 = vcmask 203776  }
 0x26f   : > { %2094 = vrot.lane.b32.xlu0 %v6749_v6, %s4172_s11  ;;  %v2617_v22 = vpop.permute.xlu1 %2616 }
 0x270   : > { %2657 = vst.msk [vmem:[#allocation2 + $0x40] sm:$0xff] %vm2648_vm0, %v2617_v22  ;;  %v6754_v22 = vld [vmem:[#allocation15_spill] sm:$0xff] }
 0x271   : > { %v2601_v27 = vpop.permute.xlu0 %2600  ;;  %2622 = vrot.lane.b32.xlu1 %v5021_v43, %s4179_s25 }
 0x272   : > { %2649 = vst.msk [vmem:[#allocation2] sm:$0xff] %vm2648_vm0, %v2601_v27 }
 0x273   : > { %2606 = vrot.lane.b32.xlu0 %v4952_v32, %s4179_s25  ;;  %v2035_v42 = vpop.permute.xlu1 %2034 }
 0x274   : > { %2072 = vst.msk [vmem:[#allocation2 + $0x58] sm:$0xff] %vm2060_vm8, %v2035_v42 }
 0x275   : > { %v2019_v12 = vpop.permute.xlu0 %2018  ;;  %2112 = vrot.lane.b32.xlu1 %v6750_v16, %s4172_s11 }
 0x276   : > { %2064 = vst.msk [vmem:[#allocation2 + $0x18] sm:$0xff] %vm2060_vm8, %v2019_v12  ;;  %v1862_v12 = vrot.slane %v4147_v51, 4 }
 0x277   : > { %2096 = vrot.lane.b32.xlu0 %v6751_v41, %s4172_s11  ;;  %v2107_v62 = vpop.permute.xlu1 %2106  ;;  %v2673_v6 = vld [vmem:[#allocation2 + $0x40] sm:$0xff] }
 0x278   : > { %2145 = vst.msk [vmem:[#allocation2 + $0x50] sm:$0xff] %vm2134_vm9, %v2107_v62  ;;  %4086 = vmatprep.mubr.msk.bf16.mxu1 %vm2681_vm15, %v2673_v6 }
 0x279   : > { %v2091_v33 = vpop.permute.xlu0 %2090  ;;  %v2665_v45 = vld [vmem:[#allocation2] sm:$0xff]  ;;  %2184 = vrot.lane.b32.xlu1 %v4826_v8, %s4173_s12 }
 0x27a   : > { %2137 = vst.msk [vmem:[#allocation2 + $0x10] sm:$0xff] %vm2134_vm9, %v2091_v33  ;;  %4070 = vmatprep.mubr.msk.bf16.mxu0 %vm2681_vm15, %v2665_v45  ;;  %v6755_v33 = vld [vmem:[#allocation14_spill] sm:$0xff] }
 0x27b   : > { %2168 = vrot.lane.b32.xlu0 %v6734_v54, %s4173_s12  ;;  %v2619_v25 = vpop.permute.xlu1 %2618 }
 0x27c   : > { %2658 = vst.msk [vmem:[#allocation2 + $0x48] sm:$0xff] %vm2648_vm0, %v2619_v25 }
 0x27d   : > { %v2603_v37 = vpop.permute.xlu0 %2602  ;;  %2186 = vrot.lane.b32.xlu1 %v5045_v63, %s4173_s12 }
 0x27e   : > { %2650 = vst.msk [vmem:[#allocation2 + $0x8] sm:$0xff] %vm2648_vm0, %v2603_v37  ;;  %v6756_v37 = vld [vmem:[#allocation20_spill] sm:$0xff] }
 0x27f   : > { %2170 = vrot.lane.b32.xlu0 %v6752_v53, %s4173_s12  ;;  %v2109_v8 = vpop.permute.xlu1 %2108 }
 0x280   : > { %2146 = vst.msk [vmem:[#allocation2 + $0x58] sm:$0xff] %vm2134_vm9, %v2109_v8 }
 0x281   : > { %v2093_v5 = vpop.permute.xlu0 %2092  ;;  %2258 = vrot.lane.b32.xlu1 %v5021_v43, %s4174_s13  ;;  %v5848_v43 = vld [vmem:[%s4225_s20 + $0x198] sm:$0xff] }
 0x282   : > { %2138 = vst.msk [vmem:[#allocation2 + $0x18] sm:$0xff] %vm2134_vm9, %v2093_v5  ;;  %v1711_v61 = vrot.slane %v5848_v43, 2 }
 0x283   : > { %2242 = vrot.lane.b32.xlu0 %v4952_v32, %s4174_s13  ;;  %v2181_v54 = vpop.permute.xlu1 %2180  ;;  %v2674_v14 = vld [vmem:[#allocation2 + $0x48] sm:$0xff]  ;;  %v5852_v32 = vld [vmem:[%s4225_s20 + $0x1a0] sm:$0xff] }
 0x284   : > { %2219 = vst.msk [vmem:[#allocation2 + $0x50] sm:$0xff] %vm2208_vm10, %v2181_v54  ;;  %4087 = vmatmul.mubr.msk.bf16.vlgmr.msra.gmra.mrb[0].mxu1 %vm2681_vm15, %v2674_v14  ;;  %v1712_v44 = vrot.slane %v5852_v32, 2  ;;  %v1786_v24 = vrot.slane %v5852_v32, 3  ;;  %v1860_v42 = vrot.slane %v5852_v32, 4  ;;  %v5952_v32 = vld [vmem:[%s4225_s20 + $0x1b0] sm:$0xff] }
 0x285   : > { %v2165_v18 = vpop.permute.xlu0 %2164  ;;  %v2666_v49 = vld [vmem:[#allocation2 + $0x8] sm:$0xff]  ;;  %1748 = vrot.lane.b32.xlu1 %v6750_v16, %s4167_s6 }
 0x286   : > { %2211 = vst.msk [vmem:[#allocation2 + $0x10] sm:$0xff] %vm2208_vm10, %v2165_v18  ;;  %4071 = vmatmul.mubr.msk.bf16.vlgmr.msra.gmra.mrb[0].mxu0 %vm2681_vm15, %v2666_v49  ;;  %v1713_v7 = vsel %vm556_vm2, %v1711_v61, %v1712_v44  ;;  %v1715_v30 = vsel %vm556_vm2, %v1712_v44, %v1714_v17  ;;  %v1789_v48 = vsel %vm766_vm3, %v1786_v24, %v1788_v1  ;;  %v5955_v44 = vld [vmem:[%s4225_s20 + $0x1b8] sm:$0xff] }
 0x287   : > { %1732 = vrot.lane.b32.xlu0 %v6751_v41, %s4167_s6  ;;  %v2183_v13 = vpop.permute.xlu1 %2182  ;;  %v5869_v40 = vpack.c.bf16 %v1715_v30, %v1713_v7  ;;  %v1863_v25 = vsel %vm976_vm4, %v1860_v42, %v1862_v12  ;;  %v5964_v17 = vpack.c.bf16 %v5955_v44, %v5952_v32  ;;  %v5976_v30 = vld [vmem:[%s4225_s20 + $0x1c0] sm:$0xf] }
 0x288   : > { %2220 = vst.msk [vmem:[#allocation2 + $0x58] sm:$0xff] %vm2208_vm10, %v2183_v13  ;;  %v2154_v12 = vrot.slane %v5976_v30, 3 }
 0x289   : > { %v2167_v59 = vpop.permute.xlu0 %2166  ;;  %2260 = vrot.lane.b32.xlu1 %v5104_v60, %s4174_s13 }
 0x28a   : > { %2212 = vst.msk [vmem:[#allocation2 + $0x18] sm:$0xff] %vm2208_vm10, %v2167_v59 }
 0x28b   : > { %2244 = vrot.lane.b32.xlu0 %v4979_v39, %s4174_s13  ;;  %v2255_v58 = vpop.permute.xlu1 %2254 }
 0x28c   : > { %2293 = vst.msk [vmem:[#allocation2 + $0x50] sm:$0xff] %vm2282_vm11, %v2255_v58 }
 0x28d   : > { %v2239_v26 = vpop.permute.xlu0 %2238  ;;  %2325 = vrot.lane.b32.xlu1 %v5091_v0, %s4175_s14 }
 0x28e   : > { %2285 = vst.msk [vmem:[#allocation2 + $0x10] sm:$0xff] %vm2282_vm11, %v2239_v26  ;;  %v2004_v26 = vrot.slane %v5955_v44, 1 }
 0x28f   : > { %2309 = vrot.lane.b32.xlu0 %v4862_v28, %s4175_s14  ;;  %v1745_v57 = vpop.permute.xlu1 %1744  ;;  %v1785_v28 = vrot.slane %v5848_v43, 3 }
 0x290   : > { %1781 = vst.msk [vmem:[#allocation2 + $0x60] sm:$0xff] %vm1768_vm1, %v1745_v57  ;;  %v2006_v57 = vrot.slane %v5976_v30, 1 }
 0x291   : > { %v1729_v34 = vpop.permute.xlu0 %1728  ;;  %1750 = vrot.lane.b32.xlu1 %v5869_v40, %s4167_s6  ;;  %v1787_v3 = vsel %vm766_vm3, %v1785_v28, %v1786_v24 }
 0x292   : > { %1773 = vst.msk [vmem:[#allocation2 + $0x20] sm:$0xff] %vm1768_vm1, %v1729_v34  ;;  %v5900_v20 = vpack.c.bf16 %v1789_v48, %v1787_v3  ;;  %v2077_v3 = vrot.slane %v5952_v32, 2  ;;  %v2080_v48 = vrot.slane %v5976_v30, 2 }
 0x293   : > { %1734 = vrot.lane.b32.xlu0 %v6753_v11, %s4167_s6  ;;  %v2257_v0 = vpop.permute.xlu1 %2256 }
 0x294   : > { %2294 = vst.msk [vmem:[#allocation2 + $0x58] sm:$0xff] %vm2282_vm11, %v2257_v0 }
 0x295   : > { %v2241_v10 = vpop.permute.xlu0 %2240  ;;  %1822 = vrot.lane.b32.xlu1 %v5045_v63, %s4168_s7 }
 0x296   : > { %2286 = vst.msk [vmem:[#allocation2 + $0x18] sm:$0xff] %vm2282_vm11, %v2241_v10 }
 0x297   : > { %1806 = vrot.lane.b32.xlu0 %v6752_v53, %s4168_s7  ;;  %v2322_v50 = vpop.permute.xlu1 %2321 }
 0x298   : > { %2360 = vst.msk [vmem:[#allocation2 + $0x50] sm:$0xff] %vm2349_vm12, %v2322_v50 }
 0x299   : > { %v2306_v46 = vpop.permute.xlu0 %2305  ;;  %2327 = vrot.lane.b32.xlu1 %v5356_v15, %s4175_s14 }
 0x29a   : > { %2352 = vst.msk [vmem:[#allocation2 + $0x10] sm:$0xff] %vm2349_vm12, %v2306_v46 }
 0x29b   : > { %2311 = vrot.lane.b32.xlu0 %v4858_v2, %s4175_s14  ;;  %v1747_v55 = vpop.permute.xlu1 %1746 }
 0x29c   : > { %1782 = vst.msk [vmem:[#allocation2 + $0x68] sm:$0xff] %vm1768_vm1, %v1747_v55  ;;  %v6763_v55 = vld [vmem:[#allocation28_spill] sm:$0xff] }
 0x29d   : > { %v1731_v31 = vpop.permute.xlu0 %1730  ;;  %2402 = vrot.lane.b32.xlu1 %v6738_v36, %s4176_s17 }
 0x29e   : > { %1774 = vst.msk [vmem:[#allocation2 + $0x28] sm:$0xff] %vm1768_vm1, %v1731_v31 }
 0x29f   : > { %2386 = vrot.lane.b32.xlu0 %v6702_v4, %s4176_s17  ;;  %v1819_v38 = vpop.permute.xlu1 %1818  ;;  %v1859_v4 = vrot.slane %v5848_v43, 4 }
 0x2a0   : > { %1855 = vst.msk [vmem:[#allocation2 + $0x60] sm:$0xff] %vm6616_vm5, %v1819_v38 }
 0x2a1   : > { %v1803_v47 = vpop.permute.xlu0 %1802  ;;  %1824 = vrot.lane.b32.xlu1 %v5900_v20, %s4168_s7  ;;  %v1861_v45 = vsel %vm976_vm4, %v1859_v4, %v1860_v42  ;;  %v2152_v42 = vrot.slane %v5955_v44, 3 }
 0x2a2   : > { %1847 = vst.msk [vmem:[#allocation2 + $0x20] sm:$0xff] %vm6616_vm5, %v1803_v47  ;;  %v5930_v54 = vpack.c.bf16 %v1863_v25, %v1861_v45 }
 0x2a3   : > { %1808 = vrot.lane.b32.xlu0 %v6754_v22, %s4168_s7  ;;  %v2324_v36 = vpop.permute.xlu1 %2323  ;;  %s4183_s7 = smov 32  }
 0x2a4   : > { %2361 = vst.msk [vmem:[#allocation2 + $0x58] sm:$0xff] %vm2349_vm12, %v2324_v36 }
 0x2a5   : > { %v2308_v27 = vpop.permute.xlu0 %2307  ;;  %1896 = vrot.lane.b32.xlu1 %v5104_v60, %s4169_s8 }
 0x2a6   : > { %2353 = vst.msk [vmem:[#allocation2 + $0x18] sm:$0xff] %vm2349_vm12, %v2308_v27 }
 0x2a7   : > { %1880 = vrot.lane.b32.xlu0 %v4979_v39, %s4169_s8  ;;  %v2399_v62 = vpop.permute.xlu1 %2398 }
 0x2a8   : > { %2437 = vst.msk [vmem:[#allocation2 + $0x50] sm:$0xff] %vm6615_vm13, %v2399_v62 }
 0x2a9   : > { %v2383_v6 = vpop.permute.xlu0 %2382  ;;  %2404 = vrot.lane.b32.xlu1 %v6755_v33, %s4176_s17 }
 0x2aa   : > { %2429 = vst.msk [vmem:[#allocation2 + $0x10] sm:$0xff] %vm6615_vm13, %v2383_v6 }
 0x2ab   : > { %2388 = vrot.lane.b32.xlu0 %v6756_v37, %s4176_s17  ;;  %v1821_v8 = vpop.permute.xlu1 %1820 }
 0x2ac   : > { %1856 = vst.msk [vmem:[#allocation2 + $0x68] sm:$0xff] %vm6616_vm5, %v1821_v8 }
 0x2ad   : > { %v1805_v5 = vpop.permute.xlu0 %1804  ;;  %2476 = vrot.lane.b32.xlu1 %v6750_v16, %s4177_s18  ;;  %v6757_v16 = vld [vmem:[#allocation4_spill] sm:$0xff] }
 0x2ae   : > { %1848 = vst.msk [vmem:[#allocation2 + $0x28] sm:$0xff] %vm6616_vm5, %v1805_v5  ;;  %vm6761_vm5 = vcmask 1046528  }
 0x2af   : > { %2460 = vrot.lane.b32.xlu0 %v6751_v41, %s4177_s18  ;;  %v1893_v14 = vpop.permute.xlu1 %1892 }
 0x2b0   : > { %1929 = vst.msk [vmem:[#allocation2 + $0x60] sm:$0xff] %vm6614_vm6, %v1893_v14  ;;  %v2225_v14 = vrot.slane %v5952_v32, 4 }
 0x2b1   : > { %v1877_v18 = vpop.permute.xlu0 %1876  ;;  %1898 = vrot.lane.b32.xlu1 %v5930_v54, %s4169_s8 }
 0x2b2   : > { %1921 = vst.msk [vmem:[#allocation2 + $0x20] sm:$0xff] %vm6614_vm6, %v1877_v18  ;;  %v2226_v18 = vrot.slane %v5955_v44, 4 }
 0x2b3   : > { %1882 = vrot.lane.b32.xlu0 %v6757_v16, %s4169_s8  ;;  %v2401_v49 = vpop.permute.xlu1 %2400  ;;  %s4185_s8 = smov 48  }
 0x2b4   : > { %2438 = vst.msk [vmem:[#allocation2 + $0x58] sm:$0xff] %vm6615_vm13, %v2401_v49  ;;  %v2228_v49 = vrot.slane %v5976_v30, 4  ;;  %v6083_v30 = vld [vmem:[%s4225_s20 + $0x1d8] sm:$0xf] }
 0x2b5   : > { %v2385_v43 = vpop.permute.xlu0 %2384  ;;  %1963 = vrot.lane.b32.xlu1 %v5356_v15, %s4170_s9 }
 0x2b6   : > { %2430 = vst.msk [vmem:[#allocation2 + $0x18] sm:$0xff] %vm6615_vm13, %v2385_v43 }
 0x2b7   : > { %1947 = vrot.lane.b32.xlu0 %v4858_v2, %s4170_s9  ;;  %v2473_v41 = vpop.permute.xlu1 %2472 }
 0x2b8   : > { %2511 = vst.msk [vmem:[#allocation2 + $0x50] sm:$0xff] %vm6617_vm14, %v2473_v41 }
 0x2b9   : > { %v2457_v61 = vpop.permute.xlu0 %2456  ;;  %2478 = vrot.lane.b32.xlu1 %v5869_v40, %s4177_s18 }
 0x2ba   : > { %2503 = vst.msk [vmem:[#allocation2 + $0x10] sm:$0xff] %vm6617_vm14, %v2457_v61  ;;  %v2229_v61 = vsel %vm976_vm4, %v2226_v18, %v2228_v49 }
 0x2bb   : > { %2462 = vrot.lane.b32.xlu0 %v6753_v11, %s4177_s18  ;;  %v1895_v15 = vpop.permute.xlu1 %1894 }
 0x2bc   : > { %1930 = vst.msk [vmem:[#allocation2 + $0x68] sm:$0xff] %vm6614_vm6, %v1895_v15 }
 0x2bd   : > { %v1879_v2 = vpop.permute.xlu0 %1878  ;;  %2550 = vrot.lane.b32.xlu1 %v5045_v63, %s4178_s19  ;;  %v6758_v63 = vld [vmem:[#allocation25_spill] sm:$0xff] }
 0x2be   : > { %1922 = vst.msk [vmem:[#allocation2 + $0x28] sm:$0xff] %vm6614_vm6, %v1879_v2  ;;  %vm6759_vm6 = vcmask 195768  }
 0x2bf   : > { %2534 = vrot.lane.b32.xlu0 %v6752_v53, %s4178_s19  ;;  %v1960_v13 = vpop.permute.xlu1 %1959  ;;  %v2003_v53 = vrot.slane %v5952_v32, 1  ;;  %vm6760_vm13 = vmmov %vm6759_vm6 }
 0x2c0   : > { %1996 = vst.msk [vmem:[#allocation2 + $0x60] sm:$0xff] %vm1983_vm7, %v1960_v13 }
 0x2c1   : > { %v1944_v59 = vpop.permute.xlu0 %1943  ;;  %1965 = vrot.lane.b32.xlu1 %v5964_v17, %s4170_s9  ;;  %v2005_v10 = vsel %vm6761_vm5, %v2003_v53, %v2004_v26 }
 0x2c2   : > { %1988 = vst.msk [vmem:[#allocation2 + $0x20] sm:$0xff] %vm1983_vm7, %v1944_v59 }
 0x2c3   : > { %1949 = vrot.lane.b32.xlu0 %v6758_v63, %s4170_s9  ;;  %v2475_v7 = vpop.permute.xlu1 %2474  ;;  %s3899_s9 = sshll.u32 %s6802_s16, 2 }
 0x2c4   : > { %2512 = vst.msk [vmem:[#allocation2 + $0x58] sm:$0xff] %vm6617_vm14, %v2475_v7  ;;  %v6078_v7 = vld [vmem:[%s4225_s20 + $0x1d0] sm:$0xff] }
 0x2c5   : > { %v2459_v58 = vpop.permute.xlu0 %2458  ;;  %2040 = vrot.lane.b32.xlu1 %v6755_v33, %s4171_s10  ;;  %v2155_v33 = vsel %vm766_vm3, %v2152_v42, %v2154_v12 }
 0x2c6   : > { %2504 = vst.msk [vmem:[#allocation2 + $0x18] sm:$0xff] %vm6617_vm14, %v2459_v58  ;;  %vm6762_vm14 = vmmov %vm6761_vm5 }
 0x2c7   : > { %2024 = vrot.lane.b32.xlu0 %v6756_v37, %s4171_s10  ;;  %v2547_v34 = vpop.permute.xlu1 %2546  ;;  %v2007_v28 = vsel %vm6762_vm14, %v2004_v26, %v2006_v57  ;;  %vm6764_vm5 = vmmov %vm6759_vm6  ;;  %v2370_v57 = vrot.slane %v6078_v7, 1 }
 0x2c8   : > { %2585 = vst.msk [vmem:[#allocation2 + $0x50] sm:$0xff] %vm6759_vm6, %v2547_v34  ;;  %v5998_v1 = vpack.c.bf16 %v2007_v28, %v2005_v10  ;;  %vm6765_vm6 = vmmov %vm6764_vm5  ;;  %v2372_v34 = vrot.slane %v6083_v30, 1 }
 0x2c9   : > { %v2531_v0 = vpop.permute.xlu0 %2530  ;;  %2552 = vrot.lane.b32.xlu1 %v5900_v20, %s4178_s19 }
 0x2ca   : > { %2577 = vst.msk [vmem:[#allocation2 + $0x10] sm:$0xff] %vm6760_vm13, %v2531_v0  ;;  %vm6766_vm13 = vmmov %vm6762_vm14 }
 0x2cb   : > { %2536 = vrot.lane.b32.xlu0 %v6754_v22, %s4178_s19  ;;  %v1962_v24 = vpop.permute.xlu1 %1961  ;;  %vm6767_vm14 = vmmov %vm6766_vm13 }
 0x2cc   : > { %1997 = vst.msk [vmem:[#allocation2 + $0x68] sm:$0xff] %vm1983_vm7, %v1962_v24  ;;  %v2373_v28 = vsel %vm6767_vm14, %v2370_v57, %v2372_v34 }
 0x2cd   : > { %v1946_v51 = vpop.permute.xlu0 %1945  ;;  %2624 = vrot.lane.b32.xlu1 %v5104_v60, %s4179_s25  ;;  %v2078_v60 = vrot.slane %v5955_v44, 2 }
 0x2ce   : > { %1989 = vst.msk [vmem:[#allocation2 + $0x28] sm:$0xff] %vm1983_vm7, %v1946_v51 }
 0x2cf   : > { %2608 = vrot.lane.b32.xlu0 %v4979_v39, %s4179_s25  ;;  %v2037_v50 = vpop.permute.xlu1 %2036  ;;  %v2079_v38 = vsel %vm556_vm2, %v2077_v3, %v2078_v60  ;;  %v2081_v47 = vsel %vm556_vm2, %v2078_v60, %v2080_v48  ;;  %v2446_v3 = vrot.slane %v6083_v30, 2 }
 0x2d0   : > { %2073 = vst.msk [vmem:[#allocation2 + $0x60] sm:$0xff] %vm2060_vm8, %v2037_v50  ;;  %v6023_v4 = vpack.c.bf16 %v2081_v47, %v2079_v38  ;;  %v2518_v47 = vrot.slane %v6078_v7, 3 }
 0x2d1   : > { %v2021_v46 = vpop.permute.xlu0 %2020  ;;  %2042 = vrot.lane.b32.xlu1 %v5998_v1, %s4171_s10 }
 0x2d2   : > { %2065 = vst.msk [vmem:[#allocation2 + $0x20] sm:$0xff] %vm2060_vm8, %v2021_v46  ;;  %v2444_v46 = vrot.slane %v6078_v7, 2 }
 0x2d3   : > { %2026 = vrot.lane.b32.xlu0 %v6763_v55, %s4171_s10  ;;  %v2549_v31 = vpop.permute.xlu1 %2548 }
 0x2d4   : > { %2586 = vst.msk [vmem:[#allocation2 + $0x58] sm:$0xff] %vm6764_vm5, %v2549_v31  ;;  %v2447_v48 = vsel %vm556_vm2, %v2444_v46, %v2446_v3 }
 0x2d5   : > { %v2533_v39 = vpop.permute.xlu0 %2532  ;;  %2114 = vrot.lane.b32.xlu1 %v5869_v40, %s4172_s11  ;;  %v2151_v40 = vrot.slane %v5952_v32, 3 }
 0x2d6   : > { %2578 = vst.msk [vmem:[#allocation2 + $0x18] sm:$0xff] %vm6765_vm6, %v2533_v39 }
 0x2d7   : > { %2098 = vrot.lane.b32.xlu0 %v6753_v11, %s4172_s11  ;;  %v2621_v36 = vpop.permute.xlu1 %2620  ;;  %v2153_v6 = vsel %vm766_vm3, %v2151_v40, %v2152_v42 }
 0x2d8   : > { %2659 = vst.msk [vmem:[#allocation2 + $0x50] sm:$0xff] %vm2648_vm0, %v2621_v36  ;;  %v6043_v5 = vpack.c.bf16 %v2155_v33, %v2153_v6  ;;  %v2520_v36 = vrot.slane %v6083_v30, 3  ;;  %v2594_v6 = vrot.slane %v6083_v30, 4 }
 0x2d9   : > { %v2605_v27 = vpop.permute.xlu0 %2604  ;;  %2626 = vrot.lane.b32.xlu1 %v5930_v54, %s4179_s25 }
 0x2da   : > { %2651 = vst.msk [vmem:[#allocation2 + $0x10] sm:$0xff] %vm2648_vm0, %v2605_v27  ;;  %v2521_v40 = vsel %vm766_vm3, %v2518_v47, %v2520_v36 }
 0x2db   : > { %2610 = vrot.lane.b32.xlu0 %v6757_v16, %s4179_s25  ;;  %v2039_v11 = vpop.permute.xlu1 %2038 }
 0x2dc   : > { %2074 = vst.msk [vmem:[#allocation2 + $0x68] sm:$0xff] %vm2060_vm8, %v2039_v11 }
 0x2dd   : > { %v2023_v62 = vpop.permute.xlu0 %2022  ;;  %2116 = vrot.lane.b32.xlu1 %v6023_v4, %s4172_s11 }
 0x2de   : > { %2066 = vst.msk [vmem:[#allocation2 + $0x28] sm:$0xff] %vm2060_vm8, %v2023_v62  ;;  %v2592_v62 = vrot.slane %v6078_v7, 4 }
 0x2df   : > { %2100 = vrot.lane.b32.xlu0 %v6743_v9, %s4172_s11  ;;  %v2111_v45 = vpop.permute.xlu1 %2110  ;;  %v2675_v25 = vld [vmem:[#allocation2 + $0x50] sm:$0xff] }
 0x2e0   : > { %2147 = vst.msk [vmem:[#allocation2 + $0x60] sm:$0xff] %vm2134_vm9, %v2111_v45  ;;  %4090 = vmatprep.mubr.msk.bf16.mxu1 %vm2681_vm15, %v2675_v25  ;;  %v2595_v25 = vsel %vm976_vm4, %v2592_v62, %v2594_v6 }
 0x2e1   : > { %v2095_v37 = vpop.permute.xlu0 %2094  ;;  %v2667_v8 = vld [vmem:[#allocation2 + $0x10] sm:$0xff]  ;;  %2188 = vrot.lane.b32.xlu1 %v5900_v20, %s4173_s12  ;;  %v2227_v20 = vsel %vm976_vm4, %v2225_v14, %v2226_v18 }
 0x2e2   : > { %2139 = vst.msk [vmem:[#allocation2 + $0x20] sm:$0xff] %vm2134_vm9, %v2095_v37  ;;  %4074 = vmatprep.mubr.msk.bf16.mxu0 %vm2681_vm15, %v2667_v8  ;;  %v6063_v44 = vpack.c.bf16 %v2229_v61, %v2227_v20 }
 0x2e3   : > { %2172 = vrot.lane.b32.xlu0 %v6754_v22, %s4173_s12  ;;  %v2623_v43 = vpop.permute.xlu1 %2622 }
 0x2e4   : > { %2660 = vst.msk [vmem:[#allocation2 + $0x58] sm:$0xff] %vm2648_vm0, %v2623_v43 }
 0x2e5   : > { %v2607_v41 = vpop.permute.xlu0 %2606  ;;  %2190 = vrot.lane.b32.xlu1 %v6043_v5, %s4173_s12 }
 0x2e6   : > { %2652 = vst.msk [vmem:[#allocation2 + $0x18] sm:$0xff] %vm2648_vm0, %v2607_v41 }
 0x2e7   : > { %2174 = vrot.lane.b32.xlu0 %v4779_v23, %s4173_s12  ;;  %v2113_v32 = vpop.permute.xlu1 %2112 }
 0x2e8   : > { %2148 = vst.msk [vmem:[#allocation2 + $0x68] sm:$0xff] %vm2134_vm9, %v2113_v32 }
 0x2e9   : > { %v2097_v22 = vpop.permute.xlu0 %2096  ;;  %2262 = vrot.lane.b32.xlu1 %v5930_v54, %s4174_s13  ;;  %v6075_v54 = vld [vmem:[%s4225_s20 + $0x1c8] sm:$0xff] }
 0x2ea   : > { %2140 = vst.msk [vmem:[#allocation2 + $0x28] sm:$0xff] %vm2134_vm9, %v2097_v22  ;;  %v2299_v53 = vpack.c.bf16 %v6078_v7, %v6075_v54  ;;  %v2369_v26 = vrot.slane %v6075_v54, 1  ;;  %v2443_v50 = vrot.slane %v6075_v54, 2  ;;  %v2517_v38 = vrot.slane %v6075_v54, 3 }
 0x2eb   : > { %2246 = vrot.lane.b32.xlu0 %v6757_v16, %s4174_s13  ;;  %v2185_v15 = vpop.permute.xlu1 %2184  ;;  %v2676_v2 = vld [vmem:[#allocation2 + $0x58] sm:$0xff]  ;;  %v2591_v11 = vrot.slane %v6075_v54, 4 }
 0x2ec   : > { %2221 = vst.msk [vmem:[#allocation2 + $0x60] sm:$0xff] %vm2208_vm10, %v2185_v15  ;;  %4091 = vmatmul.mubr.msk.bf16.gmra.mrb[4].mxu1 %vm2681_vm15, %v2676_v2 }
 0x2ed   : > { %v2169_v13 = vpop.permute.xlu0 %2168  ;;  %v2668_v59 = vld [vmem:[#allocation2 + $0x18] sm:$0xff]  ;;  %2264 = vrot.lane.b32.xlu1 %v6063_v44, %s4174_s13  ;;  %v2593_v45 = vsel %vm976_vm4, %v2591_v11, %v2592_v62 }
 0x2ee   : > { %2213 = vst.msk [vmem:[#allocation2 + $0x20] sm:$0xff] %vm2208_vm10, %v2169_v13  ;;  %4075 = vmatmul.mubr.msk.bf16.gmra.mrb[4].mxu0 %vm2681_vm15, %v2668_v59 }
 0x2ef   : > { %2248 = vrot.lane.b32.xlu0 %v4997_v21, %s4174_s13  ;;  %v2187_v16 = vpop.permute.xlu1 %2186  ;;  %s195_s13 = scalar_lea.vmem %s6497_s4, %s3899_s9 }
 0x2f0   : > { %2222 = vst.msk [vmem:[#allocation2 + $0x68] sm:$0xff] %vm2208_vm10, %v2187_v16 }
 0x2f1   : > { %v2171_v58 = vpop.permute.xlu0 %2170  ;;  %2329 = vrot.lane.b32.xlu1 %v5964_v17, %s4175_s14  ;;  %v2371_v17 = vsel %vm6766_vm13, %v2369_v26, %v2370_v57  ;;  %vm6774_vm13 = vcmask 121968  }
 0x2f2   : > { %2214 = vst.msk [vmem:[#allocation2 + $0x28] sm:$0xff] %vm2208_vm10, %v2171_v58  ;;  %vm6775_vm14 = vmmov %vm6774_vm13 }
 0x2f3   : > { %2313 = vrot.lane.b32.xlu0 %v6758_v63, %s4175_s14  ;;  %v2259_v0 = vpop.permute.xlu1 %2258  ;;  %v2376_v63 = vpack.c.bf16 %v2373_v28, %v2371_v17 }
 0x2f4   : > { %2295 = vst.msk [vmem:[#allocation2 + $0x60] sm:$0xff] %vm2282_vm11, %v2259_v0 }
 0x2f5   : > { %v2243_v10 = vpop.permute.xlu0 %2242  ;;  %2331 = vrot.lane.b32.xlu1 %v2299_v53, %s4175_s14 }
 0x2f6   : > { %2287 = vst.msk [vmem:[#allocation2 + $0x20] sm:$0xff] %vm2282_vm11, %v2243_v10 }
 0x2f7   : > { %2315 = vrot.lane.b32.xlu0 %v4871_v29, %s4175_s14  ;;  %v1749_v24 = vpop.permute.xlu1 %1748 }
 0x2f8   : > { %1783 = vst.msk [vmem:[#allocation2 + $0x70] sm:$0xff] %vm1768_vm1, %v1749_v24 }
 0x2f9   : > { %v1733_v51 = vpop.permute.xlu0 %1732  ;;  %2406 = vrot.lane.b32.xlu1 %v5998_v1, %s4176_s17  ;;  %v2445_v1 = vsel %vm556_vm2, %v2443_v50, %v2444_v46  ;;  %vm6768_vm2 = vcmask 113768  }
 0x2fa   : > { %1775 = vst.msk [vmem:[#allocation2 + $0x30] sm:$0xff] %vm1768_vm1, %v1733_v51  ;;  %vm6769_vm5 = vmmov %vm6768_vm2 }
 0x2fb   : > { %2390 = vrot.lane.b32.xlu0 %v6763_v55, %s4176_s17  ;;  %v2261_v29 = vpop.permute.xlu1 %2260  ;;  %v2450_v55 = vpack.c.bf16 %v2447_v48, %v2445_v1  ;;  %vm6772_vm6 = vmmov %vm6768_vm2  ;;  %v6206_v48 = vld [vmem:[%s6496_s3] ss:$0 sm:$0xff] }
 0x2fc   : > { %2296 = vst.msk [vmem:[#allocation2 + $0x68] sm:$0xff] %vm2282_vm11, %v2261_v29  ;;  %vm6773_vm4 = vmmov %vm6768_vm2 }
 0x2fd   : > { %v2245_v60 = vpop.permute.xlu0 %2244  ;;  %2408 = vrot.lane.b32.xlu1 %v2376_v63, %s4176_s17 }
 0x2fe   : > { %2288 = vst.msk [vmem:[#allocation2 + $0x28] sm:$0xff] %vm2282_vm11, %v2245_v60  ;;  %v6199_v60 = vld [vmem:[%s6495_s2] ss:$0 sm:$0xff] }
 0x2ff   : > { %2392 = vrot.lane.b32.xlu0 %v6707_v56, %s4176_s17  ;;  %v2326_v31 = vpop.permute.xlu1 %2325 }
 0x300   : > { %2362 = vst.msk [vmem:[#allocation2 + $0x60] sm:$0xff] %vm2349_vm12, %v2326_v31 }
 0x301   : > { %v2310_v39 = vpop.permute.xlu0 %2309  ;;  %2480 = vrot.lane.b32.xlu1 %v6023_v4, %s4177_s18  ;;  %v2519_v4 = vsel %vm766_vm3, %v2517_v38, %v2518_v47  ;;  %vm6770_vm3 = vcmask 179368  }
 0x302   : > { %2354 = vst.msk [vmem:[#allocation2 + $0x20] sm:$0xff] %vm2349_vm12, %v2310_v39 }
 0x303   : > { %2464 = vrot.lane.b32.xlu0 %v6743_v9, %s4177_s18  ;;  %v1751_v56 = vpop.permute.xlu1 %1750  ;;  %v2524_v9 = vpack.c.bf16 %v2521_v40, %v2519_v4 }
 0x304   : > { %1784 = vst.msk [vmem:[#allocation2 + $0x78] sm:$0xff] %vm1768_vm1, %v1751_v56 }
 0x305   : > { %v1735_v27 = vpop.permute.xlu0 %1734  ;;  %2482 = vrot.lane.b32.xlu1 %v2450_v55, %s4177_s18 }
 0x306   : > { %1776 = vst.msk [vmem:[#allocation2 + $0x38] sm:$0xff] %vm1768_vm1, %v1735_v27  ;;  %vm6771_vm1 = vmmov %vm6770_vm3 }
 0x307   : > { %2466 = vrot.lane.b32.xlu0 %v6723_v19, %s4177_s18  ;;  %v1823_v42 = vpop.permute.xlu1 %1822 }
 0x308   : > { %1857 = vst.msk [vmem:[#allocation2 + $0x70] sm:$0xff] %vm6768_vm2, %v1823_v42  ;;  %vm6776_vm2 = vmmov %vm6771_vm1 }
 0x309   : > { %v1807_v12 = vpop.permute.xlu0 %1806  ;;  %2554 = vrot.lane.b32.xlu1 %v6043_v5, %s4178_s19 }
 0x30a   : > { %1849 = vst.msk [vmem:[#allocation2 + $0x30] sm:$0xff] %vm6769_vm5, %v1807_v12  ;;  %vm6777_vm5 = vmmov %vm6771_vm1 }
 0x30b   : > { %2538 = vrot.lane.b32.xlu0 %v4779_v23, %s4178_s19  ;;  %v2328_v19 = vpop.permute.xlu1 %2327  ;;  %v2598_v23 = vpack.c.bf16 %v2595_v25, %v2593_v45 }
 0x30c   : > { %2363 = vst.msk [vmem:[#allocation2 + $0x68] sm:$0xff] %vm2349_vm12, %v2328_v19 }
 0x30d   : > { %v2312_v33 = vpop.permute.xlu0 %2311  ;;  %2556 = vrot.lane.b32.xlu1 %v2524_v9, %s4178_s19 }
 0x30e   : > { %2355 = vst.msk [vmem:[#allocation2 + $0x28] sm:$0xff] %vm2349_vm12, %v2312_v33 }
 0x30f   : > { %2540 = vrot.lane.b32.xlu0 %v4759_v52, %s4178_s19  ;;  %v2403_v37 = vpop.permute.xlu1 %2402 }
 0x310   : > { %2439 = vst.msk [vmem:[#allocation2 + $0x60] sm:$0xff] %vm6770_vm3, %v2403_v37  ;;  %vm6778_vm3 = vcmask 187568  }
 0x311   : > { %v2387_v8 = vpop.permute.xlu0 %2386  ;;  %2628 = vrot.lane.b32.xlu1 %v6063_v44, %s4179_s25 }
 0x312   : > { %2431 = vst.msk [vmem:[#allocation2 + $0x20] sm:$0xff] %vm6771_vm1, %v2387_v8  ;;  %vm6779_vm1 = vmmov %vm6778_vm3 }
 0x313   : > { %2612 = vrot.lane.b32.xlu0 %v4997_v21, %s4179_s25  ;;  %v1825_v5 = vpop.permute.xlu1 %1824 }
 0x314   : > { %1858 = vst.msk [vmem:[#allocation2 + $0x78] sm:$0xff] %vm6772_vm6, %v1825_v5  ;;  %vm6780_vm6 = vmmov %vm6774_vm13 }
 0x315   : > { %v1809_v14 = vpop.permute.xlu0 %1808  ;;  %2630 = vrot.lane.b32.xlu1 %v2598_v23, %s4179_s25 }
 0x316   : > { %1850 = vst.msk [vmem:[#allocation2 + $0x38] sm:$0xff] %vm6773_vm4, %v1809_v14  ;;  %vm6781_vm4 = vmmov %vm6780_vm6 }
 0x317   : > { %2614 = vrot.lane.b32.xlu0 %v4988_v35, %s4179_s25  ;;  %v1897_v52 = vpop.permute.xlu1 %1896 }
 0x318   : > { %1931 = vst.msk [vmem:[#allocation2 + $0x70] sm:$0xff] %vm6774_vm13, %v1897_v52  ;;  %vm6782_vm13 = vmmov %vm6779_vm1 }
 0x319   : > { %v1881_v18 = vpop.permute.xlu0 %1880 }
 0x31a   : > { %1923 = vst.msk [vmem:[#allocation2 + $0x30] sm:$0xff] %vm6775_vm14, %v1881_v18  ;;  %vm6783_vm14 = vmmov %vm6779_vm1 }
 0x31b   : > { %v2405_v49 = vpop.permute.xlu1 %2404 }
 0x31c   : > { %2440 = vst.msk [vmem:[#allocation2 + $0x68] sm:$0xff] %vm6776_vm2, %v2405_v49  ;;  %vm6784_vm2 = vcmask 195768  }
 0x31d   : > { %v2389_v21 = vpop.permute.xlu0 %2388 }
 0x31e   : > { %2432 = vst.msk [vmem:[#allocation2 + $0x28] sm:$0xff] %vm6777_vm5, %v2389_v21  ;;  %vm6785_vm5 = vmmov %vm6784_vm2 }
 0x31f   : > { %v2477_v43 = vpop.permute.xlu1 %2476 }
 0x320   : > { %2513 = vst.msk [vmem:[#allocation2 + $0x60] sm:$0xff] %vm6778_vm3, %v2477_v43  ;;  %vm6786_vm3 = vmmov %vm6784_vm2 }
 0x321   : > { %v2461_v41 = vpop.permute.xlu0 %2460 }
 0x322   : > { %2505 = vst.msk [vmem:[#allocation2 + $0x20] sm:$0xff] %vm6779_vm1, %v2461_v41  ;;  %vm6787_vm1 = vmmov %vm6784_vm2 }
 0x323   : > { %v1899_v20 = vpop.permute.xlu1 %1898 }
 0x324   : > { %1932 = vst.msk [vmem:[#allocation2 + $0x78] sm:$0xff] %vm6780_vm6, %v1899_v20 }
 0x325   : > { %v1883_v35 = vpop.permute.xlu0 %1882 }
 0x326   : > { %1924 = vst.msk [vmem:[#allocation2 + $0x38] sm:$0xff] %vm6781_vm4, %v1883_v35 }
 0x327   : > { %v1964_v61 = vpop.permute.xlu1 %1963 }
 0x328   : > { %1998 = vst.msk [vmem:[#allocation2 + $0x70] sm:$0xff] %vm1983_vm7, %v1964_v61 }
 0x329   : > { %v1948_v32 = vpop.permute.xlu0 %1947 }
 0x32a   : > { %1990 = vst.msk [vmem:[#allocation2 + $0x30] sm:$0xff] %vm1983_vm7, %v1948_v32 }
 0x32b   : > { %v2479_v22 = vpop.permute.xlu1 %2478 }
 0x32c   : > { %2514 = vst.msk [vmem:[#allocation2 + $0x68] sm:$0xff] %vm6782_vm13, %v2479_v22 }
 0x32d   : > { %v2463_v44 = vpop.permute.xlu0 %2462 }
 0x32e   : > { %2506 = vst.msk [vmem:[#allocation2 + $0x28] sm:$0xff] %vm6783_vm14, %v2463_v44  ;;  %vm6797_vm14 = vmmov %vm6787_vm1 }
 0x32f   : > { %v2551_v15 = vpop.permute.xlu1 %2550 }
 0x330   : > { %2587 = vst.msk [vmem:[#allocation2 + $0x60] sm:$0xff] %vm6784_vm2, %v2551_v15  ;;  %vm6798_vm2 = vmmov %vm6787_vm1 }
 0x331   : > { %v2535_v2 = vpop.permute.xlu0 %2534 }
 0x332   : > { %2579 = vst.msk [vmem:[#allocation2 + $0x20] sm:$0xff] %vm6785_vm5, %v2535_v2  ;;  %vm6799_vm5 = vmmov %vm6787_vm1 }
 0x333   : > { %v1966_v13 = vpop.permute.xlu1 %1965 }
 0x334   : > { %1999 = vst.msk [vmem:[#allocation2 + $0x78] sm:$0xff] %vm1983_vm7, %v1966_v13 }
 0x335   : > { %v1950_v59 = vpop.permute.xlu0 %1949 }
 0x336   : > { %1991 = vst.msk [vmem:[#allocation2 + $0x38] sm:$0xff] %vm1983_vm7, %v1950_v59  ;;  %vm6788_vm7 = vcmask 179368  }
 0x337   : > { %v2041_v54 = vpop.permute.xlu1 %2040 }
 0x338   : > { %2075 = vst.msk [vmem:[#allocation2 + $0x70] sm:$0xff] %vm2060_vm8, %v2041_v54 }
 0x339   : > { %v2025_v7 = vpop.permute.xlu0 %2024 }
 0x33a   : > { %2067 = vst.msk [vmem:[#allocation2 + $0x30] sm:$0xff] %vm2060_vm8, %v2025_v7 }
 0x33b   : > { %v2553_v16 = vpop.permute.xlu1 %2552 }
 0x33c   : > { %2588 = vst.msk [vmem:[#allocation2 + $0x68] sm:$0xff] %vm6786_vm3, %v2553_v16  ;;  %vm3746_vm3 = vcmask 1042434  }
 0x33d   : > { %v2537_v30 = vpop.permute.xlu0 %2536 }
 0x33e   : > { %2580 = vst.msk [vmem:[#allocation2 + $0x28] sm:$0xff] %vm6787_vm1, %v2537_v30 }
 0x33f   : > { %v2625_v58 = vpop.permute.xlu1 %2624 }
 0x340   : > { %2661 = vst.msk [vmem:[#allocation2 + $0x60] sm:$0xff] %vm2648_vm0, %v2625_v58 }
 0x341   : > { %v2609_v53 = vpop.permute.xlu0 %2608 }
 0x342   : > { %2653 = vst.msk [vmem:[#allocation2 + $0x20] sm:$0xff] %vm2648_vm0, %v2609_v53 }
 0x343   : > { %v2043_v26 = vpop.permute.xlu1 %2042 }
 0x344   : > { %2076 = vst.msk [vmem:[#allocation2 + $0x78] sm:$0xff] %vm2060_vm8, %v2043_v26 }
 0x345   : > { %v2027_v57 = vpop.permute.xlu0 %2026 }
 0x346   : > { %2068 = vst.msk [vmem:[#allocation2 + $0x38] sm:$0xff] %vm2060_vm8, %v2027_v57  ;;  %vm6789_vm8 = vmmov %vm6788_vm7 }
 0x347   : > { %v2115_v34 = vpop.permute.xlu1 %2114  ;;  %v2677_v0 = vld [vmem:[#allocation2 + $0x60] sm:$0xff] }
 0x348   : > { %2149 = vst.msk [vmem:[#allocation2 + $0x70] sm:$0xff] %vm2134_vm9, %v2115_v34  ;;  %4094 = vmatprep.mubr.msk.bf16.mxu1 %vm2681_vm15, %v2677_v0 }
 0x349   : > { %v2099_v10 = vpop.permute.xlu0 %2098  ;;  %v2669_v17 = vld [vmem:[#allocation2 + $0x20] sm:$0xff] }
 0x34a   : > { %2141 = vst.msk [vmem:[#allocation2 + $0x30] sm:$0xff] %vm2134_vm9, %v2099_v10  ;;  %4078 = vmatprep.mubr.msk.bf16.mxu0 %vm2681_vm15, %v2669_v17 }
 0x34b   : > { %v2627_v28 = vpop.permute.xlu1 %2626 }
 0x34c   : > { %2662 = vst.msk [vmem:[#allocation2 + $0x68] sm:$0xff] %vm2648_vm0, %v2627_v28 }
 0x34d   : > { %v2611_v24 = vpop.permute.xlu0 %2610 }
 0x34e   : > { %2654 = vst.msk [vmem:[#allocation2 + $0x28] sm:$0xff] %vm2648_vm0, %v2611_v24 }
 0x34f   : > { %v2117_v51 = vpop.permute.xlu1 %2116 }
 0x350   : > { %2150 = vst.msk [vmem:[#allocation2 + $0x78] sm:$0xff] %vm2134_vm9, %v2117_v51 }
 0x351   : > { %v2101_v63 = vpop.permute.xlu0 %2100 }
 0x352   : > { %2142 = vst.msk [vmem:[#allocation2 + $0x38] sm:$0xff] %vm2134_vm9, %v2101_v63  ;;  %vm6790_vm9 = vmmov %vm6788_vm7 }
 0x353   : > { %v2189_v50 = vpop.permute.xlu1 %2188  ;;  %v2678_v46 = vld [vmem:[#allocation2 + $0x68] sm:$0xff] }
 0x354   : > { %2223 = vst.msk [vmem:[#allocation2 + $0x70] sm:$0xff] %vm2208_vm10, %v2189_v50  ;;  %4095 = vmatmul.mubr.msk.bf16.gmra.mrb[8].mxu1 %vm2681_vm15, %v2678_v46 }
 0x355   : > { %v2173_v3 = vpop.permute.xlu0 %2172  ;;  %v2670_v29 = vld [vmem:[#allocation2 + $0x28] sm:$0xff] }
 0x356   : > { %2215 = vst.msk [vmem:[#allocation2 + $0x30] sm:$0xff] %vm2208_vm10, %v2173_v3  ;;  %4079 = vmatmul.mubr.msk.bf16.gmra.mrb[8].mxu0 %vm2681_vm15, %v2670_v29 }
 0x357   : > { %v2191_v1 = vpop.permute.xlu1 %2190  ;;  %v4088_v31 = vpop.f32.mrb[0].mxu1 }
 0x358   : > { %2224 = vst.msk [vmem:[#allocation2 + $0x78] sm:$0xff] %vm2208_vm10, %v2191_v1  ;;  %v2920_v39 = vmul.f32 %v4088_v31, %v6199_v60  ;;  %v2833_v55 = vpop.f32.mrb[1].mxu1 }
 0x359   : > { %v2175_v38 = vpop.permute.xlu0 %2174  ;;  %v4072_v47 = vpop.f32.mrb[0].mxu0  ;;  %v2918_v36 = vmul.f32 %v6199_v60, %v2833_v55 }
 0x35a   : > { %v2958_v56 = vadd.f32 %v6206_v48, %v2920_v39  ;;  %2216 = vst.msk [vmem:[#allocation2 + $0x38] sm:$0xff] %vm2208_vm10, %v2175_v38  ;;  %v2904_v27 = vmul.f32 %v4072_v47, %v6199_v60  ;;  %v2769_v4 = vpop.f32.mrb[1].mxu0  ;;  %v4089_v40 = vpop.f32.mrb[2].mxu1  ;;  %vm6791_vm10 = vmmov %vm6788_vm7 }
 0x35b   : > { %v2902_v42 = vmul.f32 %v6199_v60, %v2769_v4  ;;  %v2956_v12 = vadd.f32 %v6206_v48, %v2918_v36  ;;  %v4073_v9 = vpop.f32.mrb[2].mxu0  ;;  %v2921_v11 = vmul.f32 %v4089_v40, %v6199_v60  ;;  %v2836_v62 = vpop.f32.mrb[3].mxu1 }
 0x35c   : > { %v2990_v6 = vmax.f32 %v2958_v56, 0.0  ;;  %v2942_v19 = vadd.f32 %v6206_v48, %v2904_v27  ;;  %v2905_v33 = vmul.f32 %v4073_v9, %v6199_v60  ;;  %v2772_v45 = vpop.f32.mrb[3].mxu0  ;;  %v6220_v25 = vmul.f32 %v6199_v60, %v2836_v62  ;;  %v2263_v37 = vpop.permute.xlu1 %2262 }
 0x35d   : > { %v2940_v8 = vadd.f32 %v6206_v48, %v2902_v42  ;;  %v2988_v23 = vmax.f32 %v2956_v12, 0.0  ;;  %v2959_v5 = vadd.f32 %v6206_v48, %v2921_v11  ;;  %v6225_v14 = vmul.f32 %v6199_v60, %v2772_v45  ;;  %2297 = vst.msk [vmem:[#allocation2 + $0x70] sm:$0xff] %vm2282_vm11, %v2263_v37  ;;  %v2247_v52 = vpop.permute.xlu0 %2246 }
 0x35e   : > { %v3054_v18 = vcombine.high %v2990_v6, %v2990_v6  ;;  %v3954_v49 = vrot.slane %v2990_v6, 9  ;;  %v2974_v21 = vmax.f32 %v2942_v19, 0.0  ;;  %v2943_v43 = vadd.f32 %v6206_v48, %v2905_v33  ;;  %2289 = vst.msk [vmem:[#allocation2 + $0x30] sm:$0xff] %vm2282_vm11, %v2247_v52 }
 0x35f   : > { %v2972_v41 = vmax.f32 %v2940_v8, 0.0  ;;  %v3052_v20 = vcombine.high %v2988_v23, %v2988_v23  ;;  %v3950_v35 = vrot.slane %v2988_v23, 9  ;;  %v2991_v61 = vmax.f32 %v2959_v5, 0.0 }
 0x360   : > { %v3955_v32 = vrot.slane %v3054_v18, 9  ;;  %v3328_v22 = vmax.f32 %v2990_v6, %v3954_v49  ;;  %v3038_v44 = vcombine.high %v2974_v21, %v2974_v21  ;;  %v3922_v15 = vrot.slane %v2974_v21, 9  ;;  %v2265_v2 = vpop.permute.xlu1 %2264 }
 0x361   : > { %v3036_v13 = vcombine.high %v2972_v41, %v2972_v41  ;;  %v3918_v59 = vrot.slane %v2972_v41, 9  ;;  %v3951_v54 = vrot.slane %v3052_v20, 9  ;;  %v3324_v7 = vmax.f32 %v2988_v23, %v3950_v35  ;;  %2298 = vst.msk [vmem:[#allocation2 + $0x78] sm:$0xff] %vm2282_vm11, %v2265_v2  ;;  %v2249_v16 = vpop.permute.xlu0 %2248 }
 0x362   : > { %v3329_v30 = vmax.f32 %v3054_v18, %v3955_v32  ;;  %v4018_v58 = vrot.slane %v3328_v22, 10  ;;  %v3923_v53 = vrot.slane %v3038_v44, 9  ;;  %v3296_v26 = vmax.f32 %v2974_v21, %v3922_v15  ;;  %2290 = vst.msk [vmem:[#allocation2 + $0x38] sm:$0xff] %vm2282_vm11, %v2249_v16  ;;  %vm6792_vm11 = vmmov %vm6782_vm13 }
 0x363   : > { %v3919_v57 = vrot.slane %v3036_v13, 9  ;;  %v3292_v34 = vmax.f32 %v2972_v41, %v3918_v59  ;;  %v3325_v0 = vmax.f32 %v3052_v20, %v3951_v54  ;;  %v4014_v10 = vrot.slane %v3324_v7, 10  ;;  %vm6794_vm6 = vmmov %vm6792_vm11 }
 0x364   : > { %v4019_v17 = vrot.slane %v3329_v30, 10  ;;  %v6232_v28 = vmax.f32 %v3328_v22, %v4018_v58  ;;  %v3297_v24 = vmax.f32 %v3038_v44, %v3923_v53  ;;  %v3986_v51 = vrot.slane %v3296_v26, 10  ;;  %v2330_v63 = vpop.permute.xlu1 %2329  ;;  %vm6795_vm4 = vmmov %vm6794_vm6 }
 0x365   : > { %v3293_v50 = vmax.f32 %v3036_v13, %v3919_v57  ;;  %v3982_v46 = vrot.slane %v3292_v34, 10  ;;  %v4015_v3 = vrot.slane %v3325_v0, 10  ;;  %v6234_v29 = vmax.f32 %v3324_v7, %v4014_v10  ;;  %2364 = vst.msk [vmem:[#allocation2 + $0x70] sm:$0xff] %vm2349_vm12, %v2330_v63  ;;  %v2314_v1 = vpop.permute.xlu0 %2313  ;;  %vm6796_vm13 = vmmov %vm6787_vm1 }
 0x366   : > { %v6237_v31 = vmax.f32 %v3329_v30, %v4019_v17  ;;  %v3987_v39 = vrot.slane %v3297_v24, 10  ;;  %v6239_v55 = vmax.f32 %v3296_v26, %v3986_v51  ;;  %v2975_v38 = vmax.f32 %v2943_v43, 0.0  ;;  %2356 = vst.msk [vmem:[#allocation2 + $0x30] sm:$0xff] %vm2349_vm12, %v2314_v1 }
 0x367   : > { %v3983_v47 = vrot.slane %v3293_v50, 10  ;;  %v6242_v36 = vmax.f32 %v3292_v34, %v3982_v46  ;;  %v6244_v56 = vmax.f32 %v3325_v0, %v4015_v3  ;;  %v3684_v27 = vmax.f32 %v6234_v29, %v6232_v28 }
 0x368   : > { %v6248_v4 = vmax.f32 %v3297_v24, %v3987_v39  ;;  %v3039_v40 = vcombine.high %v2975_v38, %v2975_v38  ;;  %v3924_v42 = vrot.slane %v2975_v38, 9  ;;  %v3055_v12 = vcombine.high %v2991_v61, %v2991_v61  ;;  %v2332_v9 = vpop.permute.xlu1 %2331 }
 0x369   : > { %v6250_v11 = vmax.f32 %v3293_v50, %v3983_v47  ;;  %v3676_v62 = vmax.f32 %v6242_v36, %v6239_v55  ;;  %v3685_v6 = vmax.f32 %v6244_v56, %v6237_v31  ;;  %v3956_v19 = vrot.slane %v2991_v61, 9  ;;  %2365 = vst.msk [vmem:[#allocation2 + $0x78] sm:$0xff] %vm2349_vm12, %v2332_v9  ;;  %v2316_v33 = vpop.permute.xlu0 %2315 }
 0x36a   : > { %v3925_v45 = vrot.slane %v3039_v40, 9  ;;  %v3298_v37 = vmax.f32 %v2975_v38, %v3924_v42  ;;  %v3957_v8 = vrot.slane %v3055_v12, 9  ;;  %v2941_v23 = vadd.f32 %v6206_v48, %v6225_v14  ;;  %2357 = vst.msk [vmem:[#allocation2 + $0x38] sm:$0xff] %vm2349_vm12, %v2316_v33  ;;  %vm6793_vm12 = vmmov %vm6792_vm11 }
 0x36b   : > { %v3677_v5 = vmax.f32 %v6250_v11, %v6248_v4  ;;  %v3330_v52 = vmax.f32 %v2991_v61, %v3956_v19  ;;  %v2957_v18 = vadd.f32 %v6206_v48, %v6220_v25  ;;  %vm3748_vm1 = vcmask 1046534  }
 0x36c   : > { %v3299_v49 = vmax.f32 %v3039_v40, %v3925_v45  ;;  %v2973_v21 = vmax.f32 %v2941_v23, 0.0  ;;  %v2407_v43 = vpop.permute.xlu1 %2406  ;;  %v3331_v41 = vmax.f32 %v3055_v12, %v3957_v8  ;;  %v3988_v32 = vrot.slane %v3298_v37, 10 }
 0x36d   : > { %v2989_v20 = vmax.f32 %v2957_v18, 0.0  ;;  %2441 = vst.msk [vmem:[#allocation2 + $0x70] sm:$0xff] %vm6788_vm7, %v2407_v43  ;;  %v2391_v35 = vpop.permute.xlu0 %2390  ;;  %v4020_v14 = vrot.slane %v3330_v52, 10  ;;  %vm3751_vm7 = vcmask 1043459  }
 0x36e   : > { %v3037_v22 = vcombine.high %v2973_v21, %v2973_v21  ;;  %2433 = vst.msk [vmem:[#allocation2 + $0x30] sm:$0xff] %vm6789_vm8, %v2391_v35  ;;  %v3920_v44 = vrot.slane %v2973_v21, 9  ;;  %v3989_v61 = vrot.slane %v3299_v49, 10  ;;  %v4021_v25 = vrot.slane %v3331_v41, 10 }
 0x36f   : > { %v3053_v15 = vcombine.high %v2989_v20, %v2989_v20  ;;  %v3952_v2 = vrot.slane %v2989_v20, 9  ;;  %v6267_v58 = vmax.f32 %v3298_v37, %v3988_v32  ;;  %v6270_v26 = vmax.f32 %v3330_v52, %v4020_v14 }
 0x370   : > { %v3921_v13 = vrot.slane %v3037_v22, 9  ;;  %v2409_v59 = vpop.permute.xlu1 %2408  ;;  %v3294_v54 = vmax.f32 %v2973_v21, %v3920_v44  ;;  %v6272_v10 = vmax.f32 %v3299_v49, %v3989_v61  ;;  %v6274_v51 = vmax.f32 %v3331_v41, %v4021_v25 }
 0x371   : > { %v3953_v7 = vrot.slane %v3053_v15, 9  ;;  %v3326_v16 = vmax.f32 %v2989_v20, %v3952_v2  ;;  %2442 = vst.msk [vmem:[#allocation2 + $0x78] sm:$0xff] %vm6790_vm9, %v2409_v59  ;;  %v2393_v30 = vpop.permute.xlu0 %2392  ;;  %vm3753_vm8 = vcmask 1047559   ;;  %vm3832_vm9 = vcmask 130048  }
 0x372   : > { %v3295_v53 = vmax.f32 %v3037_v22, %v3921_v13  ;;  %2434 = vst.msk [vmem:[#allocation2 + $0x38] sm:$0xff] %vm6791_vm10, %v2393_v30  ;;  %v3984_v57 = vrot.slane %v3294_v54, 10  ;;  %vm3834_vm10 = vcmask 261120  }
 0x373   : > { %v3327_v34 = vmax.f32 %v3053_v15, %v3953_v7  ;;  %v4016_v0 = vrot.slane %v3326_v16, 10 }
 0x374   : > { %v3985_v17 = vrot.slane %v3295_v53, 10  ;;  %v2481_v24 = vpop.permute.xlu1 %2480  ;;  %v6276_v63 = vmax.f32 %v3294_v54, %v3984_v57 }
 0x375   : > { %v4017_v50 = vrot.slane %v3327_v34, 10  ;;  %v6278_v46 = vmax.f32 %v3326_v16, %v4016_v0  ;;  %2515 = vst.msk [vmem:[#allocation2 + $0x70] sm:$0xff] %vm6792_vm11, %v2481_v24  ;;  %v2465_v3 = vpop.permute.xlu0 %2464  ;;  %vm3836_vm11 = vcmask 392192  }
 0x376   : > { %v6281_v1 = vmax.f32 %v3295_v53, %v3985_v17  ;;  %2507 = vst.msk [vmem:[#allocation2 + $0x30] sm:$0xff] %vm6793_vm12, %v2465_v3  ;;  %v3678_v39 = vmax.f32 %v6276_v63, %v6267_v58  ;;  %vm3838_vm12 = vcmask 519168  }
 0x377   : > { %v6286_v38 = vmax.f32 %v3327_v34, %v4017_v50  ;;  %v3686_v47 = vmax.f32 %v6278_v46, %v6270_v26 }
 0x378   : > { %v3679_v40 = vmax.f32 %v6281_v1, %v6272_v10  ;;  %v2483_v42 = vpop.permute.xlu1 %2482 }
 0x379   : > { %v3687_v12 = vmax.f32 %v6286_v38, %v6274_v51  ;;  %2516 = vst.msk [vmem:[#allocation2 + $0x78] sm:$0xff] %vm6794_vm6, %v2483_v42  ;;  %v2467_v9 = vpop.permute.xlu0 %2466 }
 0x37a   : > { %2508 = vst.msk [vmem:[#allocation2 + $0x38] sm:$0xff] %vm6795_vm4, %v2467_v9 }
 0x37c   : > { %v2555_v19 = vpop.permute.xlu1 %2554 }
 0x37d   : > { %2589 = vst.msk [vmem:[#allocation2 + $0x70] sm:$0xff] %vm6796_vm13, %v2555_v19  ;;  %v2539_v33 = vpop.permute.xlu0 %2538 }
 0x37e   : > { %2581 = vst.msk [vmem:[#allocation2 + $0x30] sm:$0xff] %vm6797_vm14, %v2539_v33 }
 0x380   : > { %v2557_v45 = vpop.permute.xlu1 %2556 }
 0x381   : > { %2590 = vst.msk [vmem:[#allocation2 + $0x78] sm:$0xff] %vm6798_vm2, %v2557_v45  ;;  %v2541_v37 = vpop.permute.xlu0 %2540 }
 0x382   : > { %2582 = vst.msk [vmem:[#allocation2 + $0x38] sm:$0xff] %vm6799_vm5, %v2541_v37 }
 0x384   : > { %v2629_v8 = vpop.permute.xlu1 %2628 }
 0x385   : > { %2663 = vst.msk [vmem:[#allocation2 + $0x70] sm:$0xff] %vm2648_vm0, %v2629_v8  ;;  %v2613_v23 = vpop.permute.xlu0 %2612 }
 0x386   : > { %2655 = vst.msk [vmem:[#allocation2 + $0x30] sm:$0xff] %vm2648_vm0, %v2613_v23 }
 0x388   : > { %v2631_v52 = vpop.permute.xlu1 %2630 }
 0x389   : > { %2664 = vst.msk [vmem:[#allocation2 + $0x78] sm:$0xff] %vm2648_vm0, %v2631_v52  ;;  %v2615_v18 = vpop.permute.xlu0 %2614 }
 0x38a   : > { %2656 = vst.msk [vmem:[#allocation2 + $0x38] sm:$0xff] %vm2648_vm0, %v2615_v18  ;;  %vm3741_vm0 = vcmask 1041409  }
 0x38c   : > { %v2679_v49 = vld [vmem:[#allocation2 + $0x70] sm:$0xff] }
 0x38d   : > { %v2671_v21 = vld [vmem:[#allocation2 + $0x30] sm:$0xff]  ;;  %4098 = vmatprep.mubr.msk.bf16.mxu1 %vm2681_vm15, %v2679_v49 }
 0x38e   : > { %4082 = vmatprep.mubr.msk.bf16.mxu0 %vm2681_vm15, %v2671_v21 }
 0x390   : > { %v2680_v43 = vld [vmem:[#allocation2 + $0x78] sm:$0xff] }
 0x391   : > { %v2672_v41 = vld [vmem:[#allocation2 + $0x38] sm:$0xff]  ;;  %4099 = vmatmul.mubr.msk.bf16.gmra.mrb[12].mxu1 %vm2681_vm15, %v2680_v43 }
 0x392   : > { %4083 = vmatmul.mubr.msk.bf16.gmra.mrb[12].mxu0 %vm2681_vm15, %v2672_v41  ;;  %vm3743_vm15 = vcmask 1045509  }
 0x3bf   : > { %v4092_v20 = vpop.f32.mrb[4].mxu1 }
 0x3c0   : > { %v2924_v35 = vmul.f32 %v4092_v20, %v6199_v60  ;;  %v2849_v32 = vpop.f32.mrb[5].mxu1 }
 0x3c1   : > { %v4076_v22 = vpop.f32.mrb[4].mxu0  ;;  %v2922_v14 = vmul.f32 %v6199_v60, %v2849_v32  ;;  %v4093_v44 = vpop.f32.mrb[6].mxu1 }
 0x3c2   : > { %v2908_v15 = vmul.f32 %v4076_v22, %v6199_v60  ;;  %v2962_v2 = vadd.f32 %v6206_v48, %v2924_v35  ;;  %v2785_v61 = vpop.f32.mrb[5].mxu0  ;;  %v2925_v13 = vmul.f32 %v4093_v44, %v6199_v60  ;;  %v2852_v59 = vpop.f32.mrb[7].mxu1 }
 0x3c3   : > { %v2906_v25 = vmul.f32 %v6199_v60, %v2785_v61  ;;  %v2960_v54 = vadd.f32 %v6206_v48, %v2922_v14  ;;  %v4077_v7 = vpop.f32.mrb[6].mxu0  ;;  %v2923_v16 = vmul.f32 %v6199_v60, %v2852_v59 }
 0x3c4   : > { %v2946_v30 = vadd.f32 %v6206_v48, %v2908_v15  ;;  %v2994_v53 = vmax.f32 %v2962_v2, 0.0  ;;  %v2909_v57 = vmul.f32 %v4077_v7, %v6199_v60  ;;  %v2963_v34 = vadd.f32 %v6206_v48, %v2925_v13  ;;  %v2788_v0 = vpop.f32.mrb[7].mxu0 }
 0x3c5   : > { %v2944_v17 = vadd.f32 %v6206_v48, %v2906_v25  ;;  %v2992_v24 = vmax.f32 %v2960_v54, 0.0  ;;  %v2907_v50 = vmul.f32 %v6199_v60, %v2788_v0  ;;  %v2961_v3 = vadd.f32 %v6206_v48, %v2923_v16 }
 0x3c6   : > { %v2978_v42 = vmax.f32 %v2946_v30, 0.0  ;;  %v3058_v9 = vcombine.high %v2994_v53, %v2994_v53  ;;  %v3962_v19 = vrot.slane %v2994_v53, 9  ;;  %v2947_v33 = vadd.f32 %v6206_v48, %v2909_v57 }
 0x3c7   : > { %v2976_v45 = vmax.f32 %v2944_v17, 0.0  ;;  %v3056_v37 = vcombine.high %v2992_v24, %v2992_v24  ;;  %v3958_v8 = vrot.slane %v2992_v24, 9  ;;  %v2995_v23 = vmax.f32 %v2963_v34, 0.0 }
 0x3c8   : > { %v3042_v52 = vcombine.high %v2978_v42, %v2978_v42  ;;  %v3930_v18 = vrot.slane %v2978_v42, 9  ;;  %v3963_v49 = vrot.slane %v3058_v9, 9  ;;  %v3336_v21 = vmax.f32 %v2994_v53, %v3962_v19 }
 0x3c9   : > { %v3040_v43 = vcombine.high %v2976_v45, %v2976_v45  ;;  %v3926_v41 = vrot.slane %v2976_v45, 9  ;;  %v3959_v20 = vrot.slane %v3056_v37, 9  ;;  %v3332_v35 = vmax.f32 %v2992_v24, %v3958_v8 }
 0x3ca   : > { %v3931_v32 = vrot.slane %v3042_v52, 9  ;;  %v3304_v22 = vmax.f32 %v2978_v42, %v3930_v18  ;;  %v3337_v14 = vmax.f32 %v3058_v9, %v3963_v49  ;;  %v4026_v44 = vrot.slane %v3336_v21, 10 }
 0x3cb   : > { %v3927_v15 = vrot.slane %v3040_v43, 9  ;;  %v3300_v2 = vmax.f32 %v2976_v45, %v3926_v41  ;;  %v3333_v61 = vmax.f32 %v3056_v37, %v3959_v20  ;;  %v4022_v13 = vrot.slane %v3332_v35, 10 }
 0x3cc   : > { %v3305_v59 = vmax.f32 %v3042_v52, %v3931_v32  ;;  %v3994_v25 = vrot.slane %v3304_v22, 10  ;;  %v4027_v54 = vrot.slane %v3337_v14, 10  ;;  %v3656_v7 = vmax.f32 %v3336_v21, %v4026_v44 }
 0x3cd   : > { %v3301_v16 = vmax.f32 %v3040_v43, %v3927_v15  ;;  %v3990_v30 = vrot.slane %v3300_v2, 10  ;;  %v4023_v57 = vrot.slane %v3333_v61, 10  ;;  %v3652_v53 = vmax.f32 %v3332_v35, %v4022_v13 }
 0x3ce   : > { %v3995_v34 = vrot.slane %v3305_v59, 10  ;;  %v3624_v0 = vmax.f32 %v3304_v22, %v3994_v25  ;;  %v3657_v17 = vmax.f32 %v3337_v14, %v4027_v54  ;;  %v2979_v24 = vmax.f32 %v2947_v33, 0.0 }
 0x3cf   : > { %v3991_v19 = vrot.slane %v3301_v16, 10  ;;  %v3620_v42 = vmax.f32 %v3300_v2, %v3990_v30  ;;  %v3653_v9 = vmax.f32 %v3333_v61, %v4023_v57  ;;  %v3700_v8 = vmax.f32 %v3652_v53, %v3656_v7 }
 0x3d0   : > { %v3625_v18 = vmax.f32 %v3305_v59, %v3995_v34  ;;  %v3043_v45 = vcombine.high %v2979_v24, %v2979_v24  ;;  %v3932_v37 = vrot.slane %v2979_v24, 9  ;;  %v3059_v49 = vcombine.high %v2995_v23, %v2995_v23 }
 0x3d1   : > { %v3621_v52 = vmax.f32 %v3301_v16, %v3991_v19  ;;  %v3692_v41 = vmax.f32 %v3620_v42, %v3624_v0  ;;  %v3701_v20 = vmax.f32 %v3653_v9, %v3657_v17  ;;  %v3716_v21 = vmax.f32 %v3684_v27, %v3700_v8 }
 0x3d2   : > { %v3933_v43 = vrot.slane %v3043_v45, 9  ;;  %v3306_v35 = vmax.f32 %v2979_v24, %v3932_v37  ;;  %v3964_v32 = vrot.slane %v2995_v23, 9  ;;  %v3965_v22 = vrot.slane %v3059_v49, 9 }
 0x3d3   : > { %v3693_v33 = vmax.f32 %v3621_v52, %v3625_v18  ;;  %v3708_v14 = vmax.f32 %v3676_v62, %v3692_v41  ;;  %v3717_v44 = vmax.f32 %v3685_v6, %v3701_v20  ;;  %v2945_v15 = vadd.f32 %v6206_v48, %v2907_v50 }
 0x3d4   : > { %v3307_v2 = vmax.f32 %v3043_v45, %v3933_v43  ;;  %v2993_v61 = vmax.f32 %v2961_v3, 0.0  ;;  %v3996_v13 = vrot.slane %v3306_v35, 10  ;;  %v3338_v59 = vmax.f32 %v2995_v23, %v3964_v32 }
 0x3d5   : > { %v3709_v28 = vmax.f32 %v3677_v5, %v3693_v33  ;;  %v3764_v29 = vrot.slane %v3717_v44, 7  ;;  %v2977_v27 = vmax.f32 %v2945_v15, 0.0  ;;  %v3339_v55 = vmax.f32 %v3059_v49, %v3965_v22 }
 0x3d6   : > { %v3997_v50 = vrot.slane %v3307_v2, 10  ;;  %v3057_v4 = vcombine.high %v2993_v61, %v2993_v61  ;;  %v3626_v5 = vmax.f32 %v3306_v35, %v3996_v13  ;;  %v4028_v3 = vrot.slane %v3338_v59, 10 }
 0x3d7   : > { %v3740_v36 = vrot.slane %v3709_v28, 7  ;;  %v3765_v62 = vsel %vm3741_vm0, %v3764_v29, %v3716_v21  ;;  %v3041_v31 = vcombine.high %v2977_v27, %v2977_v27  ;;  %v3928_v56 = vrot.slane %v2977_v27, 9 }
 0x3d8   : > { %v3766_v6 = vsel %vm3743_vm15, %v3764_v29, %v3765_v62  ;;  %v3960_v16 = vrot.slane %v2993_v61, 9  ;;  %v4029_v23 = vrot.slane %v3339_v55, 10  ;;  %v3961_v53 = vrot.slane %v3057_v4, 9 }
 0x3d9   : > { %v3742_v25 = vsel %vm3741_vm0, %v3740_v36, %v3708_v14  ;;  %v3929_v54 = vrot.slane %v3041_v31, 9  ;;  %v3302_v7 = vmax.f32 %v2977_v27, %v3928_v56  ;;  %v3627_v0 = vmax.f32 %v3307_v2, %v3997_v50 }
 0x3da   : > { %v3744_v11 = vsel %vm3743_vm15, %v3740_v36, %v3742_v25  ;;  %v3334_v34 = vmax.f32 %v2993_v61, %v3960_v16  ;;  %v3335_v19 = vmax.f32 %v3057_v4, %v3961_v53  ;;  %v3658_v42 = vmax.f32 %v3338_v59, %v4028_v3 }
 0x3db   : > { %v3303_v30 = vmax.f32 %v3041_v31, %v3929_v54  ;;  %v3992_v57 = vrot.slane %v3302_v7, 10  ;;  %v3659_v8 = vmax.f32 %v3339_v55, %v4029_v23 }
 0x3dc   : > { %v4024_v9 = vrot.slane %v3334_v34, 10  ;;  %v4025_v37 = vrot.slane %v3335_v19, 10 }
 0x3dd   : > { %v3993_v17 = vrot.slane %v3303_v30, 10  ;;  %v3622_v24 = vmax.f32 %v3302_v7, %v3992_v57 }
 0x3de   : > { %v3654_v49 = vmax.f32 %v3334_v34, %v4024_v9  ;;  %v3655_v20 = vmax.f32 %v3335_v19, %v4025_v37 }
 0x3df   : > { %v3623_v18 = vmax.f32 %v3303_v30, %v3993_v17  ;;  %v3694_v45 = vmax.f32 %v3622_v24, %v3626_v5 }
 0x3e0   : > { %v3702_v21 = vmax.f32 %v3654_v49, %v3658_v42  ;;  %v3703_v32 = vmax.f32 %v3655_v20, %v3659_v8 }
 0x3e1   : > { %v3695_v52 = vmax.f32 %v3623_v18, %v3627_v0  ;;  %v3710_v41 = vmax.f32 %v3678_v39, %v3694_v45 }
 0x3e2   : > { %v3718_v22 = vmax.f32 %v3686_v47, %v3702_v21  ;;  %v3719_v58 = vmax.f32 %v3687_v12, %v3703_v32 }
 0x3e3   : > { %v3711_v43 = vmax.f32 %v3679_v40, %v3695_v52  ;;  %v3745_v35 = vrot.slane %v3710_v41, 6 }
 0x3e4   : > { %v3767_v10 = vrot.slane %v3718_v22, 6  ;;  %v3770_v40 = vrot.slane %v3719_v58, 5 }
 0x3e5   : > { %v3747_v33 = vsel %vm3746_vm3, %v3745_v35, %v3744_v11  ;;  %v3750_v14 = vrot.slane %v3711_v43, 5 }
 0x3e6   : > { %v3749_v63 = vsel %vm3748_vm1, %v3745_v35, %v3747_v33  ;;  %v3768_v39 = vsel %vm3746_vm3, %v3767_v10, %v3766_v6 }
 0x3e7   : > { %v3752_v1 = vsel %vm3751_vm7, %v3750_v14, %v3749_v63  ;;  %v3769_v46 = vsel %vm3748_vm1, %v3767_v10, %v3768_v39 }
 0x3e8   : > { %v6357_v26 = vsel %vm3753_vm8, %v3750_v14, %v3752_v1  ;;  %v3771_v47 = vsel %vm3751_vm7, %v3770_v40, %v3769_v46 }
 0x3e9   : > { %v6362_v44 = vsel %vm3753_vm8, %v3770_v40, %v3771_v47 }
 0x427   : > { %v4096_v38 = vpop.f32.mrb[8].mxu1 }
 0x428   : > { %v2928_v12 = vmul.f32 %v4096_v38, %v6199_v60  ;;  %v2865_v15 = vpop.f32.mrb[9].mxu1 }
 0x429   : > { %v4080_v2 = vpop.f32.mrb[8].mxu0  ;;  %v2926_v28 = vmul.f32 %v6199_v60, %v2865_v15  ;;  %v4097_v29 = vpop.f32.mrb[10].mxu1 }
 0x42a   : > { %v2912_v27 = vmul.f32 %v4080_v2, %v6199_v60  ;;  %v2966_v61 = vadd.f32 %v6206_v48, %v2928_v12  ;;  %v2801_v13 = vpop.f32.mrb[9].mxu0  ;;  %v2929_v59 = vmul.f32 %v4097_v29, %v6199_v60  ;;  %v2868_v55 = vpop.f32.mrb[11].mxu1 }
 0x42b   : > { %v2910_v36 = vmul.f32 %v6199_v60, %v2801_v13  ;;  %v2964_v62 = vadd.f32 %v6206_v48, %v2926_v28  ;;  %v4081_v31 = vpop.f32.mrb[10].mxu0  ;;  %v2927_v56 = vmul.f32 %v6199_v60, %v2868_v55 }
 0x42c   : > { %v2950_v6 = vadd.f32 %v6206_v48, %v2912_v27  ;;  %v2998_v50 = vmax.f32 %v2966_v61, 0.0  ;;  %v2913_v25 = vmul.f32 %v4081_v31, %v6199_v60  ;;  %v2967_v54 = vadd.f32 %v6206_v48, %v2929_v59  ;;  %v2804_v7 = vpop.f32.mrb[11].mxu0 }
 0x42d   : > { %v2948_v4 = vadd.f32 %v6206_v48, %v2910_v36  ;;  %v2996_v11 = vmax.f32 %v2964_v62, 0.0  ;;  %v2911_v5 = vmul.f32 %v6199_v60, %v2804_v7  ;;  %v2965_v3 = vadd.f32 %v6206_v48, %v2927_v56 }
 0x42e   : > { %v2982_v16 = vmax.f32 %v2950_v6, 0.0  ;;  %v3062_v23 = vcombine.high %v2998_v50, %v2998_v50  ;;  %v3970_v30 = vrot.slane %v2998_v50, 9  ;;  %v2951_v57 = vadd.f32 %v6206_v48, %v2913_v25 }
 0x42f   : > { %v2980_v53 = vmax.f32 %v2948_v4, 0.0  ;;  %v3060_v34 = vcombine.high %v2996_v11, %v2996_v11  ;;  %v3966_v0 = vrot.slane %v2996_v11, 9  ;;  %v2999_v17 = vmax.f32 %v2967_v54, 0.0 }
 0x430   : > { %v3046_v24 = vcombine.high %v2982_v16, %v2982_v16  ;;  %v3938_v19 = vrot.slane %v2982_v16, 9  ;;  %v3971_v42 = vrot.slane %v3062_v23, 9  ;;  %v3344_v9 = vmax.f32 %v2998_v50, %v3970_v30 }
 0x431   : > { %v3044_v8 = vcombine.high %v2980_v53, %v2980_v53  ;;  %v3934_v18 = vrot.slane %v2980_v53, 9  ;;  %v3967_v45 = vrot.slane %v3060_v34, 9  ;;  %v3340_v37 = vmax.f32 %v2996_v11, %v3966_v0 }
 0x432   : > { %v3939_v49 = vrot.slane %v3046_v24, 9  ;;  %v3312_v52 = vmax.f32 %v2982_v16, %v3938_v19  ;;  %v3345_v41 = vmax.f32 %v3062_v23, %v3971_v42  ;;  %v4034_v20 = vrot.slane %v3344_v9, 10 }
 0x433   : > { %v3935_v21 = vrot.slane %v3044_v8, 9  ;;  %v3308_v43 = vmax.f32 %v2980_v53, %v3934_v18  ;;  %v3341_v35 = vmax.f32 %v3060_v34, %v3967_v45  ;;  %v4030_v32 = vrot.slane %v3340_v37, 10 }
 0x434   : > { %v3313_v22 = vmax.f32 %v3046_v24, %v3939_v49  ;;  %v4002_v33 = vrot.slane %v3312_v52, 10  ;;  %v4035_v14 = vrot.slane %v3345_v41, 10  ;;  %v6381_v58 = vmax.f32 %v3344_v9, %v4034_v20 }
 0x435   : > { %v3309_v63 = vmax.f32 %v3044_v8, %v3935_v21  ;;  %v3998_v10 = vrot.slane %v3308_v43, 10  ;;  %v4031_v1 = vrot.slane %v3341_v35, 10  ;;  %v6383_v39 = vmax.f32 %v3340_v37, %v4030_v32 }
 0x436   : > { %v4003_v40 = vrot.slane %v3313_v22, 10  ;;  %v6385_v46 = vmax.f32 %v3312_v52, %v4002_v33  ;;  %v6387_v47 = vmax.f32 %v3345_v41, %v4035_v14  ;;  %v2983_v38 = vmax.f32 %v2951_v57, 0.0 }
 0x437   : > { %v3999_v12 = vrot.slane %v3309_v63, 10  ;;  %v6389_v15 = vmax.f32 %v3308_v43, %v3998_v10  ;;  %v6391_v2 = vmax.f32 %v3341_v35, %v4031_v1  ;;  %v3688_v28 = vmax.f32 %v6383_v39, %v6381_v58 }
 0x438   : > { %v6395_v29 = vmax.f32 %v3313_v22, %v4003_v40  ;;  %v3047_v27 = vcombine.high %v2983_v38, %v2983_v38  ;;  %v3940_v61 = vrot.slane %v2983_v38, 9  ;;  %v3063_v13 = vcombine.high %v2999_v17, %v2999_v17 }
 0x439   : > { %v6397_v59 = vmax.f32 %v3309_v63, %v3999_v12  ;;  %v3680_v55 = vmax.f32 %v6389_v15, %v6385_v46  ;;  %v3689_v36 = vmax.f32 %v6391_v2, %v6387_v47  ;;  %v3972_v62 = vrot.slane %v2999_v17, 9 }
 0x43a   : > { %v3941_v31 = vrot.slane %v3047_v27, 9  ;;  %v3314_v56 = vmax.f32 %v2983_v38, %v3940_v61  ;;  %v3973_v6 = vrot.slane %v3063_v13, 9  ;;  %v2949_v50 = vadd.f32 %v6206_v48, %v2911_v5 }
 0x43b   : > { %v3681_v25 = vmax.f32 %v6397_v59, %v6395_v29  ;;  %v3346_v54 = vmax.f32 %v2999_v17, %v3972_v62  ;;  %v2997_v7 = vmax.f32 %v2965_v3, 0.0 }
 0x43c   : > { %v3315_v4 = vmax.f32 %v3047_v27, %v3941_v31  ;;  %v3347_v11 = vmax.f32 %v3063_v13, %v3973_v6  ;;  %v2981_v16 = vmax.f32 %v2949_v50, 0.0  ;;  %v4004_v53 = vrot.slane %v3314_v56, 10 }
 0x43d   : > { %v4036_v23 = vrot.slane %v3346_v54, 10  ;;  %v3061_v30 = vcombine.high %v2997_v7, %v2997_v7  ;;  %v3968_v57 = vrot.slane %v2997_v7, 9 }
 0x43e   : > { %v3045_v34 = vcombine.high %v2981_v16, %v2981_v16  ;;  %v4037_v0 = vrot.slane %v3347_v11, 10  ;;  %v3936_v24 = vrot.slane %v2981_v16, 9  ;;  %v4005_v9 = vrot.slane %v3315_v4, 10 }
 0x43f   : > { %v3969_v19 = vrot.slane %v3061_v30, 9  ;;  %v3342_v42 = vmax.f32 %v2997_v7, %v3968_v57  ;;  %v6406_v5 = vmax.f32 %v3346_v54, %v4036_v23  ;;  %v6408_v3 = vmax.f32 %v3314_v56, %v4004_v53 }
 0x440   : > { %v3937_v8 = vrot.slane %v3045_v34, 9  ;;  %v3310_v18 = vmax.f32 %v2981_v16, %v3936_v24  ;;  %v6410_v49 = vmax.f32 %v3347_v11, %v4037_v0  ;;  %v6414_v21 = vmax.f32 %v3315_v4, %v4005_v9 }
 0x441   : > { %v3343_v45 = vmax.f32 %v3061_v30, %v3969_v19  ;;  %v4032_v17 = vrot.slane %v3342_v42, 10 }
 0x442   : > { %v3311_v37 = vmax.f32 %v3045_v34, %v3937_v8  ;;  %v4000_v52 = vrot.slane %v3310_v18, 10 }
 0x443   : > { %v4033_v41 = vrot.slane %v3343_v45, 10  ;;  %v6412_v20 = vmax.f32 %v3342_v42, %v4032_v17 }
 0x444   : > { %v4001_v43 = vrot.slane %v3311_v37, 10  ;;  %v6416_v35 = vmax.f32 %v3310_v18, %v4000_v52 }
 0x445   : > { %v6418_v32 = vmax.f32 %v3343_v45, %v4033_v41  ;;  %v3690_v22 = vmax.f32 %v6412_v20, %v6406_v5 }
 0x446   : > { %v6422_v33 = vmax.f32 %v3311_v37, %v4001_v43  ;;  %v3682_v14 = vmax.f32 %v6416_v35, %v6408_v3 }
 0x447   : > { %v3691_v63 = vmax.f32 %v6418_v32, %v6410_v49 }
 0x448   : > { %v3683_v10 = vmax.f32 %v6422_v33, %v6414_v21 }
 0x464   : > { %v4100_v1 = vpop.f32.mrb[12].mxu1 }
 0x465   : > { %v4084_v40 = vpop.f32.mrb[12].mxu0  ;;  %v2932_v38 = vmul.f32 %v4100_v1, %v6199_v60  ;;  %v2881_v12 = vpop.f32.mrb[13].mxu1 }
 0x466   : > { %v2916_v27 = vmul.f32 %v4084_v40, %v6199_v60  ;;  %v2817_v61 = vpop.f32.mrb[13].mxu0  ;;  %v2930_v13 = vmul.f32 %v6199_v60, %v2881_v12  ;;  %v4101_v62 = vpop.f32.mrb[14].mxu1 }
 0x467   : > { %v2970_v31 = vadd.f32 %v6206_v48, %v2932_v38  ;;  %v2914_v56 = vmul.f32 %v6199_v60, %v2817_v61  ;;  %v4085_v6 = vpop.f32.mrb[14].mxu0  ;;  %v2933_v50 = vmul.f32 %v4101_v62, %v6199_v60  ;;  %v2884_v54 = vpop.f32.mrb[15].mxu1 }
 0x468   : > { %v2954_v7 = vadd.f32 %v6206_v48, %v2916_v27  ;;  %v2968_v4 = vadd.f32 %v6206_v48, %v2930_v13  ;;  %v2917_v11 = vmul.f32 %v4085_v6, %v6199_v60  ;;  %v2820_v16 = vpop.f32.mrb[15].mxu0  ;;  %v2931_v23 = vmul.f32 %v6199_v60, %v2884_v54 }
 0x469   : > { %v3002_v30 = vmax.f32 %v2970_v31, 0.0  ;;  %v2952_v57 = vadd.f32 %v6206_v48, %v2914_v56  ;;  %v2971_v53 = vadd.f32 %v6206_v48, %v2933_v50  ;;  %v2915_v34 = vmul.f32 %v6199_v60, %v2820_v16 }
 0x46a   : > { %v2986_v0 = vmax.f32 %v2954_v7, 0.0  ;;  %v3000_v24 = vmax.f32 %v2968_v4, 0.0  ;;  %v2955_v19 = vadd.f32 %v6206_v48, %v2917_v11  ;;  %v2969_v42 = vadd.f32 %v6206_v48, %v2931_v23 }
 0x46b   : > { %v3066_v9 = vcombine.high %v3002_v30, %v3002_v30  ;;  %v3978_v8 = vrot.slane %v3002_v30, 9  ;;  %v2984_v18 = vmax.f32 %v2952_v57, 0.0  ;;  %v3003_v45 = vmax.f32 %v2971_v53, 0.0 }
 0x46c   : > { %v3050_v17 = vcombine.high %v2986_v0, %v2986_v0  ;;  %v3946_v37 = vrot.slane %v2986_v0, 9  ;;  %v3064_v52 = vcombine.high %v3000_v24, %v3000_v24  ;;  %v3974_v41 = vrot.slane %v3000_v24, 9 }
 0x46d   : > { %v3979_v43 = vrot.slane %v3066_v9, 9  ;;  %v3352_v1 = vmax.f32 %v3002_v30, %v3978_v8  ;;  %v3048_v40 = vcombine.high %v2984_v18, %v2984_v18  ;;  %v3942_v38 = vrot.slane %v2984_v18, 9 }
 0x46e   : > { %v3947_v12 = vrot.slane %v3050_v17, 9  ;;  %v3320_v60 = vmax.f32 %v2986_v0, %v3946_v37  ;;  %v3975_v27 = vrot.slane %v3064_v52, 9  ;;  %v3348_v61 = vmax.f32 %v3000_v24, %v3974_v41 }
 0x46f   : > { %v3353_v13 = vmax.f32 %v3066_v9, %v3979_v43  ;;  %v4042_v62 = vrot.slane %v3352_v1, 10  ;;  %v3943_v31 = vrot.slane %v3048_v40, 9  ;;  %v3316_v56 = vmax.f32 %v2984_v18, %v3942_v38 }
 0x470   : > { %v3321_v6 = vmax.f32 %v3050_v17, %v3947_v12  ;;  %v4010_v50 = vrot.slane %v3320_v60, 10  ;;  %v3349_v54 = vmax.f32 %v3064_v52, %v3975_v27  ;;  %v4038_v7 = vrot.slane %v3348_v61, 10 }
 0x471   : > { %v4043_v4 = vrot.slane %v3353_v13, 10  ;;  %v3672_v11 = vmax.f32 %v3352_v1, %v4042_v62  ;;  %v3317_v16 = vmax.f32 %v3048_v40, %v3943_v31  ;;  %v4006_v23 = vrot.slane %v3316_v56, 10 }
 0x472   : > { %v4011_v57 = vrot.slane %v3321_v6, 10  ;;  %v3640_v30 = vmax.f32 %v3320_v60, %v4010_v50  ;;  %v4039_v53 = vrot.slane %v3349_v54, 10  ;;  %v3668_v8 = vmax.f32 %v3348_v61, %v4038_v7 }
 0x473   : > { %v3673_v51 = vmax.f32 %v3353_v13, %v4043_v4  ;;  %v4007_v0 = vrot.slane %v3317_v16, 10  ;;  %v3636_v37 = vmax.f32 %v3316_v56, %v4006_v23  ;;  %v2987_v24 = vmax.f32 %v2955_v19, 0.0 }
 0x474   : > { %v3641_v9 = vmax.f32 %v3321_v6, %v4011_v57  ;;  %v3669_v41 = vmax.f32 %v3349_v54, %v4039_v53  ;;  %v3704_v43 = vmax.f32 %v3668_v8, %v3672_v11  ;;  %v3067_v18 = vcombine.high %v3003_v45, %v3003_v45 }
 0x475   : > { %v3637_v17 = vmax.f32 %v3317_v16, %v4007_v0  ;;  %v3696_v38 = vmax.f32 %v3636_v37, %v3640_v30  ;;  %v3051_v52 = vcombine.high %v2987_v24, %v2987_v24  ;;  %v3948_v12 = vrot.slane %v2987_v24, 9 }
 0x476   : > { %v3705_v27 = vmax.f32 %v3669_v41, %v3673_v51  ;;  %v3720_v1 = vmax.f32 %v3688_v28, %v3704_v43  ;;  %v3980_v40 = vrot.slane %v3003_v45, 9  ;;  %v3981_v60 = vrot.slane %v3067_v18, 9 }
 0x477   : > { %v3697_v61 = vmax.f32 %v3637_v17, %v3641_v9  ;;  %v3712_v19 = vmax.f32 %v3680_v55, %v3696_v38  ;;  %v3949_v13 = vrot.slane %v3051_v52, 9  ;;  %v3322_v62 = vmax.f32 %v2987_v24, %v3948_v12 }
 0x478   : > { %v3721_v31 = vmax.f32 %v3689_v36, %v3705_v27  ;;  %v3354_v56 = vmax.f32 %v3003_v45, %v3980_v40  ;;  %v3355_v6 = vmax.f32 %v3067_v18, %v3981_v60  ;;  %v2953_v51 = vadd.f32 %v6206_v48, %v2915_v34 }
 0x479   : > { %v3713_v58 = vmax.f32 %v3681_v25, %v3697_v61  ;;  %v3323_v39 = vmax.f32 %v3051_v52, %v3949_v13  ;;  %v3001_v28 = vmax.f32 %v2969_v42, 0.0  ;;  %v4012_v15 = vrot.slane %v3322_v62, 10 }
 0x47a   : > { %v3773_v50 = vrot.slane %v3721_v31, 7  ;;  %v2985_v54 = vmax.f32 %v2953_v51, 0.0  ;;  %v4044_v4 = vrot.slane %v3354_v56, 10  ;;  %v4045_v47 = vrot.slane %v3355_v6, 10 }
 0x47b   : > { %v3755_v46 = vrot.slane %v3713_v58, 7  ;;  %v3065_v55 = vcombine.high %v3001_v28, %v3001_v28  ;;  %v4013_v34 = vrot.slane %v3323_v39, 10  ;;  %v3976_v25 = vrot.slane %v3001_v28, 9 }
 0x47c   : > { %v3774_v7 = vsel %vm3741_vm0, %v3773_v50, %v3720_v1  ;;  %v3049_v2 = vcombine.high %v2985_v54, %v2985_v54  ;;  %v3944_v45 = vrot.slane %v2985_v54, 9  ;;  %v3642_v30 = vmax.f32 %v3322_v62, %v4012_v15 }
 0x47d   : > { %v3756_v36 = vsel %vm3741_vm0, %v3755_v46, %v3712_v19  ;;  %v3775_v48 = vsel %vm3743_vm15, %v3773_v50, %v3774_v7  ;;  %v3977_v42 = vrot.slane %v3065_v55, 9  ;;  %v3350_v23 = vmax.f32 %v3001_v28, %v3976_v25 }
 0x47e   : > { %v3757_v29 = vsel %vm3743_vm15, %v3755_v46, %v3756_v36  ;;  %v3945_v59 = vrot.slane %v3049_v2, 9  ;;  %v3318_v11 = vmax.f32 %v2985_v54, %v3944_v45  ;;  %v3674_v53 = vmax.f32 %v3354_v56, %v4044_v4 }
 0x47f   : > { %v3351_v57 = vmax.f32 %v3065_v55, %v3977_v42  ;;  %v3675_v8 = vmax.f32 %v3355_v6, %v4045_v47  ;;  %v3643_v37 = vmax.f32 %v3323_v39, %v4013_v34  ;;  %v4040_v9 = vrot.slane %v3350_v23, 10 }
 0x480   : > { %v3319_v16 = vmax.f32 %v3049_v2, %v3945_v59  ;;  %v4008_v0 = vrot.slane %v3318_v11, 10  ;;  %v4181_v12 = vmov 1983009808   ;;  %v3790_v61 = vlaneseq }
 0x481   : > { %v4041_v41 = vrot.slane %v3351_v57, 10  ;;  %v3670_v17 = vmax.f32 %v3350_v23, %v4040_v9  ;;  %v3788_v27 = vunpack.c.l.s4 %v4181_v12  ;;  %v4182_v39 = vmov 1934713408  }
 0x482   : > { %v4009_v24 = vrot.slane %v3319_v16, 10  ;;  %v3638_v43 = vmax.f32 %v3318_v11, %v4008_v0  ;;  %v3791_v58 = vshrl.u32 %v3790_v61, 7  ;;  %v3805_v28 = vunpack.c.l.s4 %v4182_v39 }
 0x483   : > { %v3671_v38 = vmax.f32 %v3351_v57, %v4041_v41  ;;  %v3706_v40 = vmax.f32 %v3670_v17, %v3674_v53  ;;  %v3789_v51 = vunpack.c.0.s8 %v3788_v27  ;;  %v6800_v54 = vcombine.low %v6357_v26, %v6362_v44 }
 0x484   : > { %v3639_v18 = vmax.f32 %v3319_v16, %v4009_v24  ;;  %v3698_v52 = vmax.f32 %v3638_v43, %v3642_v30  ;;  %v4184_v36 = vmov 0.0  }
 0x485   : > { %v3707_v60 = vmax.f32 %v3671_v38, %v3675_v8  ;;  %v3722_v62 = vmax.f32 %v3690_v22, %v3706_v40  ;;  %v3792_v22 = vsub.s32 %v3789_v51, %v3791_v58 }
 0x486   : > { %v3699_v1 = vmax.f32 %v3639_v18, %v3643_v37  ;;  %v3714_v19 = vmax.f32 %v3682_v14, %v3698_v52 }
 0x487   : > { %v3723_v31 = vmax.f32 %v3691_v63, %v3707_v60  ;;  %v3776_v6 = vrot.slane %v3722_v62, 6  ;;  %v3806_v63 = vunpack.c.0.s8 %v3805_v28  ;;  %v3793_v46 = vrot.slane %v6800_v54, %v3792_v22 }
 0x488   : > { %v3715_v13 = vmax.f32 %v3683_v10, %v3699_v1  ;;  %v3758_v56 = vrot.slane %v3714_v19, 6 }
 0x489   : > { %v3777_v33 = vsel %vm3746_vm3, %v3776_v6, %v3775_v48  ;;  %v3779_v14 = vrot.slane %v3723_v31, 5  ;;  %v3809_v55 = vsub.s32 %v3806_v63, %v3791_v58 }
 0x48a   : > { %v3759_v3 = vsel %vm3746_vm3, %v3758_v56, %v3757_v29  ;;  %v3761_v35 = vrot.slane %v3715_v13, 5  ;;  %v3778_v5 = vsel %vm3748_vm1, %v3776_v6, %v3777_v33 }
 0x48b   : > { %v3760_v21 = vsel %vm3748_vm1, %v3758_v56, %v3759_v3  ;;  %v3780_v32 = vsel %vm3751_vm7, %v3779_v14, %v3778_v5 }
 0x48c   : > { %v3762_v20 = vsel %vm3751_vm7, %v3761_v35, %v3760_v21  ;;  %v3781_v10 = vsel %vm3753_vm8, %v3779_v14, %v3780_v32 }
 0x48d   : > { %v3763_v49 = vsel %vm3753_vm8, %v3761_v35, %v3762_v20 }
 0x48e   : > { %v3794_v50 = vcombine.low %v3763_v49, %v3781_v10 }
 0x490   : > { %v3801_v15 = vrot.slane %v3794_v50, %v3792_v22 }
 0x492   : > { %v3803_v7 = vcombine.high %v3793_v46, %v3801_v15  ;;  %v3802_v4 = vcombine.low %v3793_v46, %v3801_v15 }
 0x494   : > { %v3817_v47 = vrot.slane %v3803_v7, %v3809_v55  ;;  %v3810_v2 = vrot.slane %v3802_v4, %v3809_v55 }
 0x496   : > { %3825 = vrot.lane.b32.xlu1 %v3817_v47, %s4183_s7  ;;  %v3818_v48 = vcombine.high %v3810_v2, %v4184_v36  ;;  %v3819_v34 = vcombine.high %v3817_v47, %v4184_v36 }
 0x498   : > { %3821 = vrot.lane.b32.xlu0 %v3818_v48, %s4171_s10 }
 0x49c   : > { %3829 = vrot.lane.b32.xlu0 %v3819_v34, %s4185_s8 }
 0x508   : > { %v3826_v44 = vpop.permute.xlu1 %3825 }
 0x50a   : > { %v3822_v45 = vpop.permute.xlu0 %3821 }
 0x50b   : > { %v3833_v26 = vsel %vm3832_vm9, %v3810_v2, %v3822_v45 }
 0x50c   : > { %v3835_v29 = vsel %vm3834_vm10, %v3833_v26, %v3826_v44 }
 0x50e   : > { %v3830_v59 = vpop.permute.xlu0 %3829 }
 0x50f   : > { %v3837_v25 = vsel %vm3836_vm11, %v3835_v29, %v3830_v59 }
 0x510   : > { %3839 = vst.msk [vmem:[%s195_s13] sm:$0xf] %vm3838_vm12, %v3837_v25 }
 0x511 PF: > { %s14_s15 = sadd.s32 1, %s4154_s15  }
 0x512   : > { %p11_p4 = scmp.ge.s32.totalorder %s14_s15, 6  }
 0x514   :  { %13 = sbr.rel (!%p11_p4) target bundleno = 1 (0x1), region = 66 }

</bundles_post_ra>
